<compile_context>
chip_gen: v6e
topology: v6e:2x2x1
jax: 0.10.0
libtpu: 0.0.40
codegen_flags: <defaults>
</compile_context>

<pallas_src>
import functools
import math

import jax
import jax.numpy as jnp
from jax.experimental import pallas as pl
from jax.experimental.pallas import tpu as pltpu  # noqa: F401  (TPU backend)

_INV_SQRT2 = 0.7071067811865476
MATMUL_DTYPE = jnp.bfloat16   # bf16 MXU operands, fp32 accumulate
_SLAB_W = 512                 # lane width of the packed bias/LN-vector slab
_NEG_INF = -1e9


def _round_up(x, m):
    return (x + m - 1) // m * m


# ----------------------------- fused kernel --------------------------------

def _fused_forward_kernel(xcat_ref, emb_ref, bias_ref, slab_ref, *rest,
                          wnames, vec_rows, B, S, nH, H, n_layers,
                          cls_true_dims):
    out_ref = rest[-1]
    w = dict(zip(wnames, rest[:-1]))
    f32 = jnp.float32
    M = B * S
    dh = H // nH

    def vec(name, width):
        r = vec_rows[name]
        return slab_ref[r:r + 1, 0:width]                       # (1, width) f32

    def mm(x, wname, bname):
        wm = w[wname][...]
        y = jnp.dot(x.astype(wm.dtype), wm, preferred_element_type=f32)
        return y + vec(bname, wm.shape[-1])

    def ln(x, gname, bname, eps, n=None):
        width = x.shape[-1]
        g = vec(gname, width)
        b = vec(bname, width)
        if n is None or n == width:
            mu = jnp.mean(x, axis=-1, keepdims=True)
            xc = x - mu
            var = jnp.mean(xc * xc, axis=-1, keepdims=True)
            return xc * jax.lax.rsqrt(var + eps) * g + b
        # lane-padded activation: statistics over the true feature count only
        # (padded lanes are exactly zero, so sums are unaffected).
        inv_n = 1.0 / n
        mu = jnp.sum(x, axis=-1, keepdims=True) * inv_n
        var = jnp.sum(x * x, axis=-1, keepdims=True) * inv_n - mu * mu
        return (x - mu) * jax.lax.rsqrt(var + eps) * g + b

    def gelu(x):
        # exact (erf-based) GELU -- matches torch.nn.GELU() / HF "gelu"
        return 0.5 * x * (1.0 + jax.lax.erf(x * _INV_SQRT2))

    xcat = xcat_ref[...].astype(f32)                            # (M, 2*Pp)
    Pp = xcat.shape[-1] // 2

    # --- modality projections fused into one block-diagonal matmul, then the
    #     shared LayerNorm (eps=1e-5) per half ---
    proj = mm(xcat, "proj_w", "proj_b")                         # (M, 2*Pp)
    nt = ln(proj[:, 0:Pp], "norm_g", "norm_b", 1e-5)
    nv = ln(proj[:, Pp:2 * Pp], "norm_g", "norm_b", 1e-5)
    cat = jnp.concatenate([nt, nv], axis=-1)

    # --- fusion MLP: Linear -> LN -> GELU -> Linear -> LN -> GELU -> Linear ---
    f = gelu(ln(mm(cat, "f0_w", "f0_b"), "f0_ln_g", "f0_ln_b", 1e-5))
    f = gelu(ln(mm(f, "f1_w", "f1_b"), "f1_ln_g", "f1_ln_b", 1e-5))
    fused = mm(f, "f2_w", "f2_b")                               # (M, H)

    # --- BERT embeddings: pos + token_type(0) precomputed host-side, LN 1e-12 ---
    h = ln(fused + emb_ref[...], "emb_ln_g", "emb_ln_b", 1e-12)

    # (head, batch)-block-diagonal additive bias (includes the key mask)
    bias = bias_ref[...]                                        # (nH*M, nH*M)

    # --- BERT encoder layers ---
    for li in range(n_layers):
        pre = f"L{li}_"
        qkv = mm(h, pre + "qkv_w", pre + "qkv_b")               # (M, 3H)
        q = qkv[:, 0:H]                                         # scale folded into W_q
        k = qkv[:, H:2 * H]
        v = qkv[:, 2 * H:3 * H]

        # head-stacked (sublane) layout: (nH*M, dh)
        q_stk = jnp.concatenate(
            [q[:, hh * dh:(hh + 1) * dh] for hh in range(nH)], axis=0)
        k_stk = jnp.concatenate(
            [k[:, hh * dh:(hh + 1) * dh] for hh in range(nH)], axis=0)
        v_stk = jnp.concatenate(
            [v[:, hh * dh:(hh + 1) * dh] for hh in range(nH)], axis=0)

        # ONE scores matmul + ONE PV matmul for ALL (batch, head) pairs;
        # cross-head / cross-batch / masked-key terms are killed by the bias.
        s = jax.lax.dot_general(
            q_stk.astype(MATMUL_DTYPE), k_stk.astype(MATMUL_DTYPE),
            (((1,), (1,)), ((), ())), preferred_element_type=f32)   # (nH*M, nH*M)
        s = s + bias
        s = s - jnp.max(s, axis=-1, keepdims=True)
        e = jnp.exp(s)
        inv = pl.reciprocal(jnp.sum(e, axis=-1, keepdims=True), approx=True)
        p_attn = e * inv
        ctx_stk = jnp.dot(p_attn.astype(MATMUL_DTYPE),
                          v_stk.astype(MATMUL_DTYPE),
                          preferred_element_type=f32)               # (nH*M, dh)
        ctx = jnp.concatenate(
            [ctx_stk[hh * M:(hh + 1) * M, :] for hh in range(nH)], axis=-1)  # (M, H)

        attn_out = mm(ctx, pre + "ao_w", pre + "ao_b")
        h1 = ln(attn_out + h, pre + "ao_ln_g", pre + "ao_ln_b", 1e-12)
        inter = gelu(mm(h1, pre + "i_w", pre + "i_b"))
        ffn = mm(inter, pre + "o_w", pre + "o_b")
        h = ln(ffn + h1, pre + "o_ln_g", pre + "o_ln_b", 1e-12)

    # --- classifier head (lane-padded to 128; LN stats use true dims) ---
    c1_dim, c2_dim = cls_true_dims
    c = mm(h, "c0_w", "c0_b")
    c = mm(c, "c1_w", "c1_b")
    c = gelu(ln(c, "c1_ln_g", "c1_ln_b", 1e-5, n=c1_dim))
    c = mm(c, "c2_w", "c2_b")
    c = gelu(ln(c, "c2_ln_g", "c2_ln_b", 1e-5, n=c2_dim))
    logits = mm(c, "c3_w", "c3_b")                              # (M, 128) padded
    out_ref[...] = logits.astype(out_ref.dtype)

    # TODO(synk): nn.Dropout(p=0.3) layers are identity (eval/inference semantics).


# ----------------------------- parameters ----------------------------------

CFG = dict(
    textual_feature_dim=96,
    visual_feature_dim=64,
    bert_input_dim=128,
    projection_dim=128,
    num_hidden_layers=2,
    num_attention_heads=4,
    num_classes=4,
    hidden_dim=64,
    max_position_embeddings=64,   # HF default is 1024; only first S rows are used
)


def _init_linear(key, fan_in, fan_out):
    w = jax.random.normal(key, (fan_in, fan_out), jnp.float32) * 0.02
    b = jnp.zeros((fan_out,), jnp.float32)
    return w, b


def init_params(key, cfg):
    H = cfg["bert_input_dim"]
    P = cfg["projection_dim"]
    Hd = cfg["hidden_dim"]
    concat = 2 * P
    fusion_dims = [concat * 2, concat // 2, H]
    inter = 4 * H
    keys = iter(jax.random.split(key, 64))

    p = {}
    p["txt_w"], p["txt_b"] = _init_linear(next(keys), cfg["textual_feature_dim"], P)
    p["vis_w"], p["vis_b"] = _init_linear(next(keys), cfg["visual_feature_dim"], P)
    p["norm_g"], p["norm_b"] = jnp.ones((P,), jnp.float32), jnp.zeros((P,), jnp.float32)
    p["f0_w"], p["f0_b"] = _init_linear(next(keys), concat, fusion_dims[0])
    p["f0_ln_g"], p["f0_ln_b"] = jnp.ones((fusion_dims[0],)), jnp.zeros((fusion_dims[0],))
    p["f1_w"], p["f1_b"] = _init_linear(next(keys), fusion_dims[0], fusion_dims[1])
    p["f1_ln_g"], p["f1_ln_b"] = jnp.ones((fusion_dims[1],)), jnp.zeros((fusion_dims[1],))
    p["f2_w"], p["f2_b"] = _init_linear(next(keys), fusion_dims[1], fusion_dims[2])
    p["pos_emb"] = jax.random.normal(next(keys), (cfg["max_position_embeddings"], H),
                                     jnp.float32) * 0.02
    p["tok_emb"] = jax.random.normal(next(keys), (2, H), jnp.float32) * 0.02
    p["emb_ln_g"], p["emb_ln_b"] = jnp.ones((H,)), jnp.zeros((H,))
    layers = []
    for _ in range(cfg["num_hidden_layers"]):
        lp = {}
        lp["q_w"], lp["q_b"] = _init_linear(next(keys), H, H)
        lp["k_w"], lp["k_b"] = _init_linear(next(keys), H, H)
        lp["v_w"], lp["v_b"] = _init_linear(next(keys), H, H)
        lp["ao_w"], lp["ao_b"] = _init_linear(next(keys), H, H)
        lp["ao_ln_g"], lp["ao_ln_b"] = jnp.ones((H,)), jnp.zeros((H,))
        lp["i_w"], lp["i_b"] = _init_linear(next(keys), H, inter)
        lp["o_w"], lp["o_b"] = _init_linear(next(keys), inter, H)
        lp["o_ln_g"], lp["o_ln_b"] = jnp.ones((H,)), jnp.zeros((H,))
        layers.append(lp)
    p["layers"] = layers
    c0 = (H + Hd) // 2
    p["c0_w"], p["c0_b"] = _init_linear(next(keys), H, c0)
    p["c1_w"], p["c1_b"] = _init_linear(next(keys), c0, Hd)
    p["c1_ln_g"], p["c1_ln_b"] = jnp.ones((Hd,)), jnp.zeros((Hd,))
    p["c2_w"], p["c2_b"] = _init_linear(next(keys), Hd, Hd // 2)
    p["c2_ln_g"], p["c2_ln_b"] = jnp.ones((Hd // 2,)), jnp.zeros((Hd // 2,))
    p["c3_w"], p["c3_b"] = _init_linear(next(keys), Hd // 2, cfg["num_classes"])
    return p


def pack_params(params, cfg):
    """One-time host-side packing: fuse/pad weights, fold the attention scale,
    and pack every small bias / LN vector into a single f32 slab."""
    H = cfg["bert_input_dim"]
    P = cfg["projection_dim"]
    nH = cfg["num_attention_heads"]
    dh = H // nH
    Hd = cfg["hidden_dim"]
    Dt = cfg["textual_feature_dim"]
    Dv = cfg["visual_feature_dim"]
    Dt_p = _round_up(Dt, 128)
    Dv_p = _round_up(Dv, 128)
    LANE = 128
    f32 = jnp.float32

    def pad2(a, rows, cols):
        out = jnp.zeros((rows, cols), f32)
        return out.at[:a.shape[0], :a.shape[1]].set(a.astype(f32))

    vec_rows, rows = {}, []

    def addv(name, v):
        v = jnp.asarray(v, f32).reshape(-1)
        assert v.shape[0] <= _SLAB_W
        vec_rows[name] = len(rows)
        rows.append(jnp.zeros((_SLAB_W,), f32).at[:v.shape[0]].set(v))

    wnames, warrays = [], []

    def addw(name, a):
        wnames.append(name)
        warrays.append(jnp.asarray(a, f32).astype(MATMUL_DTYPE))

    # modality projections fused into one block-diagonal weight
    proj_w = jnp.zeros((Dt_p + Dv_p, 2 * P), f32)
    proj_w = proj_w.at[:Dt, :P].set(params["txt_w"])
    proj_w = proj_w.at[Dt_p:Dt_p + Dv, P:].set(params["vis_w"])
    addw("proj_w", proj_w)
    addv("proj_b", jnp.concatenate([params["txt_b"], params["vis_b"]]))
    addv("norm_g", params["norm_g"]); addv("norm_b", params["norm_b"])

    addw("f0_w", params["f0_w"]); addv("f0_b", params["f0_b"])
    addv("f0_ln_g", params["f0_ln_g"]); addv("f0_ln_b", params["f0_ln_b"])
    addw("f1_w", params["f1_w"]); addv("f1_b", params["f1_b"])
    addv("f1_ln_g", params["f1_ln_g"]); addv("f1_ln_b", params["f1_ln_b"])
    addw("f2_w", params["f2_w"]); addv("f2_b", params["f2_b"])

    addv("emb_ln_g", params["emb_ln_g"]); addv("emb_ln_b", params["emb_ln_b"])

    scale = 1.0 / math.sqrt(dh)
    for li, lp in enumerate(params["layers"]):
        pre = f"L{li}_"
        # fuse QKV; fold 1/sqrt(dh) into the Q columns (f32, before bf16 cast)
        qkv_w = jnp.concatenate([lp["q_w"] * scale, lp["k_w"], lp["v_w"]], axis=1)
        qkv_b = jnp.concatenate([lp["q_b"] * scale, lp["k_b"], lp["v_b"]])
        addw(pre + "qkv_w", qkv_w); addv(pre + "qkv_b", qkv_b)
        addw(pre + "ao_w", lp["ao_w"]); addv(pre + "ao_b", lp["ao_b"])
        addv(pre + "ao_ln_g", lp["ao_ln_g"]); addv(pre + "ao_ln_b", lp["ao_ln_b"])
        addw(pre + "i_w", lp["i_w"]); addv(pre + "i_b", lp["i_b"])
        addw(pre + "o_w", lp["o_w"]); addv(pre + "o_b", lp["o_b"])
        addv(pre + "o_ln_g", lp["o_ln_g"]); addv(pre + "o_ln_b", lp["o_ln_b"])

    # classifier: lane-pad every stage to 128 so all vector ops / the final
    # store are lane-dense (padded weight rows/cols and LN gamma/beta are zero)
    addw("c0_w", pad2(params["c0_w"], H, LANE)); addv("c0_b", params["c0_b"])
    addw("c1_w", pad2(params["c1_w"], LANE, LANE)); addv("c1_b", params["c1_b"])
    addv("c1_ln_g", params["c1_ln_g"]); addv("c1_ln_b", params["c1_ln_b"])
    addw("c2_w", pad2(params["c2_w"], LANE, LANE)); addv("c2_b", params["c2_b"])
    addv("c2_ln_g", params["c2_ln_g"]); addv("c2_ln_b", params["c2_ln_b"])
    addw("c3_w", pad2(params["c3_w"], LANE, LANE)); addv("c3_b", params["c3_b"])

    n = len(rows)
    slab = jnp.zeros((_round_up(max(n, 8), 8), _SLAB_W), f32).at[:n].set(jnp.stack(rows))

    return dict(
        wnames=tuple(wnames), warrays=tuple(warrays),
        slab=slab, vec_rows=dict(vec_rows),
        pos_emb=jnp.asarray(params["pos_emb"], f32),
        tok_emb=jnp.asarray(params["tok_emb"], f32),
        cls_true_dims=(Hd, Hd // 2),
        dt_pad=Dt_p, dv_pad=Dv_p,
    )


# ------------------------------- forward -----------------------------------

def forward(packed, cfg, textual_features, visual_features, attention_mask):
    B, S, Dt = textual_features.shape
    Dv = visual_features.shape[-1]
    M = B * S
    H = cfg["bert_input_dim"]
    nH = cfg["num_attention_heads"]
    nC = cfg["num_classes"]
    n_layers = cfg["num_hidden_layers"]
    assert S <= packed["pos_emb"].shape[0], "sequence longer than max_position_embeddings"
    assert nC <= 128
    f32 = jnp.float32
    Dt_p, Dv_p = packed["dt_pad"], packed["dv_pad"]

    # lane-padded concatenated modality input (one operand, one fused matmul)
    txt2d = textual_features.reshape(M, Dt).astype(f32)
    vis2d = visual_features.reshape(M, Dv).astype(f32)
    xcat = jnp.zeros((M, Dt_p + Dv_p), f32)
    xcat = xcat.at[:, :Dt].set(txt2d).at[:, Dt_p:Dt_p + Dv].set(vis2d)

    # position + token_type(0) embeddings, broadcast to all batches host-side
    emb = jnp.tile(packed["pos_emb"][:S, :] + packed["tok_emb"][0:1, :], (B, 1))

    # (head, batch)-block-diagonal additive attention bias incl. the key mask.
    # Finite -1e9 keeps fully-masked rows NaN-free after max-subtraction.
    r = jnp.arange(nH * M)
    head = r // M
    bat = (r % M) // S
    key_ok = jnp.tile(attention_mask.reshape(M).astype(f32) > 0.5, (nH,))
    valid = ((head[:, None] == head[None, :]) &
             (bat[:, None] == bat[None, :]) & key_ok[None, :])
    attn_bias = jnp.where(valid, 0.0, _NEG_INF).astype(f32)

    kernel = functools.partial(
        _fused_forward_kernel,
        wnames=packed["wnames"], vec_rows=packed["vec_rows"],
        B=B, S=S, nH=nH, H=H, n_layers=n_layers,
        cls_true_dims=packed["cls_true_dims"])

    out_pad = pl.pallas_call(
        kernel,
        out_shape=jax.ShapeDtypeStruct((M, 128), jnp.float32),
    )(xcat, emb, attn_bias, packed["slab"], *packed["warrays"])

    return out_pad[:, :nC].reshape(B, S, nC)


if __name__ == "__main__":
    cfg = CFG
    B, S = 2, 8
    key = jax.random.PRNGKey(0)
    kp, kt, kv = jax.random.split(key, 3)
    params = init_params(kp, cfg)
    packed = pack_params(params, cfg)   # one-time host-side packing

    textual = jax.random.normal(kt, (B, S, cfg["textual_feature_dim"]), jnp.float32)
    visual = jax.random.normal(kv, (B, S, cfg["visual_feature_dim"]), jnp.float32)
    # mask out the last two tokens of the second sequence to exercise masking
    attention_mask = jnp.ones((B, S), jnp.float32).at[1, 6:].set(0.0)

    logits = forward(packed, cfg, textual, visual, attention_mask)
    jax.block_until_ready(logits)
    assert logits.shape == (B, S, cfg["num_classes"])
    assert bool(jnp.all(jnp.isfinite(logits)))
    print("KERNEL_OK")
</pallas_src>

<mosaic_0001>
module attributes {stable_mosaic.version = 11 : i64} {
  func.func @_fused_forward_kernel(%arg0: memref<16x256xf32, #tpu.memory_space<vmem>>, %arg1: memref<16x128xf32, #tpu.memory_space<vmem>>, %arg2: memref<64x64xf32, #tpu.memory_space<vmem>>, %arg3: memref<40x512xf32, #tpu.memory_space<vmem>>, %arg4: memref<256x256xbf16, #tpu.memory_space<vmem>>, %arg5: memref<256x512xbf16, #tpu.memory_space<vmem>>, %arg6: memref<512x128xbf16, #tpu.memory_space<vmem>>, %arg7: memref<128x128xbf16, #tpu.memory_space<vmem>>, %arg8: memref<128x384xbf16, #tpu.memory_space<vmem>>, %arg9: memref<128x128xbf16, #tpu.memory_space<vmem>>, %arg10: memref<128x512xbf16, #tpu.memory_space<vmem>>, %arg11: memref<512x128xbf16, #tpu.memory_space<vmem>>, %arg12: memref<128x384xbf16, #tpu.memory_space<vmem>>, %arg13: memref<128x128xbf16, #tpu.memory_space<vmem>>, %arg14: memref<128x512xbf16, #tpu.memory_space<vmem>>, %arg15: memref<512x128xbf16, #tpu.memory_space<vmem>>, %arg16: memref<128x128xbf16, #tpu.memory_space<vmem>>, %arg17: memref<128x128xbf16, #tpu.memory_space<vmem>>, %arg18: memref<128x128xbf16, #tpu.memory_space<vmem>>, %arg19: memref<128x128xbf16, #tpu.memory_space<vmem>>, %arg20: memref<16x128xf32, #tpu.memory_space<vmem>>) attributes {dimension_semantics = [], scalar_prefetch = 0 : i64, scratch_operands = 0 : i64, tpu.core_type = #tpu.core_type<tc>} {
    %c0 = arith.constant 0 : index
    %c0_0 = arith.constant 0 : index
    %0 = vector.load %arg0[%c0, %c0_0] : memref<16x256xf32, #tpu.memory_space<vmem>>, vector<16x256xf32>
    %c0_1 = arith.constant 0 : index
    %c0_2 = arith.constant 0 : index
    %1 = vector.load %arg4[%c0_1, %c0_2] : memref<256x256xbf16, #tpu.memory_space<vmem>>, vector<256x256xbf16>
    %2 = arith.truncf %0 : vector<16x256xf32> to vector<16x256xbf16>
    %cst = arith.constant dense<0.000000e+00> : vector<16x256xf32>
    %3 = tpu.matmul %2, %1, %cst {dimension_numbers = #tpu.dot_dimension_numbers<[1], [0], [0], [1], [0, 0, 1, 1], [], []>} : vector<16x256xbf16>, vector<256x256xbf16>, vector<16x256xf32> -> vector<16x256xf32>
    %c0_3 = arith.constant 0 : index
    %c0_4 = arith.constant 0 : index
    %4 = vector.load %arg3[%c0_3, %c0_4] : memref<40x512xf32, #tpu.memory_space<vmem>>, vector<1x256xf32>
    %5 = vector.broadcast %4 : vector<1x256xf32> to vector<16x256xf32>
    %6 = arith.addf %3, %5 : vector<16x256xf32>
    %7 = vector.extract_strided_slice %6 {offsets = [0, 0], sizes = [16, 128], strides = [1, 1]} : vector<16x256xf32> to vector<16x128xf32>
    %c1 = arith.constant 1 : index
    %c0_5 = arith.constant 0 : index
    %8 = vector.load %arg3[%c1, %c0_5] : memref<40x512xf32, #tpu.memory_space<vmem>>, vector<1x128xf32>
    %c2 = arith.constant 2 : index
    %c0_6 = arith.constant 0 : index
    %9 = vector.load %arg3[%c2, %c0_6] : memref<40x512xf32, #tpu.memory_space<vmem>>, vector<1x128xf32>
    %cst_7 = arith.constant dense<0.000000e+00> : vector<16xf32>
    %10 = vector.multi_reduction <add>, %7, %cst_7 [1] : vector<16x128xf32> to vector<16xf32>
    %11 = vector.shape_cast %10 : vector<16xf32> to vector<16x1xf32>
    %cst_8 = arith.constant 1.280000e+02 : f32
    %12 = vector.broadcast %cst_8 : f32 to vector<16x1xf32>
    %13 = arith.divf %11, %12 : vector<16x1xf32>
    %14 = vector.broadcast %13 : vector<16x1xf32> to vector<16x128xf32>
    %15 = arith.subf %7, %14 : vector<16x128xf32>
    %16 = arith.mulf %15, %15 : vector<16x128xf32>
    %cst_9 = arith.constant dense<0.000000e+00> : vector<16xf32>
    %17 = vector.multi_reduction <add>, %16, %cst_9 [1] : vector<16x128xf32> to vector<16xf32>
    %18 = vector.shape_cast %17 : vector<16xf32> to vector<16x1xf32>
    %cst_10 = arith.constant 1.280000e+02 : f32
    %19 = vector.broadcast %cst_10 : f32 to vector<16x1xf32>
    %20 = arith.divf %18, %19 : vector<16x1xf32>
    %cst_11 = arith.constant 9.99999974E-6 : f32
    %21 = vector.broadcast %cst_11 : f32 to vector<16x1xf32>
    %22 = arith.addf %20, %21 : vector<16x1xf32>
    %23 = math.rsqrt %22 : vector<16x1xf32>
    %24 = vector.broadcast %23 : vector<16x1xf32> to vector<16x128xf32>
    %25 = arith.mulf %15, %24 : vector<16x128xf32>
    %26 = vector.broadcast %8 : vector<1x128xf32> to vector<16x128xf32>
    %27 = arith.mulf %25, %26 : vector<16x128xf32>
    %28 = vector.broadcast %9 : vector<1x128xf32> to vector<16x128xf32>
    %29 = arith.addf %27, %28 : vector<16x128xf32>
    %30 = vector.extract_strided_slice %6 {offsets = [0, 128], sizes = [16, 128], strides = [1, 1]} : vector<16x256xf32> to vector<16x128xf32>
    %c1_12 = arith.constant 1 : index
    %c0_13 = arith.constant 0 : index
    %31 = vector.load %arg3[%c1_12, %c0_13] : memref<40x512xf32, #tpu.memory_space<vmem>>, vector<1x128xf32>
    %c2_14 = arith.constant 2 : index
    %c0_15 = arith.constant 0 : index
    %32 = vector.load %arg3[%c2_14, %c0_15] : memref<40x512xf32, #tpu.memory_space<vmem>>, vector<1x128xf32>
    %cst_16 = arith.constant dense<0.000000e+00> : vector<16xf32>
    %33 = vector.multi_reduction <add>, %30, %cst_16 [1] : vector<16x128xf32> to vector<16xf32>
    %34 = vector.shape_cast %33 : vector<16xf32> to vector<16x1xf32>
    %cst_17 = arith.constant 1.280000e+02 : f32
    %35 = vector.broadcast %cst_17 : f32 to vector<16x1xf32>
    %36 = arith.divf %34, %35 : vector<16x1xf32>
    %37 = vector.broadcast %36 : vector<16x1xf32> to vector<16x128xf32>
    %38 = arith.subf %30, %37 : vector<16x128xf32>
    %39 = arith.mulf %38, %38 : vector<16x128xf32>
    %cst_18 = arith.constant dense<0.000000e+00> : vector<16xf32>
    %40 = vector.multi_reduction <add>, %39, %cst_18 [1] : vector<16x128xf32> to vector<16xf32>
    %41 = vector.shape_cast %40 : vector<16xf32> to vector<16x1xf32>
    %cst_19 = arith.constant 1.280000e+02 : f32
    %42 = vector.broadcast %cst_19 : f32 to vector<16x1xf32>
    %43 = arith.divf %41, %42 : vector<16x1xf32>
    %cst_20 = arith.constant 9.99999974E-6 : f32
    %44 = vector.broadcast %cst_20 : f32 to vector<16x1xf32>
    %45 = arith.addf %43, %44 : vector<16x1xf32>
    %46 = math.rsqrt %45 : vector<16x1xf32>
    %47 = vector.broadcast %46 : vector<16x1xf32> to vector<16x128xf32>
    %48 = arith.mulf %38, %47 : vector<16x128xf32>
    %49 = vector.broadcast %31 : vector<1x128xf32> to vector<16x128xf32>
    %50 = arith.mulf %48, %49 : vector<16x128xf32>
    %51 = vector.broadcast %32 : vector<1x128xf32> to vector<16x128xf32>
    %52 = arith.addf %50, %51 : vector<16x128xf32>
    %53 = tpu.concatenate %29, %52 in 1 : vector<16x128xf32>, vector<16x128xf32> -> vector<16x256xf32>
    %c0_21 = arith.constant 0 : index
    %c0_22 = arith.constant 0 : index
    %54 = vector.load %arg5[%c0_21, %c0_22] : memref<256x512xbf16, #tpu.memory_space<vmem>>, vector<256x512xbf16>
    %55 = arith.truncf %53 : vector<16x256xf32> to vector<16x256xbf16>
    %cst_23 = arith.constant dense<0.000000e+00> : vector<16x512xf32>
    %56 = tpu.matmul %55, %54, %cst_23 {dimension_numbers = #tpu.dot_dimension_numbers<[1], [0], [0], [1], [0, 0, 1, 1], [], []>} : vector<16x256xbf16>, vector<256x512xbf16>, vector<16x512xf32> -> vector<16x512xf32>
    %c3 = arith.constant 3 : index
    %c0_24 = arith.constant 0 : index
    %57 = vector.load %arg3[%c3, %c0_24] : memref<40x512xf32, #tpu.memory_space<vmem>>, vector<1x512xf32>
    %58 = vector.broadcast %57 : vector<1x512xf32> to vector<16x512xf32>
    %59 = arith.addf %56, %58 : vector<16x512xf32>
    %c4 = arith.constant 4 : index
    %c0_25 = arith.constant 0 : index
    %60 = vector.load %arg3[%c4, %c0_25] : memref<40x512xf32, #tpu.memory_space<vmem>>, vector<1x512xf32>
    %c5 = arith.constant 5 : index
    %c0_26 = arith.constant 0 : index
    %61 = vector.load %arg3[%c5, %c0_26] : memref<40x512xf32, #tpu.memory_space<vmem>>, vector<1x512xf32>
    %cst_27 = arith.constant dense<0.000000e+00> : vector<16xf32>
    %62 = vector.multi_reduction <add>, %59, %cst_27 [1] : vector<16x512xf32> to vector<16xf32>
    %63 = vector.shape_cast %62 : vector<16xf32> to vector<16x1xf32>
    %cst_28 = arith.constant 5.120000e+02 : f32
    %64 = vector.broadcast %cst_28 : f32 to vector<16x1xf32>
    %65 = arith.divf %63, %64 : vector<16x1xf32>
    %66 = vector.broadcast %65 : vector<16x1xf32> to vector<16x512xf32>
    %67 = arith.subf %59, %66 : vector<16x512xf32>
    %68 = arith.mulf %67, %67 : vector<16x512xf32>
    %cst_29 = arith.constant dense<0.000000e+00> : vector<16xf32>
    %69 = vector.multi_reduction <add>, %68, %cst_29 [1] : vector<16x512xf32> to vector<16xf32>
    %70 = vector.shape_cast %69 : vector<16xf32> to vector<16x1xf32>
    %cst_30 = arith.constant 5.120000e+02 : f32
    %71 = vector.broadcast %cst_30 : f32 to vector<16x1xf32>
    %72 = arith.divf %70, %71 : vector<16x1xf32>
    %cst_31 = arith.constant 9.99999974E-6 : f32
    %73 = vector.broadcast %cst_31 : f32 to vector<16x1xf32>
    %74 = arith.addf %72, %73 : vector<16x1xf32>
    %75 = math.rsqrt %74 : vector<16x1xf32>
    %76 = vector.broadcast %75 : vector<16x1xf32> to vector<16x512xf32>
    %77 = arith.mulf %67, %76 : vector<16x512xf32>
    %78 = vector.broadcast %60 : vector<1x512xf32> to vector<16x512xf32>
    %79 = arith.mulf %77, %78 : vector<16x512xf32>
    %80 = vector.broadcast %61 : vector<1x512xf32> to vector<16x512xf32>
    %81 = arith.addf %79, %80 : vector<16x512xf32>
    %cst_32 = arith.constant 5.000000e-01 : f32
    %82 = vector.broadcast %cst_32 : f32 to vector<16x512xf32>
    %83 = arith.mulf %82, %81 : vector<16x512xf32>
    %cst_33 = arith.constant 0.707106769 : f32
    %84 = vector.broadcast %cst_33 : f32 to vector<16x512xf32>
    %85 = arith.mulf %81, %84 : vector<16x512xf32>
    %86 = math.erf %85 : vector<16x512xf32>
    %cst_34 = arith.constant 1.000000e+00 : f32
    %87 = vector.broadcast %cst_34 : f32 to vector<16x512xf32>
    %88 = arith.addf %87, %86 : vector<16x512xf32>
    %89 = arith.mulf %83, %88 : vector<16x512xf32>
    %c0_35 = arith.constant 0 : index
    %c0_36 = arith.constant 0 : index
    %90 = vector.load %arg6[%c0_35, %c0_36] : memref<512x128xbf16, #tpu.memory_space<vmem>>, vector<512x128xbf16>
    %91 = arith.truncf %89 : vector<16x512xf32> to vector<16x512xbf16>
    %cst_37 = arith.constant dense<0.000000e+00> : vector<16x128xf32>
    %92 = tpu.matmul %91, %90, %cst_37 {dimension_numbers = #tpu.dot_dimension_numbers<[1], [0], [0], [1], [0, 0, 1, 1], [], []>} : vector<16x512xbf16>, vector<512x128xbf16>, vector<16x128xf32> -> vector<16x128xf32>
    %c6 = arith.constant 6 : index
    %c0_38 = arith.constant 0 : index
    %93 = vector.load %arg3[%c6, %c0_38] : memref<40x512xf32, #tpu.memory_space<vmem>>, vector<1x128xf32>
    %94 = vector.broadcast %93 : vector<1x128xf32> to vector<16x128xf32>
    %95 = arith.addf %92, %94 : vector<16x128xf32>
    %c7 = arith.constant 7 : index
    %c0_39 = arith.constant 0 : index
    %96 = vector.load %arg3[%c7, %c0_39] : memref<40x512xf32, #tpu.memory_space<vmem>>, vector<1x128xf32>
    %c8 = arith.constant 8 : index
    %c0_40 = arith.constant 0 : index
    %97 = vector.load %arg3[%c8, %c0_40] : memref<40x512xf32, #tpu.memory_space<vmem>>, vector<1x128xf32>
    %cst_41 = arith.constant dense<0.000000e+00> : vector<16xf32>
    %98 = vector.multi_reduction <add>, %95, %cst_41 [1] : vector<16x128xf32> to vector<16xf32>
    %99 = vector.shape_cast %98 : vector<16xf32> to vector<16x1xf32>
    %cst_42 = arith.constant 1.280000e+02 : f32
    %100 = vector.broadcast %cst_42 : f32 to vector<16x1xf32>
    %101 = arith.divf %99, %100 : vector<16x1xf32>
    %102 = vector.broadcast %101 : vector<16x1xf32> to vector<16x128xf32>
    %103 = arith.subf %95, %102 : vector<16x128xf32>
    %104 = arith.mulf %103, %103 : vector<16x128xf32>
    %cst_43 = arith.constant dense<0.000000e+00> : vector<16xf32>
    %105 = vector.multi_reduction <add>, %104, %cst_43 [1] : vector<16x128xf32> to vector<16xf32>
    %106 = vector.shape_cast %105 : vector<16xf32> to vector<16x1xf32>
    %cst_44 = arith.constant 1.280000e+02 : f32
    %107 = vector.broadcast %cst_44 : f32 to vector<16x1xf32>
    %108 = arith.divf %106, %107 : vector<16x1xf32>
    %cst_45 = arith.constant 9.99999974E-6 : f32
    %109 = vector.broadcast %cst_45 : f32 to vector<16x1xf32>
    %110 = arith.addf %108, %109 : vector<16x1xf32>
    %111 = math.rsqrt %110 : vector<16x1xf32>
    %112 = vector.broadcast %111 : vector<16x1xf32> to vector<16x128xf32>
    %113 = arith.mulf %103, %112 : vector<16x128xf32>
    %114 = vector.broadcast %96 : vector<1x128xf32> to vector<16x128xf32>
    %115 = arith.mulf %113, %114 : vector<16x128xf32>
    %116 = vector.broadcast %97 : vector<1x128xf32> to vector<16x128xf32>
    %117 = arith.addf %115, %116 : vector<16x128xf32>
    %cst_46 = arith.constant 5.000000e-01 : f32
    %118 = vector.broadcast %cst_46 : f32 to vector<16x128xf32>
    %119 = arith.mulf %118, %117 : vector<16x128xf32>
    %cst_47 = arith.constant 0.707106769 : f32
    %120 = vector.broadcast %cst_47 : f32 to vector<16x128xf32>
    %121 = arith.mulf %117, %120 : vector<16x128xf32>
    %122 = math.erf %121 : vector<16x128xf32>
    %cst_48 = arith.constant 1.000000e+00 : f32
    %123 = vector.broadcast %cst_48 : f32 to vector<16x128xf32>
    %124 = arith.addf %123, %122 : vector<16x128xf32>
    %125 = arith.mulf %119, %124 : vector<16x128xf32>
    %c0_49 = arith.constant 0 : index
    %c0_50 = arith.constant 0 : index
    %126 = vector.load %arg7[%c0_49, %c0_50] : memref<128x128xbf16, #tpu.memory_space<vmem>>, vector<128x128xbf16>
    %127 = arith.truncf %125 : vector<16x128xf32> to vector<16x128xbf16>
    %cst_51 = arith.constant dense<0.000000e+00> : vector<16x128xf32>
    %128 = tpu.matmul %127, %126, %cst_51 {dimension_numbers = #tpu.dot_dimension_numbers<[1], [0], [0], [1], [0, 0, 1, 1], [], []>} : vector<16x128xbf16>, vector<128x128xbf16>, vector<16x128xf32> -> vector<16x128xf32>
    %c9 = arith.constant 9 : index
    %c0_52 = arith.constant 0 : index
    %129 = vector.load %arg3[%c9, %c0_52] : memref<40x512xf32, #tpu.memory_space<vmem>>, vector<1x128xf32>
    %130 = vector.broadcast %129 : vector<1x128xf32> to vector<16x128xf32>
    %131 = arith.addf %128, %130 : vector<16x128xf32>
    %c0_53 = arith.constant 0 : index
    %c0_54 = arith.constant 0 : index
    %132 = vector.load %arg1[%c0_53, %c0_54] : memref<16x128xf32, #tpu.memory_space<vmem>>, vector<16x128xf32>
    %133 = arith.addf %131, %132 : vector<16x128xf32>
    %c10 = arith.constant 10 : index
    %c0_55 = arith.constant 0 : index
    %134 = vector.load %arg3[%c10, %c0_55] : memref<40x512xf32, #tpu.memory_space<vmem>>, vector<1x128xf32>
    %c11 = arith.constant 11 : index
    %c0_56 = arith.constant 0 : index
    %135 = vector.load %arg3[%c11, %c0_56] : memref<40x512xf32, #tpu.memory_space<vmem>>, vector<1x128xf32>
    %cst_57 = arith.constant dense<0.000000e+00> : vector<16xf32>
    %136 = vector.multi_reduction <add>, %133, %cst_57 [1] : vector<16x128xf32> to vector<16xf32>
    %137 = vector.shape_cast %136 : vector<16xf32> to vector<16x1xf32>
    %cst_58 = arith.constant 1.280000e+02 : f32
    %138 = vector.broadcast %cst_58 : f32 to vector<16x1xf32>
    %139 = arith.divf %137, %138 : vector<16x1xf32>
    %140 = vector.broadcast %139 : vector<16x1xf32> to vector<16x128xf32>
    %141 = arith.subf %133, %140 : vector<16x128xf32>
    %142 = arith.mulf %141, %141 : vector<16x128xf32>
    %cst_59 = arith.constant dense<0.000000e+00> : vector<16xf32>
    %143 = vector.multi_reduction <add>, %142, %cst_59 [1] : vector<16x128xf32> to vector<16xf32>
    %144 = vector.shape_cast %143 : vector<16xf32> to vector<16x1xf32>
    %cst_60 = arith.constant 1.280000e+02 : f32
    %145 = vector.broadcast %cst_60 : f32 to vector<16x1xf32>
    %146 = arith.divf %144, %145 : vector<16x1xf32>
    %cst_61 = arith.constant 9.99999996E-13 : f32
    %147 = vector.broadcast %cst_61 : f32 to vector<16x1xf32>
    %148 = arith.addf %146, %147 : vector<16x1xf32>
    %149 = math.rsqrt %148 : vector<16x1xf32>
    %150 = vector.broadcast %149 : vector<16x1xf32> to vector<16x128xf32>
    %151 = arith.mulf %141, %150 : vector<16x128xf32>
    %152 = vector.broadcast %134 : vector<1x128xf32> to vector<16x128xf32>
    %153 = arith.mulf %151, %152 : vector<16x128xf32>
    %154 = vector.broadcast %135 : vector<1x128xf32> to vector<16x128xf32>
    %155 = arith.addf %153, %154 : vector<16x128xf32>
    %c0_62 = arith.constant 0 : index
    %c0_63 = arith.constant 0 : index
    %156 = vector.load %arg2[%c0_62, %c0_63] : memref<64x64xf32, #tpu.memory_space<vmem>>, vector<64x64xf32>
    %c0_64 = arith.constant 0 : index
    %c0_65 = arith.constant 0 : index
    %157 = vector.load %arg8[%c0_64, %c0_65] : memref<128x384xbf16, #tpu.memory_space<vmem>>, vector<128x384xbf16>
    %158 = arith.truncf %155 : vector<16x128xf32> to vector<16x128xbf16>
    %cst_66 = arith.constant dense<0.000000e+00> : vector<16x384xf32>
    %159 = tpu.matmul %158, %157, %cst_66 {dimension_numbers = #tpu.dot_dimension_numbers<[1], [0], [0], [1], [0, 0, 1, 1], [], []>} : vector<16x128xbf16>, vector<128x384xbf16>, vector<16x384xf32> -> vector<16x384xf32>
    %c12 = arith.constant 12 : index
    %c0_67 = arith.constant 0 : index
    %160 = vector.load %arg3[%c12, %c0_67] : memref<40x512xf32, #tpu.memory_space<vmem>>, vector<1x384xf32>
    %161 = vector.broadcast %160 : vector<1x384xf32> to vector<16x384xf32>
    %162 = arith.addf %159, %161 : vector<16x384xf32>
    %163 = vector.extract_strided_slice %162 {offsets = [0, 0], sizes = [16, 128], strides = [1, 1]} : vector<16x384xf32> to vector<16x128xf32>
    %164 = vector.extract_strided_slice %162 {offsets = [0, 128], sizes = [16, 128], strides = [1, 1]} : vector<16x384xf32> to vector<16x128xf32>
    %165 = vector.extract_strided_slice %162 {offsets = [0, 256], sizes = [16, 128], strides = [1, 1]} : vector<16x384xf32> to vector<16x128xf32>
    %166 = vector.extract_strided_slice %163 {offsets = [0, 0], sizes = [16, 32], strides = [1, 1]} : vector<16x128xf32> to vector<16x32xf32>
    %167 = vector.extract_strided_slice %163 {offsets = [0, 32], sizes = [16, 32], strides = [1, 1]} : vector<16x128xf32> to vector<16x32xf32>
    %168 = vector.extract_strided_slice %163 {offsets = [0, 64], sizes = [16, 32], strides = [1, 1]} : vector<16x128xf32> to vector<16x32xf32>
    %169 = vector.extract_strided_slice %163 {offsets = [0, 96], sizes = [16, 32], strides = [1, 1]} : vector<16x128xf32> to vector<16x32xf32>
    %170 = tpu.concatenate %166, %167, %168, %169 in 0 : vector<16x32xf32>, vector<16x32xf32>, vector<16x32xf32>, vector<16x32xf32> -> vector<64x32xf32>
    %171 = vector.extract_strided_slice %164 {offsets = [0, 0], sizes = [16, 32], strides = [1, 1]} : vector<16x128xf32> to vector<16x32xf32>
    %172 = vector.extract_strided_slice %164 {offsets = [0, 32], sizes = [16, 32], strides = [1, 1]} : vector<16x128xf32> to vector<16x32xf32>
    %173 = vector.extract_strided_slice %164 {offsets = [0, 64], sizes = [16, 32], strides = [1, 1]} : vector<16x128xf32> to vector<16x32xf32>
    %174 = vector.extract_strided_slice %164 {offsets = [0, 96], sizes = [16, 32], strides = [1, 1]} : vector<16x128xf32> to vector<16x32xf32>
    %175 = tpu.concatenate %171, %172, %173, %174 in 0 : vector<16x32xf32>, vector<16x32xf32>, vector<16x32xf32>, vector<16x32xf32> -> vector<64x32xf32>
    %176 = vector.extract_strided_slice %165 {offsets = [0, 0], sizes = [16, 32], strides = [1, 1]} : vector<16x128xf32> to vector<16x32xf32>
    %177 = vector.extract_strided_slice %165 {offsets = [0, 32], sizes = [16, 32], strides = [1, 1]} : vector<16x128xf32> to vector<16x32xf32>
    %178 = vector.extract_strided_slice %165 {offsets = [0, 64], sizes = [16, 32], strides = [1, 1]} : vector<16x128xf32> to vector<16x32xf32>
    %179 = vector.extract_strided_slice %165 {offsets = [0, 96], sizes = [16, 32], strides = [1, 1]} : vector<16x128xf32> to vector<16x32xf32>
    %180 = tpu.concatenate %176, %177, %178, %179 in 0 : vector<16x32xf32>, vector<16x32xf32>, vector<16x32xf32>, vector<16x32xf32> -> vector<64x32xf32>
    %181 = arith.truncf %170 : vector<64x32xf32> to vector<64x32xbf16>
    %182 = arith.truncf %175 : vector<64x32xf32> to vector<64x32xbf16>
    %cst_68 = arith.constant dense<0.000000e+00> : vector<64x64xf32>
    %183 = tpu.matmul %181, %182, %cst_68 {dimension_numbers = #tpu.dot_dimension_numbers<[1], [1], [0], [0], [0, 0, 1, 0], [], []>} : vector<64x32xbf16>, vector<64x32xbf16>, vector<64x64xf32> -> vector<64x64xf32>
    %184 = arith.addf %183, %156 : vector<64x64xf32>
    %cst_69 = arith.constant dense<0xFF800000> : vector<64xf32>
    %185 = vector.multi_reduction <maximumf>, %184, %cst_69 [1] : vector<64x64xf32> to vector<64xf32>
    %186 = vector.shape_cast %185 : vector<64xf32> to vector<64x1xf32>
    %187 = vector.broadcast %186 : vector<64x1xf32> to vector<64x64xf32>
    %188 = arith.subf %184, %187 : vector<64x64xf32>
    %189 = math.exp %188 : vector<64x64xf32>
    %cst_70 = arith.constant dense<0.000000e+00> : vector<64xf32>
    %190 = vector.multi_reduction <add>, %189, %cst_70 [1] : vector<64x64xf32> to vector<64xf32>
    %191 = vector.shape_cast %190 : vector<64xf32> to vector<64x1xf32>
    %192 = tpu.reciprocal %191 {approx = true} : vector<64x1xf32> -> vector<64x1xf32>
    %193 = vector.broadcast %192 : vector<64x1xf32> to vector<64x64xf32>
    %194 = arith.mulf %189, %193 : vector<64x64xf32>
    %195 = arith.truncf %194 : vector<64x64xf32> to vector<64x64xbf16>
    %196 = arith.truncf %180 : vector<64x32xf32> to vector<64x32xbf16>
    %cst_71 = arith.constant dense<0.000000e+00> : vector<64x32xf32>
    %197 = tpu.matmul %195, %196, %cst_71 {dimension_numbers = #tpu.dot_dimension_numbers<[1], [0], [0], [1], [0, 0, 1, 1], [], []>} : vector<64x64xbf16>, vector<64x32xbf16>, vector<64x32xf32> -> vector<64x32xf32>
    %198 = vector.extract_strided_slice %197 {offsets = [0, 0], sizes = [16, 32], strides = [1, 1]} : vector<64x32xf32> to vector<16x32xf32>
    %199 = vector.extract_strided_slice %197 {offsets = [16, 0], sizes = [16, 32], strides = [1, 1]} : vector<64x32xf32> to vector<16x32xf32>
    %200 = vector.extract_strided_slice %197 {offsets = [32, 0], sizes = [16, 32], strides = [1, 1]} : vector<64x32xf32> to vector<16x32xf32>
    %201 = vector.extract_strided_slice %197 {offsets = [48, 0], sizes = [16, 32], strides = [1, 1]} : vector<64x32xf32> to vector<16x32xf32>
    %202 = tpu.concatenate %198, %199, %200, %201 in 1 : vector<16x32xf32>, vector<16x32xf32>, vector<16x32xf32>, vector<16x32xf32> -> vector<16x128xf32>
    %c0_72 = arith.constant 0 : index
    %c0_73 = arith.constant 0 : index
    %203 = vector.load %arg9[%c0_72, %c0_73] : memref<128x128xbf16, #tpu.memory_space<vmem>>, vector<128x128xbf16>
    %204 = arith.truncf %202 : vector<16x128xf32> to vector<16x128xbf16>
    %cst_74 = arith.constant dense<0.000000e+00> : vector<16x128xf32>
    %205 = tpu.matmul %204, %203, %cst_74 {dimension_numbers = #tpu.dot_dimension_numbers<[1], [0], [0], [1], [0, 0, 1, 1], [], []>} : vector<16x128xbf16>, vector<128x128xbf16>, vector<16x128xf32> -> vector<16x128xf32>
    %c13 = arith.constant 13 : index
    %c0_75 = arith.constant 0 : index
    %206 = vector.load %arg3[%c13, %c0_75] : memref<40x512xf32, #tpu.memory_space<vmem>>, vector<1x128xf32>
    %207 = vector.broadcast %206 : vector<1x128xf32> to vector<16x128xf32>
    %208 = arith.addf %205, %207 : vector<16x128xf32>
    %209 = arith.addf %208, %155 : vector<16x128xf32>
    %c14 = arith.constant 14 : index
    %c0_76 = arith.constant 0 : index
    %210 = vector.load %arg3[%c14, %c0_76] : memref<40x512xf32, #tpu.memory_space<vmem>>, vector<1x128xf32>
    %c15 = arith.constant 15 : index
    %c0_77 = arith.constant 0 : index
    %211 = vector.load %arg3[%c15, %c0_77] : memref<40x512xf32, #tpu.memory_space<vmem>>, vector<1x128xf32>
    %cst_78 = arith.constant dense<0.000000e+00> : vector<16xf32>
    %212 = vector.multi_reduction <add>, %209, %cst_78 [1] : vector<16x128xf32> to vector<16xf32>
    %213 = vector.shape_cast %212 : vector<16xf32> to vector<16x1xf32>
    %cst_79 = arith.constant 1.280000e+02 : f32
    %214 = vector.broadcast %cst_79 : f32 to vector<16x1xf32>
    %215 = arith.divf %213, %214 : vector<16x1xf32>
    %216 = vector.broadcast %215 : vector<16x1xf32> to vector<16x128xf32>
    %217 = arith.subf %209, %216 : vector<16x128xf32>
    %218 = arith.mulf %217, %217 : vector<16x128xf32>
    %cst_80 = arith.constant dense<0.000000e+00> : vector<16xf32>
    %219 = vector.multi_reduction <add>, %218, %cst_80 [1] : vector<16x128xf32> to vector<16xf32>
    %220 = vector.shape_cast %219 : vector<16xf32> to vector<16x1xf32>
    %cst_81 = arith.constant 1.280000e+02 : f32
    %221 = vector.broadcast %cst_81 : f32 to vector<16x1xf32>
    %222 = arith.divf %220, %221 : vector<16x1xf32>
    %cst_82 = arith.constant 9.99999996E-13 : f32
    %223 = vector.broadcast %cst_82 : f32 to vector<16x1xf32>
    %224 = arith.addf %222, %223 : vector<16x1xf32>
    %225 = math.rsqrt %224 : vector<16x1xf32>
    %226 = vector.broadcast %225 : vector<16x1xf32> to vector<16x128xf32>
    %227 = arith.mulf %217, %226 : vector<16x128xf32>
    %228 = vector.broadcast %210 : vector<1x128xf32> to vector<16x128xf32>
    %229 = arith.mulf %227, %228 : vector<16x128xf32>
    %230 = vector.broadcast %211 : vector<1x128xf32> to vector<16x128xf32>
    %231 = arith.addf %229, %230 : vector<16x128xf32>
    %c0_83 = arith.constant 0 : index
    %c0_84 = arith.constant 0 : index
    %232 = vector.load %arg10[%c0_83, %c0_84] : memref<128x512xbf16, #tpu.memory_space<vmem>>, vector<128x512xbf16>
    %233 = arith.truncf %231 : vector<16x128xf32> to vector<16x128xbf16>
    %cst_85 = arith.constant dense<0.000000e+00> : vector<16x512xf32>
    %234 = tpu.matmul %233, %232, %cst_85 {dimension_numbers = #tpu.dot_dimension_numbers<[1], [0], [0], [1], [0, 0, 1, 1], [], []>} : vector<16x128xbf16>, vector<128x512xbf16>, vector<16x512xf32> -> vector<16x512xf32>
    %c16 = arith.constant 16 : index
    %c0_86 = arith.constant 0 : index
    %235 = vector.load %arg3[%c16, %c0_86] : memref<40x512xf32, #tpu.memory_space<vmem>>, vector<1x512xf32>
    %236 = vector.broadcast %235 : vector<1x512xf32> to vector<16x512xf32>
    %237 = arith.addf %234, %236 : vector<16x512xf32>
    %cst_87 = arith.constant 5.000000e-01 : f32
    %238 = vector.broadcast %cst_87 : f32 to vector<16x512xf32>
    %239 = arith.mulf %238, %237 : vector<16x512xf32>
    %cst_88 = arith.constant 0.707106769 : f32
    %240 = vector.broadcast %cst_88 : f32 to vector<16x512xf32>
    %241 = arith.mulf %237, %240 : vector<16x512xf32>
    %242 = math.erf %241 : vector<16x512xf32>
    %cst_89 = arith.constant 1.000000e+00 : f32
    %243 = vector.broadcast %cst_89 : f32 to vector<16x512xf32>
    %244 = arith.addf %243, %242 : vector<16x512xf32>
    %245 = arith.mulf %239, %244 : vector<16x512xf32>
    %c0_90 = arith.constant 0 : index
    %c0_91 = arith.constant 0 : index
    %246 = vector.load %arg11[%c0_90, %c0_91] : memref<512x128xbf16, #tpu.memory_space<vmem>>, vector<512x128xbf16>
    %247 = arith.truncf %245 : vector<16x512xf32> to vector<16x512xbf16>
    %cst_92 = arith.constant dense<0.000000e+00> : vector<16x128xf32>
    %248 = tpu.matmul %247, %246, %cst_92 {dimension_numbers = #tpu.dot_dimension_numbers<[1], [0], [0], [1], [0, 0, 1, 1], [], []>} : vector<16x512xbf16>, vector<512x128xbf16>, vector<16x128xf32> -> vector<16x128xf32>
    %c17 = arith.constant 17 : index
    %c0_93 = arith.constant 0 : index
    %249 = vector.load %arg3[%c17, %c0_93] : memref<40x512xf32, #tpu.memory_space<vmem>>, vector<1x128xf32>
    %250 = vector.broadcast %249 : vector<1x128xf32> to vector<16x128xf32>
    %251 = arith.addf %248, %250 : vector<16x128xf32>
    %252 = arith.addf %251, %231 : vector<16x128xf32>
    %c18 = arith.constant 18 : index
    %c0_94 = arith.constant 0 : index
    %253 = vector.load %arg3[%c18, %c0_94] : memref<40x512xf32, #tpu.memory_space<vmem>>, vector<1x128xf32>
    %c19 = arith.constant 19 : index
    %c0_95 = arith.constant 0 : index
    %254 = vector.load %arg3[%c19, %c0_95] : memref<40x512xf32, #tpu.memory_space<vmem>>, vector<1x128xf32>
    %cst_96 = arith.constant dense<0.000000e+00> : vector<16xf32>
    %255 = vector.multi_reduction <add>, %252, %cst_96 [1] : vector<16x128xf32> to vector<16xf32>
    %256 = vector.shape_cast %255 : vector<16xf32> to vector<16x1xf32>
    %cst_97 = arith.constant 1.280000e+02 : f32
    %257 = vector.broadcast %cst_97 : f32 to vector<16x1xf32>
    %258 = arith.divf %256, %257 : vector<16x1xf32>
    %259 = vector.broadcast %258 : vector<16x1xf32> to vector<16x128xf32>
    %260 = arith.subf %252, %259 : vector<16x128xf32>
    %261 = arith.mulf %260, %260 : vector<16x128xf32>
    %cst_98 = arith.constant dense<0.000000e+00> : vector<16xf32>
    %262 = vector.multi_reduction <add>, %261, %cst_98 [1] : vector<16x128xf32> to vector<16xf32>
    %263 = vector.shape_cast %262 : vector<16xf32> to vector<16x1xf32>
    %cst_99 = arith.constant 1.280000e+02 : f32
    %264 = vector.broadcast %cst_99 : f32 to vector<16x1xf32>
    %265 = arith.divf %263, %264 : vector<16x1xf32>
    %cst_100 = arith.constant 9.99999996E-13 : f32
    %266 = vector.broadcast %cst_100 : f32 to vector<16x1xf32>
    %267 = arith.addf %265, %266 : vector<16x1xf32>
    %268 = math.rsqrt %267 : vector<16x1xf32>
    %269 = vector.broadcast %268 : vector<16x1xf32> to vector<16x128xf32>
    %270 = arith.mulf %260, %269 : vector<16x128xf32>
    %271 = vector.broadcast %253 : vector<1x128xf32> to vector<16x128xf32>
    %272 = arith.mulf %270, %271 : vector<16x128xf32>
    %273 = vector.broadcast %254 : vector<1x128xf32> to vector<16x128xf32>
    %274 = arith.addf %272, %273 : vector<16x128xf32>
    %c0_101 = arith.constant 0 : index
    %c0_102 = arith.constant 0 : index
    %275 = vector.load %arg12[%c0_101, %c0_102] : memref<128x384xbf16, #tpu.memory_space<vmem>>, vector<128x384xbf16>
    %276 = arith.truncf %274 : vector<16x128xf32> to vector<16x128xbf16>
    %cst_103 = arith.constant dense<0.000000e+00> : vector<16x384xf32>
    %277 = tpu.matmul %276, %275, %cst_103 {dimension_numbers = #tpu.dot_dimension_numbers<[1], [0], [0], [1], [0, 0, 1, 1], [], []>} : vector<16x128xbf16>, vector<128x384xbf16>, vector<16x384xf32> -> vector<16x384xf32>
    %c20 = arith.constant 20 : index
    %c0_104 = arith.constant 0 : index
    %278 = vector.load %arg3[%c20, %c0_104] : memref<40x512xf32, #tpu.memory_space<vmem>>, vector<1x384xf32>
    %279 = vector.broadcast %278 : vector<1x384xf32> to vector<16x384xf32>
    %280 = arith.addf %277, %279 : vector<16x384xf32>
    %281 = vector.extract_strided_slice %280 {offsets = [0, 0], sizes = [16, 128], strides = [1, 1]} : vector<16x384xf32> to vector<16x128xf32>
    %282 = vector.extract_strided_slice %280 {offsets = [0, 128], sizes = [16, 128], strides = [1, 1]} : vector<16x384xf32> to vector<16x128xf32>
    %283 = vector.extract_strided_slice %280 {offsets = [0, 256], sizes = [16, 128], strides = [1, 1]} : vector<16x384xf32> to vector<16x128xf32>
    %284 = vector.extract_strided_slice %281 {offsets = [0, 0], sizes = [16, 32], strides = [1, 1]} : vector<16x128xf32> to vector<16x32xf32>
    %285 = vector.extract_strided_slice %281 {offsets = [0, 32], sizes = [16, 32], strides = [1, 1]} : vector<16x128xf32> to vector<16x32xf32>
    %286 = vector.extract_strided_slice %281 {offsets = [0, 64], sizes = [16, 32], strides = [1, 1]} : vector<16x128xf32> to vector<16x32xf32>
    %287 = vector.extract_strided_slice %281 {offsets = [0, 96], sizes = [16, 32], strides = [1, 1]} : vector<16x128xf32> to vector<16x32xf32>
    %288 = tpu.concatenate %284, %285, %286, %287 in 0 : vector<16x32xf32>, vector<16x32xf32>, vector<16x32xf32>, vector<16x32xf32> -> vector<64x32xf32>
    %289 = vector.extract_strided_slice %282 {offsets = [0, 0], sizes = [16, 32], strides = [1, 1]} : vector<16x128xf32> to vector<16x32xf32>
    %290 = vector.extract_strided_slice %282 {offsets = [0, 32], sizes = [16, 32], strides = [1, 1]} : vector<16x128xf32> to vector<16x32xf32>
    %291 = vector.extract_strided_slice %282 {offsets = [0, 64], sizes = [16, 32], strides = [1, 1]} : vector<16x128xf32> to vector<16x32xf32>
    %292 = vector.extract_strided_slice %282 {offsets = [0, 96], sizes = [16, 32], strides = [1, 1]} : vector<16x128xf32> to vector<16x32xf32>
    %293 = tpu.concatenate %289, %290, %291, %292 in 0 : vector<16x32xf32>, vector<16x32xf32>, vector<16x32xf32>, vector<16x32xf32> -> vector<64x32xf32>
    %294 = vector.extract_strided_slice %283 {offsets = [0, 0], sizes = [16, 32], strides = [1, 1]} : vector<16x128xf32> to vector<16x32xf32>
    %295 = vector.extract_strided_slice %283 {offsets = [0, 32], sizes = [16, 32], strides = [1, 1]} : vector<16x128xf32> to vector<16x32xf32>
    %296 = vector.extract_strided_slice %283 {offsets = [0, 64], sizes = [16, 32], strides = [1, 1]} : vector<16x128xf32> to vector<16x32xf32>
    %297 = vector.extract_strided_slice %283 {offsets = [0, 96], sizes = [16, 32], strides = [1, 1]} : vector<16x128xf32> to vector<16x32xf32>
    %298 = tpu.concatenate %294, %295, %296, %297 in 0 : vector<16x32xf32>, vector<16x32xf32>, vector<16x32xf32>, vector<16x32xf32> -> vector<64x32xf32>
    %299 = arith.truncf %288 : vector<64x32xf32> to vector<64x32xbf16>
    %300 = arith.truncf %293 : vector<64x32xf32> to vector<64x32xbf16>
    %cst_105 = arith.constant dense<0.000000e+00> : vector<64x64xf32>
    %301 = tpu.matmul %299, %300, %cst_105 {dimension_numbers = #tpu.dot_dimension_numbers<[1], [1], [0], [0], [0, 0, 1, 0], [], []>} : vector<64x32xbf16>, vector<64x32xbf16>, vector<64x64xf32> -> vector<64x64xf32>
    %302 = arith.addf %301, %156 : vector<64x64xf32>
    %cst_106 = arith.constant dense<0xFF800000> : vector<64xf32>
    %303 = vector.multi_reduction <maximumf>, %302, %cst_106 [1] : vector<64x64xf32> to vector<64xf32>
    %304 = vector.shape_cast %303 : vector<64xf32> to vector<64x1xf32>
    %305 = vector.broadcast %304 : vector<64x1xf32> to vector<64x64xf32>
    %306 = arith.subf %302, %305 : vector<64x64xf32>
    %307 = math.exp %306 : vector<64x64xf32>
    %cst_107 = arith.constant dense<0.000000e+00> : vector<64xf32>
    %308 = vector.multi_reduction <add>, %307, %cst_107 [1] : vector<64x64xf32> to vector<64xf32>
    %309 = vector.shape_cast %308 : vector<64xf32> to vector<64x1xf32>
    %310 = tpu.reciprocal %309 {approx = true} : vector<64x1xf32> -> vector<64x1xf32>
    %311 = vector.broadcast %310 : vector<64x1xf32> to vector<64x64xf32>
    %312 = arith.mulf %307, %311 : vector<64x64xf32>
    %313 = arith.truncf %312 : vector<64x64xf32> to vector<64x64xbf16>
    %314 = arith.truncf %298 : vector<64x32xf32> to vector<64x32xbf16>
    %cst_108 = arith.constant dense<0.000000e+00> : vector<64x32xf32>
    %315 = tpu.matmul %313, %314, %cst_108 {dimension_numbers = #tpu.dot_dimension_numbers<[1], [0], [0], [1], [0, 0, 1, 1], [], []>} : vector<64x64xbf16>, vector<64x32xbf16>, vector<64x32xf32> -> vector<64x32xf32>
    %316 = vector.extract_strided_slice %315 {offsets = [0, 0], sizes = [16, 32], strides = [1, 1]} : vector<64x32xf32> to vector<16x32xf32>
    %317 = vector.extract_strided_slice %315 {offsets = [16, 0], sizes = [16, 32], strides = [1, 1]} : vector<64x32xf32> to vector<16x32xf32>
    %318 = vector.extract_strided_slice %315 {offsets = [32, 0], sizes = [16, 32], strides = [1, 1]} : vector<64x32xf32> to vector<16x32xf32>
    %319 = vector.extract_strided_slice %315 {offsets = [48, 0], sizes = [16, 32], strides = [1, 1]} : vector<64x32xf32> to vector<16x32xf32>
    %320 = tpu.concatenate %316, %317, %318, %319 in 1 : vector<16x32xf32>, vector<16x32xf32>, vector<16x32xf32>, vector<16x32xf32> -> vector<16x128xf32>
    %c0_109 = arith.constant 0 : index
    %c0_110 = arith.constant 0 : index
    %321 = vector.load %arg13[%c0_109, %c0_110] : memref<128x128xbf16, #tpu.memory_space<vmem>>, vector<128x128xbf16>
    %322 = arith.truncf %320 : vector<16x128xf32> to vector<16x128xbf16>
    %cst_111 = arith.constant dense<0.000000e+00> : vector<16x128xf32>
    %323 = tpu.matmul %322, %321, %cst_111 {dimension_numbers = #tpu.dot_dimension_numbers<[1], [0], [0], [1], [0, 0, 1, 1], [], []>} : vector<16x128xbf16>, vector<128x128xbf16>, vector<16x128xf32> -> vector<16x128xf32>
    %c21 = arith.constant 21 : index
    %c0_112 = arith.constant 0 : index
    %324 = vector.load %arg3[%c21, %c0_112] : memref<40x512xf32, #tpu.memory_space<vmem>>, vector<1x128xf32>
    %325 = vector.broadcast %324 : vector<1x128xf32> to vector<16x128xf32>
    %326 = arith.addf %323, %325 : vector<16x128xf32>
    %327 = arith.addf %326, %274 : vector<16x128xf32>
    %c22 = arith.constant 22 : index
    %c0_113 = arith.constant 0 : index
    %328 = vector.load %arg3[%c22, %c0_113] : memref<40x512xf32, #tpu.memory_space<vmem>>, vector<1x128xf32>
    %c23 = arith.constant 23 : index
    %c0_114 = arith.constant 0 : index
    %329 = vector.load %arg3[%c23, %c0_114] : memref<40x512xf32, #tpu.memory_space<vmem>>, vector<1x128xf32>
    %cst_115 = arith.constant dense<0.000000e+00> : vector<16xf32>
    %330 = vector.multi_reduction <add>, %327, %cst_115 [1] : vector<16x128xf32> to vector<16xf32>
    %331 = vector.shape_cast %330 : vector<16xf32> to vector<16x1xf32>
    %cst_116 = arith.constant 1.280000e+02 : f32
    %332 = vector.broadcast %cst_116 : f32 to vector<16x1xf32>
    %333 = arith.divf %331, %332 : vector<16x1xf32>
    %334 = vector.broadcast %333 : vector<16x1xf32> to vector<16x128xf32>
    %335 = arith.subf %327, %334 : vector<16x128xf32>
    %336 = arith.mulf %335, %335 : vector<16x128xf32>
    %cst_117 = arith.constant dense<0.000000e+00> : vector<16xf32>
    %337 = vector.multi_reduction <add>, %336, %cst_117 [1] : vector<16x128xf32> to vector<16xf32>
    %338 = vector.shape_cast %337 : vector<16xf32> to vector<16x1xf32>
    %cst_118 = arith.constant 1.280000e+02 : f32
    %339 = vector.broadcast %cst_118 : f32 to vector<16x1xf32>
    %340 = arith.divf %338, %339 : vector<16x1xf32>
    %cst_119 = arith.constant 9.99999996E-13 : f32
    %341 = vector.broadcast %cst_119 : f32 to vector<16x1xf32>
    %342 = arith.addf %340, %341 : vector<16x1xf32>
    %343 = math.rsqrt %342 : vector<16x1xf32>
    %344 = vector.broadcast %343 : vector<16x1xf32> to vector<16x128xf32>
    %345 = arith.mulf %335, %344 : vector<16x128xf32>
    %346 = vector.broadcast %328 : vector<1x128xf32> to vector<16x128xf32>
    %347 = arith.mulf %345, %346 : vector<16x128xf32>
    %348 = vector.broadcast %329 : vector<1x128xf32> to vector<16x128xf32>
    %349 = arith.addf %347, %348 : vector<16x128xf32>
    %c0_120 = arith.constant 0 : index
    %c0_121 = arith.constant 0 : index
    %350 = vector.load %arg14[%c0_120, %c0_121] : memref<128x512xbf16, #tpu.memory_space<vmem>>, vector<128x512xbf16>
    %351 = arith.truncf %349 : vector<16x128xf32> to vector<16x128xbf16>
    %cst_122 = arith.constant dense<0.000000e+00> : vector<16x512xf32>
    %352 = tpu.matmul %351, %350, %cst_122 {dimension_numbers = #tpu.dot_dimension_numbers<[1], [0], [0], [1], [0, 0, 1, 1], [], []>} : vector<16x128xbf16>, vector<128x512xbf16>, vector<16x512xf32> -> vector<16x512xf32>
    %c24 = arith.constant 24 : index
    %c0_123 = arith.constant 0 : index
    %353 = vector.load %arg3[%c24, %c0_123] : memref<40x512xf32, #tpu.memory_space<vmem>>, vector<1x512xf32>
    %354 = vector.broadcast %353 : vector<1x512xf32> to vector<16x512xf32>
    %355 = arith.addf %352, %354 : vector<16x512xf32>
    %cst_124 = arith.constant 5.000000e-01 : f32
    %356 = vector.broadcast %cst_124 : f32 to vector<16x512xf32>
    %357 = arith.mulf %356, %355 : vector<16x512xf32>
    %cst_125 = arith.constant 0.707106769 : f32
    %358 = vector.broadcast %cst_125 : f32 to vector<16x512xf32>
    %359 = arith.mulf %355, %358 : vector<16x512xf32>
    %360 = math.erf %359 : vector<16x512xf32>
    %cst_126 = arith.constant 1.000000e+00 : f32
    %361 = vector.broadcast %cst_126 : f32 to vector<16x512xf32>
    %362 = arith.addf %361, %360 : vector<16x512xf32>
    %363 = arith.mulf %357, %362 : vector<16x512xf32>
    %c0_127 = arith.constant 0 : index
    %c0_128 = arith.constant 0 : index
    %364 = vector.load %arg15[%c0_127, %c0_128] : memref<512x128xbf16, #tpu.memory_space<vmem>>, vector<512x128xbf16>
    %365 = arith.truncf %363 : vector<16x512xf32> to vector<16x512xbf16>
    %cst_129 = arith.constant dense<0.000000e+00> : vector<16x128xf32>
    %366 = tpu.matmul %365, %364, %cst_129 {dimension_numbers = #tpu.dot_dimension_numbers<[1], [0], [0], [1], [0, 0, 1, 1], [], []>} : vector<16x512xbf16>, vector<512x128xbf16>, vector<16x128xf32> -> vector<16x128xf32>
    %c25 = arith.constant 25 : index
    %c0_130 = arith.constant 0 : index
    %367 = vector.load %arg3[%c25, %c0_130] : memref<40x512xf32, #tpu.memory_space<vmem>>, vector<1x128xf32>
    %368 = vector.broadcast %367 : vector<1x128xf32> to vector<16x128xf32>
    %369 = arith.addf %366, %368 : vector<16x128xf32>
    %370 = arith.addf %369, %349 : vector<16x128xf32>
    %c26 = arith.constant 26 : index
    %c0_131 = arith.constant 0 : index
    %371 = vector.load %arg3[%c26, %c0_131] : memref<40x512xf32, #tpu.memory_space<vmem>>, vector<1x128xf32>
    %c27 = arith.constant 27 : index
    %c0_132 = arith.constant 0 : index
    %372 = vector.load %arg3[%c27, %c0_132] : memref<40x512xf32, #tpu.memory_space<vmem>>, vector<1x128xf32>
    %cst_133 = arith.constant dense<0.000000e+00> : vector<16xf32>
    %373 = vector.multi_reduction <add>, %370, %cst_133 [1] : vector<16x128xf32> to vector<16xf32>
    %374 = vector.shape_cast %373 : vector<16xf32> to vector<16x1xf32>
    %cst_134 = arith.constant 1.280000e+02 : f32
    %375 = vector.broadcast %cst_134 : f32 to vector<16x1xf32>
    %376 = arith.divf %374, %375 : vector<16x1xf32>
    %377 = vector.broadcast %376 : vector<16x1xf32> to vector<16x128xf32>
    %378 = arith.subf %370, %377 : vector<16x128xf32>
    %379 = arith.mulf %378, %378 : vector<16x128xf32>
    %cst_135 = arith.constant dense<0.000000e+00> : vector<16xf32>
    %380 = vector.multi_reduction <add>, %379, %cst_135 [1] : vector<16x128xf32> to vector<16xf32>
    %381 = vector.shape_cast %380 : vector<16xf32> to vector<16x1xf32>
    %cst_136 = arith.constant 1.280000e+02 : f32
    %382 = vector.broadcast %cst_136 : f32 to vector<16x1xf32>
    %383 = arith.divf %381, %382 : vector<16x1xf32>
    %cst_137 = arith.constant 9.99999996E-13 : f32
    %384 = vector.broadcast %cst_137 : f32 to vector<16x1xf32>
    %385 = arith.addf %383, %384 : vector<16x1xf32>
    %386 = math.rsqrt %385 : vector<16x1xf32>
    %387 = vector.broadcast %386 : vector<16x1xf32> to vector<16x128xf32>
    %388 = arith.mulf %378, %387 : vector<16x128xf32>
    %389 = vector.broadcast %371 : vector<1x128xf32> to vector<16x128xf32>
    %390 = arith.mulf %388, %389 : vector<16x128xf32>
    %391 = vector.broadcast %372 : vector<1x128xf32> to vector<16x128xf32>
    %392 = arith.addf %390, %391 : vector<16x128xf32>
    %c0_138 = arith.constant 0 : index
    %c0_139 = arith.constant 0 : index
    %393 = vector.load %arg16[%c0_138, %c0_139] : memref<128x128xbf16, #tpu.memory_space<vmem>>, vector<128x128xbf16>
    %394 = arith.truncf %392 : vector<16x128xf32> to vector<16x128xbf16>
    %cst_140 = arith.constant dense<0.000000e+00> : vector<16x128xf32>
    %395 = tpu.matmul %394, %393, %cst_140 {dimension_numbers = #tpu.dot_dimension_numbers<[1], [0], [0], [1], [0, 0, 1, 1], [], []>} : vector<16x128xbf16>, vector<128x128xbf16>, vector<16x128xf32> -> vector<16x128xf32>
    %c28 = arith.constant 28 : index
    %c0_141 = arith.constant 0 : index
    %396 = vector.load %arg3[%c28, %c0_141] : memref<40x512xf32, #tpu.memory_space<vmem>>, vector<1x128xf32>
    %397 = vector.broadcast %396 : vector<1x128xf32> to vector<16x128xf32>
    %398 = arith.addf %395, %397 : vector<16x128xf32>
    %c0_142 = arith.constant 0 : index
    %c0_143 = arith.constant 0 : index
    %399 = vector.load %arg17[%c0_142, %c0_143] : memref<128x128xbf16, #tpu.memory_space<vmem>>, vector<128x128xbf16>
    %400 = arith.truncf %398 : vector<16x128xf32> to vector<16x128xbf16>
    %cst_144 = arith.constant dense<0.000000e+00> : vector<16x128xf32>
    %401 = tpu.matmul %400, %399, %cst_144 {dimension_numbers = #tpu.dot_dimension_numbers<[1], [0], [0], [1], [0, 0, 1, 1], [], []>} : vector<16x128xbf16>, vector<128x128xbf16>, vector<16x128xf32> -> vector<16x128xf32>
    %c29 = arith.constant 29 : index
    %c0_145 = arith.constant 0 : index
    %402 = vector.load %arg3[%c29, %c0_145] : memref<40x512xf32, #tpu.memory_space<vmem>>, vector<1x128xf32>
    %403 = vector.broadcast %402 : vector<1x128xf32> to vector<16x128xf32>
    %404 = arith.addf %401, %403 : vector<16x128xf32>
    %c30 = arith.constant 30 : index
    %c0_146 = arith.constant 0 : index
    %405 = vector.load %arg3[%c30, %c0_146] : memref<40x512xf32, #tpu.memory_space<vmem>>, vector<1x128xf32>
    %c31 = arith.constant 31 : index
    %c0_147 = arith.constant 0 : index
    %406 = vector.load %arg3[%c31, %c0_147] : memref<40x512xf32, #tpu.memory_space<vmem>>, vector<1x128xf32>
    %cst_148 = arith.constant dense<0.000000e+00> : vector<16xf32>
    %407 = vector.multi_reduction <add>, %404, %cst_148 [1] : vector<16x128xf32> to vector<16xf32>
    %408 = vector.shape_cast %407 : vector<16xf32> to vector<16x1xf32>
    %cst_149 = arith.constant 1.562500e-02 : f32
    %409 = vector.broadcast %cst_149 : f32 to vector<16x1xf32>
    %410 = arith.mulf %408, %409 : vector<16x1xf32>
    %411 = arith.mulf %404, %404 : vector<16x128xf32>
    %cst_150 = arith.constant dense<0.000000e+00> : vector<16xf32>
    %412 = vector.multi_reduction <add>, %411, %cst_150 [1] : vector<16x128xf32> to vector<16xf32>
    %413 = vector.shape_cast %412 : vector<16xf32> to vector<16x1xf32>
    %cst_151 = arith.constant 1.562500e-02 : f32
    %414 = vector.broadcast %cst_151 : f32 to vector<16x1xf32>
    %415 = arith.mulf %413, %414 : vector<16x1xf32>
    %416 = arith.mulf %410, %410 : vector<16x1xf32>
    %417 = arith.subf %415, %416 : vector<16x1xf32>
    %418 = vector.broadcast %410 : vector<16x1xf32> to vector<16x128xf32>
    %419 = arith.subf %404, %418 : vector<16x128xf32>
    %cst_152 = arith.constant 9.99999974E-6 : f32
    %420 = vector.broadcast %cst_152 : f32 to vector<16x1xf32>
    %421 = arith.addf %417, %420 : vector<16x1xf32>
    %422 = math.rsqrt %421 : vector<16x1xf32>
    %423 = vector.broadcast %422 : vector<16x1xf32> to vector<16x128xf32>
    %424 = arith.mulf %419, %423 : vector<16x128xf32>
    %425 = vector.broadcast %405 : vector<1x128xf32> to vector<16x128xf32>
    %426 = arith.mulf %424, %425 : vector<16x128xf32>
    %427 = vector.broadcast %406 : vector<1x128xf32> to vector<16x128xf32>
    %428 = arith.addf %426, %427 : vector<16x128xf32>
    %cst_153 = arith.constant 5.000000e-01 : f32
    %429 = vector.broadcast %cst_153 : f32 to vector<16x128xf32>
    %430 = arith.mulf %429, %428 : vector<16x128xf32>
    %cst_154 = arith.constant 0.707106769 : f32
    %431 = vector.broadcast %cst_154 : f32 to vector<16x128xf32>
    %432 = arith.mulf %428, %431 : vector<16x128xf32>
    %433 = math.erf %432 : vector<16x128xf32>
    %cst_155 = arith.constant 1.000000e+00 : f32
    %434 = vector.broadcast %cst_155 : f32 to vector<16x128xf32>
    %435 = arith.addf %434, %433 : vector<16x128xf32>
    %436 = arith.mulf %430, %435 : vector<16x128xf32>
    %c0_156 = arith.constant 0 : index
    %c0_157 = arith.constant 0 : index
    %437 = vector.load %arg18[%c0_156, %c0_157] : memref<128x128xbf16, #tpu.memory_space<vmem>>, vector<128x128xbf16>
    %438 = arith.truncf %436 : vector<16x128xf32> to vector<16x128xbf16>
    %cst_158 = arith.constant dense<0.000000e+00> : vector<16x128xf32>
    %439 = tpu.matmul %438, %437, %cst_158 {dimension_numbers = #tpu.dot_dimension_numbers<[1], [0], [0], [1], [0, 0, 1, 1], [], []>} : vector<16x128xbf16>, vector<128x128xbf16>, vector<16x128xf32> -> vector<16x128xf32>
    %c32 = arith.constant 32 : index
    %c0_159 = arith.constant 0 : index
    %440 = vector.load %arg3[%c32, %c0_159] : memref<40x512xf32, #tpu.memory_space<vmem>>, vector<1x128xf32>
    %441 = vector.broadcast %440 : vector<1x128xf32> to vector<16x128xf32>
    %442 = arith.addf %439, %441 : vector<16x128xf32>
    %c33 = arith.constant 33 : index
    %c0_160 = arith.constant 0 : index
    %443 = vector.load %arg3[%c33, %c0_160] : memref<40x512xf32, #tpu.memory_space<vmem>>, vector<1x128xf32>
    %c34 = arith.constant 34 : index
    %c0_161 = arith.constant 0 : index
    %444 = vector.load %arg3[%c34, %c0_161] : memref<40x512xf32, #tpu.memory_space<vmem>>, vector<1x128xf32>
    %cst_162 = arith.constant dense<0.000000e+00> : vector<16xf32>
    %445 = vector.multi_reduction <add>, %442, %cst_162 [1] : vector<16x128xf32> to vector<16xf32>
    %446 = vector.shape_cast %445 : vector<16xf32> to vector<16x1xf32>
    %cst_163 = arith.constant 3.125000e-02 : f32
    %447 = vector.broadcast %cst_163 : f32 to vector<16x1xf32>
    %448 = arith.mulf %446, %447 : vector<16x1xf32>
    %449 = arith.mulf %442, %442 : vector<16x128xf32>
    %cst_164 = arith.constant dense<0.000000e+00> : vector<16xf32>
    %450 = vector.multi_reduction <add>, %449, %cst_164 [1] : vector<16x128xf32> to vector<16xf32>
    %451 = vector.shape_cast %450 : vector<16xf32> to vector<16x1xf32>
    %cst_165 = arith.constant 3.125000e-02 : f32
    %452 = vector.broadcast %cst_165 : f32 to vector<16x1xf32>
    %453 = arith.mulf %451, %452 : vector<16x1xf32>
    %454 = arith.mulf %448, %448 : vector<16x1xf32>
    %455 = arith.subf %453, %454 : vector<16x1xf32>
    %456 = vector.broadcast %448 : vector<16x1xf32> to vector<16x128xf32>
    %457 = arith.subf %442, %456 : vector<16x128xf32>
    %cst_166 = arith.constant 9.99999974E-6 : f32
    %458 = vector.broadcast %cst_166 : f32 to vector<16x1xf32>
    %459 = arith.addf %455, %458 : vector<16x1xf32>
    %460 = math.rsqrt %459 : vector<16x1xf32>
    %461 = vector.broadcast %460 : vector<16x1xf32> to vector<16x128xf32>
    %462 = arith.mulf %457, %461 : vector<16x128xf32>
    %463 = vector.broadcast %443 : vector<1x128xf32> to vector<16x128xf32>
    %464 = arith.mulf %462, %463 : vector<16x128xf32>
    %465 = vector.broadcast %444 : vector<1x128xf32> to vector<16x128xf32>
    %466 = arith.addf %464, %465 : vector<16x128xf32>
    %cst_167 = arith.constant 5.000000e-01 : f32
    %467 = vector.broadcast %cst_167 : f32 to vector<16x128xf32>
    %468 = arith.mulf %467, %466 : vector<16x128xf32>
    %cst_168 = arith.constant 0.707106769 : f32
    %469 = vector.broadcast %cst_168 : f32 to vector<16x128xf32>
    %470 = arith.mulf %466, %469 : vector<16x128xf32>
    %471 = math.erf %470 : vector<16x128xf32>
    %cst_169 = arith.constant 1.000000e+00 : f32
    %472 = vector.broadcast %cst_169 : f32 to vector<16x128xf32>
    %473 = arith.addf %472, %471 : vector<16x128xf32>
    %474 = arith.mulf %468, %473 : vector<16x128xf32>
    %c0_170 = arith.constant 0 : index
    %c0_171 = arith.constant 0 : index
    %475 = vector.load %arg19[%c0_170, %c0_171] : memref<128x128xbf16, #tpu.memory_space<vmem>>, vector<128x128xbf16>
    %476 = arith.truncf %474 : vector<16x128xf32> to vector<16x128xbf16>
    %cst_172 = arith.constant dense<0.000000e+00> : vector<16x128xf32>
    %477 = tpu.matmul %476, %475, %cst_172 {dimension_numbers = #tpu.dot_dimension_numbers<[1], [0], [0], [1], [0, 0, 1, 1], [], []>} : vector<16x128xbf16>, vector<128x128xbf16>, vector<16x128xf32> -> vector<16x128xf32>
    %c35 = arith.constant 35 : index
    %c0_173 = arith.constant 0 : index
    %478 = vector.load %arg3[%c35, %c0_173] : memref<40x512xf32, #tpu.memory_space<vmem>>, vector<1x128xf32>
    %479 = vector.broadcast %478 : vector<1x128xf32> to vector<16x128xf32>
    %480 = arith.addf %477, %479 : vector<16x128xf32>
    %c0_174 = arith.constant 0 : index
    %c0_175 = arith.constant 0 : index
    %481 = vector.load %arg20[%c0_174, %c0_175] : memref<16x128xf32, #tpu.memory_space<vmem>>, vector<16x128xf32>
    tpu.vector_store %arg20[%c0_174, %c0_175], %480 {strides = array<i32>} : memref<16x128xf32, #tpu.memory_space<vmem>>, vector<16x128xf32>,
    return
  }
}

</mosaic_0001>

<bundles_post_ra>
// kernel: tpu_custom_call.1
= control target key start
LH: loop header
LB: loop body
LE: loop exit
PB: predicated region body
PF: predicated region fallthrough
CT: control target
= control target key end

     0   :  { %s8130_s0 = inlined_call_operand.hbm [shape: f32[16,256], index: 0, kind: input, shape index: {}]   ;;  %s8131_s1 = inlined_call_operand.hbm [shape: f32[16,128], index: 1, kind: input, shape index: {}]   ;;  %s8132_s2 = inlined_call_operand.hbm [shape: f32[64,64], index: 2, kind: input, shape index: {}]   ;;  %s8133_s3 = inlined_call_operand.hbm [shape: f32[40,512], index: 3, kind: input, shape index: {}]   ;;  %s8134_s4 = inlined_call_operand.hbm [shape: bf16[256,256], index: 4, kind: input, shape index: {}]   ;;  %s8135_s5 = inlined_call_operand.hbm [shape: bf16[256,512], index: 5, kind: input, shape index: {}]   ;;  %s8136_s6 = inlined_call_operand.hbm [shape: bf16[512,128], index: 6, kind: input, shape index: {}]   ;;  %s8137_s7 = inlined_call_operand.hbm [shape: bf16[128,128], index: 7, kind: input, shape index: {}]   ;;  %s8138_s8 = inlined_call_operand.hbm [shape: bf16[128,384], index: 8, kind: input, shape index: {}]   ;;  %s8139_s9 = inlined_call_operand.hbm [shape: bf16[128,128], index: 9, kind: input, shape index: {}]   ;;  %s8140_s10 = inlined_call_operand.hbm [shape: bf16[128,512], index: 10, kind: input, shape index: {}]   ;;  %s8141_s11 = inlined_call_operand.hbm [shape: bf16[512,128], index: 11, kind: input, shape index: {}]   ;;  %s8142_s12 = inlined_call_operand.hbm [shape: bf16[128,384], index: 12, kind: input, shape index: {}]   ;;  %s8143_s13 = inlined_call_operand.hbm [shape: bf16[128,128], index: 13, kind: input, shape index: {}]   ;;  %s8144_s14 = inlined_call_operand.hbm [shape: bf16[128,512], index: 14, kind: input, shape index: {}]   ;;  %s8145_s15 = inlined_call_operand.hbm [shape: bf16[512,128], index: 15, kind: input, shape index: {}]   ;;  %s8146_s16 = inlined_call_operand.hbm [shape: bf16[128,128], index: 16, kind: input, shape index: {}]   ;;  %s8147_s17 = inlined_call_operand.hbm [shape: bf16[128,128], index: 17, kind: input, shape index: {}]   ;;  %s8148_s18 = inlined_call_operand.hbm [shape: bf16[128,128], index: 18, kind: input, shape index: {}]   ;;  %s8149_s19 = inlined_call_operand.hbm [shape: bf16[128,128], index: 19, kind: input, shape index: {}]   ;;  %s8150_s20 = inlined_call_operand.hbm [shape: f32[16,128], index: 20, kind: output, shape index: {}]  }
   0x1   :  { %8153 = sst [smem:[#allocation47_spill]] %s8130_s0 }
   0x2   :  { %8154 = sst [smem:[#allocation48_spill]] %s8131_s1 }
   0x3   :  { %8155 = sst [smem:[#allocation49_spill]] %s8132_s2 }
   0x4   :  { %8156 = sst [smem:[#allocation50_spill]] %s8133_s3 }
   0x5   :  { %8157 = sst [smem:[#allocation51_spill]] %s8134_s4 }
   0x6   :  { %25 = vsyncpa [#allocation3], 0 }
   0x7   :  { %26 = vsyncpa [#allocation6], 0 }
   0x8   :  { %27 = vsyncpa [#allocation9], 0 }
   0x9   :  { %28 = vsyncpa [#allocation12], 0 }
   0xa   :  { %29 = vsyncpa [#allocation15], 0 }
   0xb   :  { %30 = vsyncpa [#allocation18], 0 }
   0xc   :  { %31 = vsyncpa [#allocation21], 0 }
   0xd   :  { %32 = vsyncpa [#allocation24], 0 }
   0xe   :  { %33 = vsyncpa [#allocation27], 0 }
   0xf   :  { %34 = vsyncpa [#allocation30], 0 }
  0x10   :  { %35 = vsyncpa [#allocation33], 0 }
  0x11   :  { %36 = vsyncpa [#allocation4], 0  ;;  %s7422_s1 = smov [#allocation5]  }
  0x12   :  { %s54_s22 = sshll.u32 %s7422_s1, 4  ;;  %s55_s22 = int_to_ptr.vmem [resolvable:$true] %s54_s22 }
  0x13   :  { %s6986_s23 = scalar_lea.vmem %s55_s22, 256  ;;  %p6991_p1 = scmp.lt.s32.totalorder %s55_s22, %s55_s22 }
  0x14   :  { %p6987_p0 = scmp.ne.s32.totalorder %s55_s22, %s6986_s23  ;;  %p6992_p2 = scmp.lt.s32.totalorder %s6986_s23, %s6986_s23 }
  0x16   :  { %p6993_p3 = por %p6992_p2, %p6991_p1 }
  0x18   :  { %p6994_p4 = pnand %p6993_p3, %p6987_p0 }
  0x1a   :  { %6997 = shalt.err (!%p6994_p4)
}
  0x1b   :  { %s7423_s24 = smov 128   ;;  %s7424_s2 = smov 8  }
  0x1c   :  { %s8158_s26 = sld [smem:[#allocation48_spill]]  ;;  %s7425_s27 = smov [#allocation8]  }
  0x1d   :  { %s78_s28 = sshll.u32 %s7425_s27, 4  ;;  %s79_s28 = int_to_ptr.vmem [resolvable:$true] %s78_s28 }
  0x1e   :  { %s7006_s4 = scalar_lea.vmem %s79_s28, 2560  ;;  %p7011_p6 = scmp.lt.s32.totalorder %s79_s28, %s79_s28 }
  0x1f   :  { %p7007_p5 = scmp.ne.s32.totalorder %s79_s28, %s7006_s4  ;;  %p7012_p7 = scmp.lt.s32.totalorder %s7006_s4, %s7006_s4 }
  0x21   :  { %p7013_p8 = por %p7012_p7, %p7011_p6 }
  0x22   :  { %60 = dma.hbm_to_vmem [thread:$0]  %s8158_s26, 256, %s55_s22, [#allocation6], %s7423_s24, %s7423_s24, %s7424_s2  }
  0x23   :  { %p7014_p9 = pnand %p7013_p8, %p7007_p5 }
  0x25   :  { %7017 = shalt.err (!%p7014_p9)
}
  0x26   :  { %s7426_s29 = smov 512   ;;  %s8151_s30 = smov 32  }
  0x27   :  { %s8159_s1 = sld [smem:[#allocation50_spill]]  ;;  %s7428_s23 = smov [#allocation11]  }
  0x28   :  { %s102_s25 = sshll.u32 %s7428_s23, 4  ;;  %s103_s25 = int_to_ptr.vmem [resolvable:$true] %s102_s25 }
  0x29   :  { %s7026_s22 = scalar_lea.vmem %s103_s25, 8192  ;;  %p7031_p11 = scmp.lt.s32.totalorder %s103_s25, %s103_s25 }
  0x2a   :  { %p7027_p10 = scmp.ne.s32.totalorder %s103_s25, %s7026_s22  ;;  %p7032_p12 = scmp.lt.s32.totalorder %s7026_s22, %s7026_s22 }
  0x2c   :  { %p7033_p13 = por %p7032_p12, %p7031_p11 }
  0x2d   :  { %84 = dma.hbm_to_vmem [thread:$0]  %s8159_s1, 2560, %s79_s28, [#allocation9], %s7426_s29, %s7426_s29, %s8151_s30  }
  0x2e   :  { %p7034_p0 = pnand %p7033_p13, %p7027_p10 }
  0x30   :  { %7037 = shalt.err (!%p7034_p0)
}
  0x31   :  { %s7429_s3 = smov 256   ;;  %s7430_s26 = smov 16  }
  0x32   :  { %108 = dma.hbm_to_vmem [thread:$0]  %s8135_s5, 8192, %s103_s25, [#allocation12], %s7429_s3, %s7429_s3, %s7430_s26  }
  0x33   :  { %s7431_s28 = smov [#allocation14]   ;;  %s7432_s0 = smov [#allocation17]  }
  0x34   :  { %s126_s29 = sshll.u32 %s7431_s28, 4  ;;  %s150_s21 = sshll.u32 %s7432_s0, 4  ;;  %s127_s29 = int_to_ptr.vmem [resolvable:$true] %s126_s29  ;;  %s151_s21 = int_to_ptr.vmem [resolvable:$true] %s150_s21 }
  0x35   :  { %s7046_s1 = scalar_lea.vmem %s127_s29, 1024  ;;  %p7051_p2 = scmp.lt.s32.totalorder %s127_s29, %s127_s29 }
  0x36   :  { %p7047_p1 = scmp.ne.s32.totalorder %s127_s29, %s7046_s1  ;;  %p7052_p3 = scmp.lt.s32.totalorder %s7046_s1, %s7046_s1 }
  0x38   :  { %p7053_p4 = por %p7052_p3, %p7051_p2 }
  0x3a   :  { %p7054_p5 = pnand %p7053_p4, %p7047_p1 }
  0x3c   :  { %7057 = shalt.err (!%p7054_p5)
}
  0x3d   :  { %s7433_s23 = smov 64   ;;  %s7434_s22 = smov 4  }
  0x3e   :  { %132 = dma.hbm_to_vmem [thread:$0]  %s8137_s7, 1024, %s127_s29, [#allocation15], %s7433_s23, %s7433_s23, %s7434_s22  }
  0x3f   :  { %s7066_s5 = scalar_lea.vmem %s151_s21, 1024  ;;  %p7071_p7 = scmp.lt.s32.totalorder %s151_s21, %s151_s21 }
  0x40   :  { %p7067_p6 = scmp.ne.s32.totalorder %s151_s21, %s7066_s5  ;;  %p7072_p8 = scmp.lt.s32.totalorder %s7066_s5, %s7066_s5 }
  0x42   :  { %p7073_p9 = por %p7072_p8, %p7071_p7 }
  0x44   :  { %p7074_p10 = pnand %p7073_p9, %p7067_p6 }
  0x46   :  { %7077 = shalt.err (!%p7074_p10)
}
  0x47   :  { %156 = dma.hbm_to_vmem [thread:$0]  %s8139_s9, 1024, %s151_s21, [#allocation18], %s7433_s23, %s7433_s23, %s7434_s22  }
  0x48   :  { %s7435_s28 = smov [#allocation20]   ;;  %s7436_s30 = smov [#allocation23]  }
  0x49   :  { %s174_s0 = sshll.u32 %s7435_s28, 4  ;;  %s198_s7 = sshll.u32 %s7436_s30, 4  ;;  %s175_s0 = int_to_ptr.vmem [resolvable:$true] %s174_s0  ;;  %s199_s7 = int_to_ptr.vmem [resolvable:$true] %s198_s7 }
  0x4a   :  { %s7086_s29 = scalar_lea.vmem %s175_s0, 4096  ;;  %p7091_p12 = scmp.lt.s32.totalorder %s175_s0, %s175_s0 }
  0x4b   :  { %p7087_p11 = scmp.ne.s32.totalorder %s175_s0, %s7086_s29  ;;  %p7092_p13 = scmp.lt.s32.totalorder %s7086_s29, %s7086_s29 }
  0x4d   :  { %p7093_p0 = por %p7092_p13, %p7091_p12 }
  0x4f   :  { %p7094_p1 = pnand %p7093_p0, %p7087_p11 }
  0x51   :  { %7097 = shalt.err (!%p7094_p1)
}
  0x52   :  { %180 = dma.hbm_to_vmem [thread:$0]  %s8141_s11, 4096, %s175_s0, [#allocation21], %s7433_s23, %s7433_s23, %s7434_s22  }
  0x53   :  { %s7106_s9 = scalar_lea.vmem %s199_s7, 1024  ;;  %p7111_p3 = scmp.lt.s32.totalorder %s199_s7, %s199_s7 }
  0x54   :  { %p7107_p2 = scmp.ne.s32.totalorder %s199_s7, %s7106_s9  ;;  %p7112_p4 = scmp.lt.s32.totalorder %s7106_s9, %s7106_s9 }
  0x56   :  { %p7113_p5 = por %p7112_p4, %p7111_p3 }
  0x58   :  { %p7114_p6 = pnand %p7113_p5, %p7107_p2 }
  0x5a   :  { %7117 = shalt.err (!%p7114_p6)
}
  0x5b   :  { %204 = dma.hbm_to_vmem [thread:$0]  %s8143_s13, 1024, %s199_s7, [#allocation24], %s7433_s23, %s7433_s23, %s7434_s22  }
  0x5c   :  { %s7437_s25 = smov [#allocation26]   ;;  %s7438_s28 = smov [#allocation29]  }
  0x5d   :  { %s222_s4 = sshll.u32 %s7437_s25, 4  ;;  %s246_s11 = sshll.u32 %s7438_s28, 4  ;;  %s223_s4 = int_to_ptr.vmem [resolvable:$true] %s222_s4  ;;  %s247_s11 = int_to_ptr.vmem [resolvable:$true] %s246_s11 }
  0x5e   :  { %s7126_s0 = scalar_lea.vmem %s223_s4, 4096  ;;  %p7131_p8 = scmp.lt.s32.totalorder %s223_s4, %s223_s4 }
  0x5f   :  { %p7127_p7 = scmp.ne.s32.totalorder %s223_s4, %s7126_s0  ;;  %p7132_p9 = scmp.lt.s32.totalorder %s7126_s0, %s7126_s0 }
  0x61   :  { %p7133_p10 = por %p7132_p9, %p7131_p8 }
  0x63   :  { %p7134_p11 = pnand %p7133_p10, %p7127_p7 }
  0x65   :  { %7137 = shalt.err (!%p7134_p11)
}
  0x66   :  { %228 = dma.hbm_to_vmem [thread:$0]  %s8145_s15, 4096, %s223_s4, [#allocation27], %s7433_s23, %s7433_s23, %s7434_s22  }
  0x67   :  { %s7146_s13 = scalar_lea.vmem %s247_s11, 1024  ;;  %p7151_p13 = scmp.lt.s32.totalorder %s247_s11, %s247_s11 }
  0x68   :  { %p7147_p12 = scmp.ne.s32.totalorder %s247_s11, %s7146_s13  ;;  %p7152_p0 = scmp.lt.s32.totalorder %s7146_s13, %s7146_s13 }
  0x6a   :  { %p7153_p1 = por %p7152_p0, %p7151_p13 }
  0x6c   :  { %p7154_p2 = pnand %p7153_p1, %p7147_p12 }
  0x6e   :  { %7157 = shalt.err (!%p7154_p2)
}
  0x6f   :  { %252 = dma.hbm_to_vmem [thread:$0]  %s8147_s17, 1024, %s247_s11, [#allocation30], %s7433_s23, %s7433_s23, %s7434_s22  }
  0x70   :  { %s7439_s27 = smov [#allocation2]   ;;  %s7440_s21 = smov [#allocation7]  }
  0x71   :  { %s42_s9 = sshll.u32 %s7439_s27, 4  ;;  %s66_s15 = sshll.u32 %s7440_s21, 4  ;;  %s43_s9 = int_to_ptr.vmem [resolvable:$true] %s42_s9  ;;  %s67_s15 = int_to_ptr.vmem [resolvable:$true] %s66_s15 }
  0x72   :  { %s7166_s5 = scalar_lea.vmem %s43_s9, 512  ;;  %p7171_p4 = scmp.lt.s32.totalorder %s43_s9, %s43_s9 }
  0x73   :  { %p7167_p3 = scmp.ne.s32.totalorder %s43_s9, %s7166_s5  ;;  %p7172_p5 = scmp.lt.s32.totalorder %s7166_s5, %s7166_s5 }
  0x75   :  { %p7173_p6 = por %p7172_p5, %p7171_p4 }
  0x77   :  { %p7174_p7 = pnand %p7173_p6, %p7167_p3 }
  0x79   :  { %7177 = shalt.err (!%p7174_p7)
}
  0x7a   :  { %s8160_s28 = sld [smem:[#allocation47_spill]]  ;;  %s7186_s17 = scalar_lea.vmem %s67_s15, 1024 }
  0x7b   :  { %p7187_p8 = scmp.ne.s32.totalorder %s67_s15, %s7186_s17  ;;  %p7191_p9 = scmp.lt.s32.totalorder %s67_s15, %s67_s15 }
  0x7c   :  { %p7192_p10 = scmp.lt.s32.totalorder %s7186_s17, %s7186_s17 }
  0x7e   :  { %p7193_p11 = por %p7192_p10, %p7191_p9 }
  0x80   :  { %48 = dma.hbm_to_vmem [thread:$0]  %s8160_s28, 512, %s43_s9, [#allocation3], %s7429_s3, %s7429_s3, %s7430_s26  }
  0x81   :  { %p7194_p12 = pnand %p7193_p11, %p7187_p8 }
  0x83   :  { %7197 = shalt.err (!%p7194_p12)
}
  0x84   :  { %s8161_s30 = sld [smem:[#allocation49_spill]]  ;;  %s7441_s29 = smov [#allocation10]  }
  0x85   :  { %s90_s13 = sshll.u32 %s7441_s29, 4  ;;  %s7442_s7 = smov [#allocation13]   ;;  %s91_s13 = int_to_ptr.vmem [resolvable:$true] %s90_s13 }
  0x86   :  { %s114_s1 = sshll.u32 %s7442_s7, 4  ;;  %s7206_s27 = scalar_lea.vmem %s91_s13, 4096  ;;  %s115_s1 = int_to_ptr.vmem [resolvable:$true] %s114_s1 }
  0x87   :  { %p7207_p13 = scmp.ne.s32.totalorder %s91_s13, %s7206_s27  ;;  %p7211_p0 = scmp.lt.s32.totalorder %s91_s13, %s91_s13 }
  0x88   :  { %p7212_p1 = scmp.lt.s32.totalorder %s7206_s27, %s7206_s27 }
  0x8a   :  { %72 = dma.hbm_to_vmem [thread:$0]  %s8161_s30, 1024, %s67_s15, [#allocation6], %s7423_s24, %s7423_s24, %s7424_s2  }
  0x8b   :  { %p7213_p2 = por %p7212_p1, %p7211_p0 }
  0x8d   :  { %p7214_p3 = pnand %p7213_p2, %p7207_p13 }
  0x8f   :  { %7217 = shalt.err (!%p7214_p3)
}
  0x90   :  { %s8162_s5 = sld [smem:[#allocation51_spill]]  ;;  %s7226_s15 = scalar_lea.vmem %s115_s1, 4096 }
  0x91   :  { %p7227_p4 = scmp.ne.s32.totalorder %s115_s1, %s7226_s15  ;;  %p7231_p5 = scmp.lt.s32.totalorder %s115_s1, %s115_s1 }
  0x92   :  { %p7232_p6 = scmp.lt.s32.totalorder %s7226_s15, %s7226_s15 }
  0x94   :  { %p7233_p7 = por %p7232_p6, %p7231_p5 }
  0x96   :  { %96 = dma.hbm_to_vmem [thread:$0]  %s8162_s5, 4096, %s91_s13, [#allocation9], %s7423_s24, %s7423_s24, %s7424_s2  }
  0x97   :  { %p7234_p8 = pnand %p7233_p7, %p7227_p4 }
  0x99   :  { %7237 = shalt.err (!%p7234_p8)
}
  0x9a   :  { %120 = dma.hbm_to_vmem [thread:$0]  %s8136_s6, 4096, %s115_s1, [#allocation12], %s7433_s23, %s7433_s23, %s7434_s22  }
  0x9b   :  { %s7443_s28 = smov [#allocation16]  }
  0x9c   :  { %s138_s17 = sshll.u32 %s7443_s28, 4  ;;  %s139_s17 = int_to_ptr.vmem [resolvable:$true] %s138_s17 }
  0x9d   :  { %s7246_s11 = scalar_lea.vmem %s139_s17, 3072  ;;  %p7251_p10 = scmp.lt.s32.totalorder %s139_s17, %s139_s17 }
  0x9e   :  { %p7247_p9 = scmp.ne.s32.totalorder %s139_s17, %s7246_s11  ;;  %p7252_p11 = scmp.lt.s32.totalorder %s7246_s11, %s7246_s11 }
  0xa0   :  { %p7253_p12 = por %p7252_p11, %p7251_p10 }
  0xa2   :  { %p7254_p13 = pnand %p7253_p12, %p7247_p9 }
  0xa4   :  { %7257 = shalt.err (!%p7254_p13)
}
  0xa5   :  { %s7444_s0 = smov 192   ;;  %s7445_s30 = smov 12  }
  0xa6   :  { %144 = dma.hbm_to_vmem [thread:$0]  %s8138_s8, 3072, %s139_s17, [#allocation15], %s7444_s0, %s7444_s0, %s7445_s30  }
  0xa7   :  { %s7446_s7 = smov [#allocation19]   ;;  %s7447_s9 = smov [#allocation22]  }
  0xa8   :  { %s162_s27 = sshll.u32 %s7446_s7, 4  ;;  %s186_s6 = sshll.u32 %s7447_s9, 4  ;;  %s163_s27 = int_to_ptr.vmem [resolvable:$true] %s162_s27  ;;  %s187_s6 = int_to_ptr.vmem [resolvable:$true] %s186_s6 }
  0xa9   :  { %s7266_s1 = scalar_lea.vmem %s163_s27, 4096  ;;  %p7271_p1 = scmp.lt.s32.totalorder %s163_s27, %s163_s27 }
  0xaa   :  { %p7267_p0 = scmp.ne.s32.totalorder %s163_s27, %s7266_s1  ;;  %p7272_p2 = scmp.lt.s32.totalorder %s7266_s1, %s7266_s1 }
  0xac   :  { %p7273_p3 = por %p7272_p2, %p7271_p1 }
  0xae   :  { %p7274_p4 = pnand %p7273_p3, %p7267_p0 }
  0xb0   :  { %7277 = shalt.err (!%p7274_p4)
}
  0xb1   :  { %168 = dma.hbm_to_vmem [thread:$0]  %s8140_s10, 4096, %s163_s27, [#allocation18], %s7429_s3, %s7429_s3, %s7430_s26  }
  0xb2   :  { %s7286_s8 = scalar_lea.vmem %s187_s6, 3072  ;;  %p7291_p6 = scmp.lt.s32.totalorder %s187_s6, %s187_s6 }
  0xb3   :  { %p7287_p5 = scmp.ne.s32.totalorder %s187_s6, %s7286_s8  ;;  %p7292_p7 = scmp.lt.s32.totalorder %s7286_s8, %s7286_s8 }
  0xb5   :  { %p7293_p8 = por %p7292_p7, %p7291_p6 }
  0xb7   :  { %p7294_p9 = pnand %p7293_p8, %p7287_p5 }
  0xb9   :  { %7297 = shalt.err (!%p7294_p9)
}
  0xba   :  { %192 = dma.hbm_to_vmem [thread:$0]  %s8142_s12, 3072, %s187_s6, [#allocation21], %s7444_s0, %s7444_s0, %s7445_s30  }
  0xbb   :  { %s7448_s4 = smov [#allocation25]   ;;  %s7449_s17 = smov [#allocation28]  }
  0xbc   :  { %s210_s28 = sshll.u32 %s7448_s4, 4  ;;  %s234_s11 = sshll.u32 %s7449_s17, 4  ;;  %s211_s28 = int_to_ptr.vmem [resolvable:$true] %s210_s28  ;;  %s235_s11 = int_to_ptr.vmem [resolvable:$true] %s234_s11 }
  0xbd   :  { %s7306_s29 = scalar_lea.vmem %s211_s28, 4096  ;;  %p7311_p11 = scmp.lt.s32.totalorder %s211_s28, %s211_s28 }
  0xbe   :  { %p7307_p10 = scmp.ne.s32.totalorder %s211_s28, %s7306_s29  ;;  %p7312_p12 = scmp.lt.s32.totalorder %s7306_s29, %s7306_s29 }
  0xc0   :  { %p7313_p13 = por %p7312_p12, %p7311_p11 }
  0xc2   :  { %p7314_p0 = pnand %p7313_p13, %p7307_p10 }
  0xc4   :  { %7317 = shalt.err (!%p7314_p0)
}
  0xc5   :  { %216 = dma.hbm_to_vmem [thread:$0]  %s8144_s14, 4096, %s211_s28, [#allocation24], %s7429_s3, %s7429_s3, %s7430_s26  }
  0xc6   :  { %s7326_s12 = scalar_lea.vmem %s235_s11, 1024  ;;  %p7331_p2 = scmp.lt.s32.totalorder %s235_s11, %s235_s11 }
  0xc7   :  { %p7327_p1 = scmp.ne.s32.totalorder %s235_s11, %s7326_s12  ;;  %p7332_p3 = scmp.lt.s32.totalorder %s7326_s12, %s7326_s12 }
  0xc9   :  { %p7333_p4 = por %p7332_p3, %p7331_p2 }
  0xcb   :  { %p7334_p5 = pnand %p7333_p4, %p7327_p1 }
  0xcd   :  { %7337 = shalt.err (!%p7334_p5)
}
  0xce   :  { %240 = dma.hbm_to_vmem [thread:$0]  %s8146_s16, 1024, %s235_s11, [#allocation27], %s7433_s23, %s7433_s23, %s7434_s22  }
  0xcf   :  { %s7450_s7 = smov [#allocation31]   ;;  %s7451_s9 = smov [#allocation32]  }
  0xd0   :  { %s258_s27 = sshll.u32 %s7450_s7, 4  ;;  %s270_s6 = sshll.u32 %s7451_s9, 4  ;;  %s259_s27 = int_to_ptr.vmem [resolvable:$true] %s258_s27  ;;  %s271_s6 = int_to_ptr.vmem [resolvable:$true] %s270_s6 }
  0xd1   :  { %s7346_s14 = scalar_lea.vmem %s259_s27, 1024  ;;  %p7351_p7 = scmp.lt.s32.totalorder %s259_s27, %s259_s27 }
  0xd2   :  { %p7347_p6 = scmp.ne.s32.totalorder %s259_s27, %s7346_s14  ;;  %p7352_p8 = scmp.lt.s32.totalorder %s7346_s14, %s7346_s14 }
  0xd4   :  { %p7353_p9 = por %p7352_p8, %p7351_p7 }
  0xd6   :  { %p7354_p10 = pnand %p7353_p9, %p7347_p6 }
  0xd8   :  { %7357 = shalt.err (!%p7354_p10)
}
  0xd9   :  { %264 = dma.hbm_to_vmem [thread:$0]  %s8148_s18, 1024, %s259_s27, [#allocation30], %s7433_s23, %s7433_s23, %s7434_s22  }
  0xda   :  { %s7366_s16 = scalar_lea.vmem %s271_s6, 1024  ;;  %p7371_p12 = scmp.lt.s32.totalorder %s271_s6, %s271_s6 }
  0xdb   :  { %p7367_p11 = scmp.ne.s32.totalorder %s271_s6, %s7366_s16  ;;  %p7372_p13 = scmp.lt.s32.totalorder %s7366_s16, %s7366_s16 }
  0xdd   :  { %p7373_p0 = por %p7372_p13, %p7371_p12 }
  0xdf   :  { %p7374_p1 = pnand %p7373_p0, %p7367_p11 }
  0xe1   :  { %7377 = shalt.err (!%p7374_p1)
}
  0xe2   :  { %276 = dma.hbm_to_vmem [thread:$0]  %s8149_s19, 1024, %s271_s6, [#allocation33], %s7433_s23, %s7433_s23, %s7434_s22  }
  0xe3   :  { %7398 = dma.done.wait [#allocation3], 512  }
  0xe4   :  { %7399 = vsyncadd [#allocation3], 4294966784 }
  0xe5   :  { %7400 = dma.done.wait [#allocation6], 1280  }
  0xe6   :  { %7401 = vsyncadd [#allocation6], 4294966016 }
  0xe7   :  { %7402 = dma.done.wait [#allocation9], 6656  }
  0xe8   :  { %7403 = vsyncadd [#allocation9], 4294960640 }
  0xe9   :  { %7404 = dma.done.wait [#allocation12], 12288  }
  0xea   :  { %7405 = vsyncadd [#allocation12], 4294955008 }
  0xeb   :  { %7406 = dma.done.wait [#allocation15], 4096  }
  0xec   :  { %7407 = vsyncadd [#allocation15], 4294963200 }
  0xed   :  { %7408 = dma.done.wait [#allocation18], 5120  }
  0xee   :  { %7409 = vsyncadd [#allocation18], 4294962176 }
  0xef   :  { %7410 = dma.done.wait [#allocation21], 7168  }
  0xf0   :  { %7411 = vsyncadd [#allocation21], 4294960128 }
  0xf1   :  { %7412 = dma.done.wait [#allocation24], 5120  }
  0xf2   :  { %7413 = vsyncadd [#allocation24], 4294962176 }
  0xf3   :  { %7414 = dma.done.wait [#allocation27], 5120  }
  0xf4   :  { %7415 = vsyncadd [#allocation27], 4294962176 }
  0xf5   :  { %7416 = dma.done.wait [#allocation30], 2048  }
  0xf6   :  { %7417 = vsyncadd [#allocation30], 4294965248 }
  0xf7   :  { %7418 = dma.done.wait [#allocation33], 1024  }
  0xf8   :  { %7419 = vsyncadd [#allocation33], 4294966272  ;;  %v6346_v0 = vld [vmem:[#allocation10 + $0x74] ss:$8 sps:$4 sm:$0xff]   ;;  %v6348_v1 = vld [vmem:[#allocation10 + $0x70] ss:$8 sps:$4 sm:$0xff]   ;;  %v378_v38 = vlaneseq }
  0xf9   :  { %548 = vmatprep.subr.bf16.mxu0 %v6346_v0  ;;  %v6349_v2 = vld [vmem:[#allocation10 + $0x64] ss:$8 sps:$4 sm:$0xff]   ;;  %v6351_v3 = vld [vmem:[#allocation10 + $0x60] ss:$8 sps:$4 sm:$0xff]   ;;  %v6352_v4 = vld [vmem:[#allocation10 + $0x54] ss:$8 sps:$4 sm:$0xff]  }
  0xfa   :  { %549 = vmatpush1.bf16.msra.mxu0 %v6348_v1  ;;  %v6354_v5 = vld [vmem:[#allocation10 + $0x50] ss:$8 sps:$4 sm:$0xff]   ;;  %v6355_v6 = vld [vmem:[#allocation10 + $0x44] ss:$8 sps:$4 sm:$0xff]   ;;  %v6357_v7 = vld [vmem:[#allocation10 + $0x40] ss:$8 sps:$4 sm:$0xff]  }
  0xfb   :  { %550 = vmatprep.subr.bf16.mxu0 %v6349_v2  ;;  %v6358_v8 = vld [vmem:[#allocation10 + $0x34] ss:$8 sps:$4 sm:$0xff]   ;;  %v6360_v9 = vld [vmem:[#allocation10 + $0x30] ss:$8 sps:$4 sm:$0xff]   ;;  %v6361_v10 = vld [vmem:[#allocation10 + $0x24] ss:$8 sps:$4 sm:$0xff]  }
  0xfc   :  { %v6363_v11 = vld [vmem:[#allocation10 + $0x20] ss:$8 sps:$4 sm:$0xff]   ;;  %v6364_v12 = vld [vmem:[#allocation10 + $0x14] ss:$8 sps:$4 sm:$0xff]   ;;  %v6366_v15 = vld [vmem:[#allocation10 + $0x10] ss:$8 sps:$4 sm:$0xff]  }
  0xfd   :  { %v339_v13 = vld [vmem:[#allocation2 + $0x8] sm:$0xff]  ;;  %v341_v14 = vld [vmem:[#allocation2 + $0x18] sm:$0xff]  ;;  %v338_v35 = vld [vmem:[#allocation2] sm:$0xff]  ;;  %v7674_v39 = vshrl.u32 %v378_v38, 7  ;;  %vm7453_vm0 = vmmov 0   ;;  %vm2155_vm1 = vcmask 261120  }
  0xfe   :  { %551 = vmatpush1.bf16.msra.mxu0 %v6351_v3  ;;  %v6367_v16 = vld [vmem:[#allocation10 + $0x4] ss:$8 sps:$4 sm:$0xff]   ;;  %v375_v17 = vpack.c.bf16 %v341_v14, %v339_v13  ;;  %v6369_v18 = vld [vmem:[#allocation10] ss:$8 sps:$4 sm:$0xff]   ;;  %v6370_v19 = vld [vmem:[#allocation10 + $0xf4] ss:$8 sps:$4 sm:$0xff]  }
  0xff   :  { %552 = vmatprep.subr.bf16.mxu0 %v6352_v4  ;;  %v6372_v20 = vld [vmem:[#allocation10 + $0xf0] ss:$8 sps:$4 sm:$0xff]   ;;  %v6373_v21 = vld [vmem:[#allocation10 + $0xe4] ss:$8 sps:$4 sm:$0xff]   ;;  %v6375_v22 = vld [vmem:[#allocation10 + $0xe0] ss:$8 sps:$4 sm:$0xff]  }
 0x100   :  { %580 = vmatprep.mubr.bf16.mxu0 %v375_v17  ;;  %v6376_v23 = vld [vmem:[#allocation10 + $0xd4] ss:$8 sps:$4 sm:$0xff]   ;;  %v6378_v24 = vld [vmem:[#allocation10 + $0xd0] ss:$8 sps:$4 sm:$0xff]   ;;  %v6379_v25 = vld [vmem:[#allocation10 + $0xc4] ss:$8 sps:$4 sm:$0xff]  }
 0x101   :  { %v6381_v26 = vld [vmem:[#allocation10 + $0xc0] ss:$8 sps:$4 sm:$0xff]   ;;  %v6382_v27 = vld [vmem:[#allocation10 + $0xb4] ss:$8 sps:$4 sm:$0xff]   ;;  %v6384_v28 = vld [vmem:[#allocation10 + $0xb0] ss:$8 sps:$4 sm:$0xff]  }
 0x102   :  { %553 = vmatpush1.bf16.msra.mxu0 %v6354_v5  ;;  %v6385_v29 = vld [vmem:[#allocation10 + $0xa4] ss:$8 sps:$4 sm:$0xff]   ;;  %v6387_v30 = vld [vmem:[#allocation10 + $0xa0] ss:$8 sps:$4 sm:$0xff]   ;;  %v6388_v31 = vld [vmem:[#allocation10 + $0x94] ss:$8 sps:$4 sm:$0xff]  }
 0x103   :  { %554 = vmatprep.subr.bf16.mxu0 %v6355_v6  ;;  %v6390_v32 = vld [vmem:[#allocation10 + $0x90] ss:$8 sps:$4 sm:$0xff]   ;;  %v6391_v33 = vld [vmem:[#allocation10 + $0x84] ss:$8 sps:$4 sm:$0xff]   ;;  %v6393_v34 = vld [vmem:[#allocation10 + $0x80] ss:$8 sps:$4 sm:$0xff]  }
 0x104   :  { %v340_v36 = vld [vmem:[#allocation2 + $0x10] sm:$0xff]  ;;  %v7677_v40 = vsub.s32 0, %v7674_v39  ;;  %v7680_v42 = vsub.s32 1, %v7674_v39  ;;  %v6396_v54 = vld [vmem:[#allocation11 + $0xe8] ss:$16 sps:$4 sm:$0xff]   ;;  %s8163_s18 = smov 32  }
 0x105   :  { %v374_v37 = vpack.c.bf16 %v340_v36, %v338_v35  ;;  %v376_v41 = vld [vmem:[#allocation8] ss:$8 sm:$0x3]  ;;  %v6394_v53 = vld [vmem:[#allocation11 + $0xe4] ss:$16 sps:$4 sm:$0xff]   ;;  %s7455_s19 = smov 96  }
 0x106   :  { %555 = vmatpush1.bf16.msra.mxu0 %v6357_v7  ;;  %v381_v43 = vrot.slane %v376_v41, %v7677_v40  ;;  %v385_v44 = vrot.slane %v376_v41, %v7680_v42  ;;  %v6398_v55 = vld [vmem:[#allocation11 + $0xec] ss:$16 sps:$4 sm:$0xff]   ;;  %v6399_v56 = vld [vmem:[#allocation11 + $0xe0] ss:$16 sps:$4 sm:$0xff]   ;;  %v6400_v57 = vld [vmem:[#allocation11 + $0xc4] ss:$16 sps:$4 sm:$0xff]   ;;  %1055 = vmatprep.subr.bf16.mxu1 %v6394_v53 }
 0x107   :  { %556 = vmatprep.subr.bf16.mxu0 %v6358_v8  ;;  %v6404_v58 = vld [vmem:[#allocation11 + $0xcc] ss:$16 sps:$4 sm:$0xff]   ;;  %1056 = vmatpush1.bf16.msra.mxu1 %v6399_v56  ;;  %v6402_v59 = vld [vmem:[#allocation11 + $0xc8] ss:$16 sps:$4 sm:$0xff]   ;;  %v6405_v60 = vld [vmem:[#allocation11 + $0xc0] ss:$16 sps:$4 sm:$0xff]  }
 0x108   :  { %1057 = vmatprep.subr.bf16.mxu1 %v6400_v57  ;;  %v6406_v61 = vld [vmem:[#allocation11 + $0xa4] ss:$16 sps:$4 sm:$0xff]   ;;  %v6410_v62 = vld [vmem:[#allocation11 + $0xac] ss:$16 sps:$4 sm:$0xff]   ;;  %v6408_v63 = vld [vmem:[#allocation11 + $0xa8] ss:$16 sps:$4 sm:$0xff]  }
 0x109   :  { %v6411_v0 = vld [vmem:[#allocation11 + $0xa0] ss:$16 sps:$4 sm:$0xff]   ;;  %v6412_v1 = vld [vmem:[#allocation11 + $0x84] ss:$16 sps:$4 sm:$0xff]   ;;  %v6416_v2 = vld [vmem:[#allocation11 + $0x8c] ss:$16 sps:$4 sm:$0xff]  }
 0x10a   :  { %557 = vmatpush1.bf16.msra.mxu0 %v6360_v9  ;;  %v6414_v3 = vld [vmem:[#allocation11 + $0x88] ss:$16 sps:$4 sm:$0xff]   ;;  %v6417_v4 = vld [vmem:[#allocation11 + $0x80] ss:$16 sps:$4 sm:$0xff]   ;;  %v6418_v5 = vld [vmem:[#allocation11 + $0x64] ss:$16 sps:$4 sm:$0xff]  }
 0x10b   :  { %558 = vmatprep.subr.bf16.mxu0 %v6361_v10  ;;  %1058 = vmatpush1.bf16.msra.mxu1 %v6405_v60  ;;  %v6422_v6 = vld [vmem:[#allocation11 + $0x6c] ss:$16 sps:$4 sm:$0xff]   ;;  %v6420_v7 = vld [vmem:[#allocation11 + $0x68] ss:$16 sps:$4 sm:$0xff]   ;;  %v6423_v8 = vld [vmem:[#allocation11 + $0x60] ss:$16 sps:$4 sm:$0xff]  }
 0x10c   :  { %1059 = vmatprep.subr.bf16.mxu1 %v6406_v61  ;;  %v6424_v9 = vld [vmem:[#allocation11 + $0x44] ss:$16 sps:$4 sm:$0xff]   ;;  %v6428_v10 = vld [vmem:[#allocation11 + $0x4c] ss:$16 sps:$4 sm:$0xff]   ;;  %v6444_v41 = vld [vmem:[#allocation11 + $0x1e8] ss:$16 sps:$4 sm:$0xff]  }
 0x10d   :  { %v6430_v13 = vld [vmem:[#allocation11 + $0x24] ss:$16 sps:$4 sm:$0xff]   ;;  %v6434_v14 = vld [vmem:[#allocation11 + $0x2c] ss:$16 sps:$4 sm:$0xff]   ;;  %v6462_v53 = vld [vmem:[#allocation11 + $0x188] ss:$16 sps:$4 sm:$0xff]  }
 0x10e   :  { %559 = vmatpush1.bf16.msra.mxu0 %v6363_v11  ;;  %v6426_v11 = vld [vmem:[#allocation11 + $0x48] ss:$16 sps:$4 sm:$0xff]   ;;  %v6436_v17 = vld [vmem:[#allocation11 + $0x4] ss:$16 sps:$4 sm:$0xff]   ;;  %v6446_v38 = vld [vmem:[#allocation11 + $0x1ec] ss:$16 sps:$4 sm:$0xff]  }
 0x10f   :  { %560 = vmatprep.subr.bf16.mxu0 %v6364_v12  ;;  %1060 = vmatpush1.bf16.msra.mxu1 %v6411_v0  ;;  %v6429_v12 = vld [vmem:[#allocation11 + $0x40] ss:$16 sps:$4 sm:$0xff]   ;;  %v6466_v56 = vld [vmem:[#allocation11 + $0x164] ss:$16 sps:$4 sm:$0xff]   ;;  %v6470_v57 = vld [vmem:[#allocation11 + $0x16c] ss:$16 sps:$4 sm:$0xff]  }
 0x110   :  { %1061 = vmatprep.subr.bf16.mxu1 %v6412_v1  ;;  %v6472_v60 = vld [vmem:[#allocation11 + $0x144] ss:$16 sps:$4 sm:$0xff]   ;;  %v6476_v61 = vld [vmem:[#allocation11 + $0x14c] ss:$16 sps:$4 sm:$0xff]   ;;  %vm2245_vm2 = vcmask 523264   ;;  %vm2447_vm3 = vcmask 785408  }
 0x111   :  { %v6478_v0 = vld [vmem:[#allocation11 + $0x124] ss:$16 sps:$4 sm:$0xff]   ;;  %v6482_v1 = vld [vmem:[#allocation11 + $0x12c] ss:$16 sps:$4 sm:$0xff]  }
 0x112   :  { %561 = vmatpush1.bf16.msra.mxu0 %v6366_v15  ;;  %v6432_v15 = vld [vmem:[#allocation11 + $0x28] ss:$16 sps:$4 sm:$0xff]  }
 0x113   :  { %562 = vmatprep.subr.bf16.mxu0 %v6367_v16  ;;  %1062 = vmatpush1.bf16.msra.mxu1 %v6417_v4  ;;  %v6435_v16 = vld [vmem:[#allocation11 + $0x20] ss:$16 sps:$4 sm:$0xff]   ;;  %v6484_v4 = vld [vmem:[#allocation11 + $0x104] ss:$16 sps:$4 sm:$0xff]  }
 0x114   :  { %1063 = vmatprep.subr.bf16.mxu1 %v6418_v5  ;;  %v6488_v5 = vld [vmem:[#allocation11 + $0x10c] ss:$16 sps:$4 sm:$0xff]  }
 0x116   :  { %563 = vmatpush1.bf16.msra.mxu0 %v6369_v18  ;;  %v6440_v18 = vld [vmem:[#allocation11 + $0xc] ss:$16 sps:$4 sm:$0xff]  }
 0x117   :  { %564 = vmatprep.subr.bf16.mxu0 %v6370_v19  ;;  %1064 = vmatpush1.bf16.msra.mxu1 %v6423_v8  ;;  %v6438_v19 = vld [vmem:[#allocation11 + $0x8] ss:$16 sps:$4 sm:$0xff]  }
 0x118   :  { %1065 = vmatprep.subr.bf16.mxu1 %v6424_v9 }
 0x11a   :  { %565 = vmatpush2.bf16.msra.mxu0 %v6372_v20  ;;  %v6441_v20 = vld [vmem:[#allocation11] ss:$16 sps:$4 sm:$0xff]  }
 0x11b   :  { %566 = vmatprep.subr.bf16.mxu0 %v6373_v21  ;;  %1066 = vmatpush1.bf16.msra.mxu1 %v6429_v12 }
 0x11c   :  { %1067 = vmatprep.subr.bf16.mxu1 %v6430_v13 }
 0x11e   :  { %567 = vmatpush2.bf16.msra.mxu0 %v6375_v22 }
 0x11f   :  { %568 = vmatprep.subr.bf16.mxu0 %v6376_v23  ;;  %1068 = vmatpush1.bf16.msra.mxu1 %v6435_v16 }
 0x120   :  { %1069 = vmatprep.subr.bf16.mxu1 %v6436_v17 }
 0x122   :  { %569 = vmatpush2.bf16.msra.mxu0 %v6378_v24 }
 0x123   :  { %570 = vmatprep.subr.bf16.mxu0 %v6379_v25  ;;  %1070 = vmatpush1.bf16.msra.mxu1 %v6441_v20 }
 0x126   :  { %571 = vmatpush2.bf16.msra.mxu0 %v6381_v26 }
 0x127   :  { %572 = vmatprep.subr.bf16.mxu0 %v6382_v27 }
 0x12a   :  { %573 = vmatpush2.bf16.msra.mxu0 %v6384_v28 }
 0x12b   :  { %574 = vmatprep.subr.bf16.mxu0 %v6385_v29 }
 0x12e   :  { %575 = vmatpush2.bf16.msra.mxu0 %v6387_v30 }
 0x12f   :  { %576 = vmatprep.subr.bf16.mxu0 %v6388_v31 }
 0x132   :  { %577 = vmatpush2.bf16.msra.mxu0 %v6390_v32 }
 0x133   :  { %578 = vmatprep.subr.bf16.mxu0 %v6391_v33 }
 0x136   :  { %579 = vmatpush2.bf16.msra.mxu0 %v6393_v34 }
 0x137   :  { %1098 = vmatprep.subr.bf16.mxu0 %v6398_v55  ;;  %v6465_v55 = vld [vmem:[#allocation11 + $0x180] ss:$16 sps:$4 sm:$0xff]  }
 0x139   :  { %581 = vmatmul.mubr.bf16.vlgmr.msra.gmra.mxu0 %v374_v37  ;;  %v6442_v37 = vld [vmem:[#allocation11 + $0x1e4] ss:$16 sps:$4 sm:$0xff]  }
 0x13a   :  { %1099 = vmatpush1.bf16.msra.mxu0 %v6396_v54  ;;  %1071 = vmatprep.subr.bf16.mxu1 %v6442_v37  ;;  %v6464_v54 = vld [vmem:[#allocation11 + $0x18c] ss:$16 sps:$4 sm:$0xff]  }
 0x13b   :  { %1100 = vmatprep.subr.bf16.mxu0 %v6404_v58  ;;  %v6468_v58 = vld [vmem:[#allocation11 + $0x168] ss:$16 sps:$4 sm:$0xff]  }
 0x13e   :  { %1101 = vmatpush1.bf16.msra.mxu0 %v6402_v59  ;;  %v6471_v59 = vld [vmem:[#allocation11 + $0x160] ss:$16 sps:$4 sm:$0xff]  }
 0x13f   :  { %1102 = vmatprep.subr.bf16.mxu0 %v6410_v62  ;;  %v6474_v62 = vld [vmem:[#allocation11 + $0x148] ss:$16 sps:$4 sm:$0xff]  }
 0x142   :  { %1103 = vmatpush1.bf16.msra.mxu0 %v6408_v63  ;;  %v6477_v63 = vld [vmem:[#allocation11 + $0x140] ss:$16 sps:$4 sm:$0xff]  }
 0x143   :  { %1104 = vmatprep.subr.bf16.mxu0 %v6416_v2  ;;  %v6480_v2 = vld [vmem:[#allocation11 + $0x128] ss:$16 sps:$4 sm:$0xff]  }
 0x146   :  { %1105 = vmatpush1.bf16.msra.mxu0 %v6414_v3  ;;  %v6483_v3 = vld [vmem:[#allocation11 + $0x120] ss:$16 sps:$4 sm:$0xff]  }
 0x147   :  { %1106 = vmatprep.subr.bf16.mxu0 %v6422_v6  ;;  %v6486_v6 = vld [vmem:[#allocation11 + $0x108] ss:$16 sps:$4 sm:$0xff]  }
 0x14a   :  { %1107 = vmatpush1.bf16.msra.mxu0 %v6420_v7  ;;  %v6489_v7 = vld [vmem:[#allocation11 + $0x100] ss:$16 sps:$4 sm:$0xff]  }
 0x14b   :  { %1108 = vmatprep.subr.bf16.mxu0 %v6428_v10 }
 0x14e   :  { %1109 = vmatpush1.bf16.msra.mxu0 %v6426_v11 }
 0x14f   :  { %1110 = vmatprep.subr.bf16.mxu0 %v6434_v14 }
 0x152   :  { %1111 = vmatpush1.bf16.msra.mxu0 %v6432_v15 }
 0x153   :  { %1112 = vmatprep.subr.bf16.mxu0 %v6440_v18 }
 0x156   :  { %1113 = vmatpush1.bf16.msra.mxu0 %v6438_v19 }
 0x157   :  { %1114 = vmatprep.subr.bf16.mxu0 %v6446_v38 }
 0x15a   :  { %1115 = vmatpush2.bf16.msra.mxu0 %v6444_v41 }
 0x1f9   :  { %v582_v45 = vpop.f32.mrf.mxu0 }
 0x1fa   :  { %v7684_v46 = vadd.f32 %v582_v45, %v381_v43  ;;  %v6452_v45 = vld [vmem:[#allocation11 + $0x1cc] ss:$16 sps:$4 sm:$0xff]  }
 0x1fb   :  { %v584_v47 = vpop.f32.mrf.mxu0  ;;  %1116 = vmatprep.subr.bf16.mxu0 %v6452_v45 }
 0x1fc   :  { %v7686_v48 = vadd.f32 %v584_v47, %v385_v44  ;;  %593 = vadd.xlane.f32.xlu1 %v7684_v46  ;;  %v6453_v47 = vld [vmem:[#allocation11 + $0x1c0] ss:$16 sps:$4 sm:$0xff]  }
 0x1fd   :  { %v586_v49 = vpop.f32.mrf.mxu0 }
 0x1fe   :  { %v7689_v50 = vadd.f32 %v586_v49, %v381_v43  ;;  %620 = vadd.xlane.f32.xlu0 %v7686_v48  ;;  %v6447_v43 = vld [vmem:[#allocation11 + $0x1e0] ss:$16 sps:$4 sm:$0xff]   ;;  %v6458_v49 = vld [vmem:[#allocation11 + $0x1ac] ss:$16 sps:$4 sm:$0xff]  }
 0x1ff   :  { %v588_v51 = vpop.f32.mrf.mxu0  ;;  %1072 = vmatpush2.bf16.msra.mxu1 %v6447_v43 }
 0x200   :  { %v7692_v52 = vadd.f32 %v588_v51, %v385_v44  ;;  %595 = vadd.xlane.f32.xlu1 %v7689_v50  ;;  %v6448_v44 = vld [vmem:[#allocation11 + $0x1c4] ss:$16 sps:$4 sm:$0xff]   ;;  %v6459_v51 = vld [vmem:[#allocation11 + $0x1a0] ss:$16 sps:$4 sm:$0xff]  }
 0x201   :  { %1073 = vmatprep.subr.bf16.mxu1 %v6448_v44 }
 0x202   :  { %622 = vadd.xlane.f32.xlu0 %v7692_v52 }
 0x203   :  { %1074 = vmatpush2.bf16.msra.mxu1 %v6453_v47  ;;  %v7726_v47 = vsub.s32 3, %v7674_v39 }
 0x285   :  { %v594_v21 = vpop.xlane.xlu1 %593 }
 0x286   :  { %v598_v23 = vmul.f32 0.0078125, %v594_v21 }
 0x287   :  { %v621_v22 = vpop.xlane.xlu0 %620 }
 0x288   :  { %v624_v24 = vmul.f32 0.0078125, %v621_v22  ;;  %v7702_v31 = vsub.f32 %v7684_v46, %v598_v23  ;;  %v6450_v46 = vld [vmem:[#allocation11 + $0x1c8] ss:$16 sps:$4 sm:$0xff]   ;;  %v591_v22 = vld [vmem:[#allocation8 + $0x1] ss:$0 sm:$0xff] }
 0x289   :  { %v596_v25 = vpop.xlane.xlu1 %595  ;;  %1117 = vmatpush2.bf16.msra.mxu0 %v6450_v46 }
 0x28a   :  { %v7697_v26 = vsub.f32 %v7686_v48, %v624_v24  ;;  %v599_v28 = vmul.f32 0.0078125, %v596_v25  ;;  %v602_v35 = vmul.f32 %v7702_v31, %v7702_v31  ;;  %v6454_v48 = vld [vmem:[#allocation11 + $0x1a4] ss:$16 sps:$4 sm:$0xff]   ;;  %1118 = vmatprep.subr.bf16.mxu0 %v6458_v49 }
 0x28b   :  { %v623_v27 = vpop.xlane.xlu0 %622  ;;  %1075 = vmatprep.subr.bf16.mxu1 %v6454_v48 }
 0x28c   :  { %v625_v29 = vmul.f32 0.0078125, %v623_v27  ;;  %v628_v30 = vmul.f32 %v7697_v26, %v7697_v26  ;;  %v7708_v33 = vsub.f32 %v7689_v50, %v599_v28  ;;  %v6456_v50 = vld [vmem:[#allocation11 + $0x1a8] ss:$16 sps:$4 sm:$0xff]   ;;  %1076 = vmatpush2.bf16.msra.mxu1 %v6459_v51 }
 0x28d   :  { %1119 = vmatpush2.bf16.msra.mxu0 %v6456_v50 }
 0x28e   :  { %v7705_v32 = vsub.f32 %v7692_v52, %v625_v29  ;;  %630 = vadd.xlane.f32.xlu0 %v628_v30  ;;  %v603_v36 = vmul.f32 %v7708_v33, %v7708_v33  ;;  %v6460_v52 = vld [vmem:[#allocation11 + $0x184] ss:$16 sps:$4 sm:$0xff]   ;;  %1120 = vmatprep.subr.bf16.mxu0 %v6464_v54  ;;  %v592_v29 = vld [vmem:[#allocation8 + $0x2] ss:$0 sm:$0xff] }
 0x28f   :  { %1077 = vmatprep.subr.bf16.mxu1 %v6460_v52 }
 0x290   :  { %v629_v34 = vmul.f32 %v7705_v32, %v7705_v32  ;;  %1078 = vmatpush2.bf16.msra.mxu1 %v6465_v55 }
 0x291   :  { %1121 = vmatpush2.bf16.msra.mxu0 %v6462_v53  ;;  %1079 = vmatprep.subr.bf16.mxu1 %v6466_v56 }
 0x292   :  { %632 = vadd.xlane.f32.xlu1 %v629_v34  ;;  %604 = vadd.xlane.f32.xlu0 %v602_v35 }
 0x293   :  { %1122 = vmatprep.subr.bf16.mxu0 %v6470_v57 }
 0x294   :  { %1080 = vmatpush2.bf16.msra.mxu1 %v6471_v59 }
 0x295   :  { %1123 = vmatpush2.bf16.msra.mxu0 %v6468_v58  ;;  %1081 = vmatprep.subr.bf16.mxu1 %v6472_v60 }
 0x296   :  { %606 = vadd.xlane.f32.xlu1 %v603_v36  ;;  %1124 = vmatprep.subr.bf16.mxu0 %v6476_v61 }
 0x298   :  { %1082 = vmatpush2.bf16.msra.mxu1 %v6477_v63 }
 0x299   :  { %1125 = vmatpush2.bf16.msra.mxu0 %v6474_v62  ;;  %1083 = vmatprep.subr.bf16.mxu1 %v6478_v0 }
 0x29a   :  { %1126 = vmatprep.subr.bf16.mxu0 %v6482_v1 }
 0x29c   :  { %1084 = vmatpush2.bf16.msra.mxu1 %v6483_v3 }
 0x29d   :  { %1127 = vmatpush2.bf16.msra.mxu0 %v6480_v2  ;;  %1085 = vmatprep.subr.bf16.mxu1 %v6484_v4 }
 0x29e   :  { %1128 = vmatprep.subr.bf16.mxu0 %v6488_v5 }
 0x2a0   :  { %1086 = vmatpush2.bf16.msra.mxu1 %v6489_v7 }
 0x2a1   :  { %1129 = vmatpush2.bf16.msra.mxu0 %v6486_v6 }
 0x317   :  { %v631_v8 = vpop.xlane.xlu0 %630 }
 0x318   :  { %v634_v9 = vmul.f32 0.0078125, %v631_v8 }
 0x31a   :  { %v636_v10 = vadd.f32 1e-05, %v634_v9 }
 0x31b   :  { %v605_v11 = vpop.xlane.xlu0 %604  ;;  %v633_v12 = vpop.xlane.xlu1 %632 }
 0x31c   :  { %6802 = vrsqrt.f32 %v636_v10  ;;  %v608_v13 = vmul.f32 0.0078125, %v605_v11  ;;  %v635_v14 = vmul.f32 0.0078125, %v633_v12 }
 0x31e   :  { %v610_v15 = vadd.f32 1e-05, %v608_v13  ;;  %v637_v16 = vadd.f32 1e-05, %v635_v14 }
 0x31f   :  { %v607_v17 = vpop.xlane.xlu1 %606 }
 0x320   :  { %6804 = vrsqrt.f32 %v610_v15  ;;  %v609_v18 = vmul.f32 0.0078125, %v607_v17 }
 0x321   :  { %6806 = vrsqrt.f32 %v637_v16 }
 0x322   :  { %v611_v19 = vadd.f32 1e-05, %v609_v18 }
 0x324   :  { %6808 = vrsqrt.f32 %v611_v19 }
 0x329   :  { %v6803_v20 = vpop.eup %6802 }
 0x32a   :  { %v640_v21 = vmul.f32 %v6803_v20, %v7697_v26 }
 0x32c   :  { %v642_v28 = vmul.f32 %v640_v21, %v591_v22 }
 0x32d   :  { %v6805_v23 = vpop.eup %6804 }
 0x32e   :  { %v6807_v24 = vpop.eup %6806  ;;  %v614_v25 = vmul.f32 %v6805_v23, %v7702_v31  ;;  %v644_v37 = vadd.f32 %v642_v28, %v592_v29  ;;  %v713_v31 = vld [vmem:[#allocation8 + $0x3] ss:$8 sm:$0xf] }
 0x32f   :  { %v641_v27 = vmul.f32 %v6807_v24, %v7705_v32  ;;  %v7721_v32 = vsub.s32 2, %v7674_v39  ;;  %v718_v46 = vrot.slane %v713_v31, %v7677_v40  ;;  %v730_v55 = vrot.slane %v713_v31, %v7726_v47 }
 0x330   :  { %v616_v36 = vmul.f32 %v614_v25, %v591_v22 }
 0x331   :  { %v6809_v30 = vpop.eup %6808  ;;  %v643_v34 = vmul.f32 %v641_v27, %v591_v22  ;;  %v726_v50 = vrot.slane %v713_v31, %v7721_v32 }
 0x332   :  { %v615_v35 = vmul.f32 %v6809_v30, %v7708_v33  ;;  %v618_v44 = vadd.f32 %v616_v36, %v592_v29  ;;  %v722_v33 = vrot.slane %v713_v31, %v7680_v42  ;;  %v6497_v31 = vld [vmem:[#allocation13 + $0x20] sm:$0xff]  }
 0x333   :  { %v645_v38 = vadd.f32 %v643_v34, %v592_v29 }
 0x334   :  { %v617_v41 = vmul.f32 %v615_v35, %v591_v22 }
 0x335   :  { %v711_v43 = vpack.c.bf16 %v645_v38, %v644_v37  ;;  %v6490_v37 = vld [vmem:[#allocation13 + $0x78] sm:$0xff]  }
 0x336   :  { %v619_v26 = vadd.f32 %v617_v41, %v592_v29  ;;  %v6491_v38 = vld [vmem:[#allocation13 + $0x38] sm:$0xff]   ;;  %v6492_v41 = vld [vmem:[#allocation13 + $0x70] sm:$0xff]   ;;  %5694 = vmatprep.subr.bf16.mxu1 %v6490_v37 }
 0x337   :  { %1087 = vmatprep.mubr.bf16.mxu1 %v711_v43  ;;  %1130 = vmatprep.mubr.bf16.mxu0 %v711_v43  ;;  %v6493_v43 = vld [vmem:[#allocation13 + $0x30] sm:$0xff]  }
 0x338   :  { %v710_v45 = vpack.c.bf16 %v619_v26, %v618_v44  ;;  %v6494_v44 = vld [vmem:[#allocation13 + $0x68] sm:$0xff]  }
 0x339   :  { %v6495_v26 = vld [vmem:[#allocation13 + $0x28] sm:$0xff]  }
 0x33a   :  { %1088 = vmatmul.mubr.bf16.vlgmr.msra.gmra.mxu1 %v710_v45  ;;  %1131 = vmatmul.mubr.bf16.vlgmr.msra.gmra.mxu0 %v710_v45  ;;  %v6496_v45 = vld [vmem:[#allocation13 + $0x60] sm:$0xff]  }
 0x33b   :  { %5695 = vmatpush3.bf16.msra.mxu1 %v6491_v38 }
 0x33c   :  { %5696 = vmatprep.subr.bf16.mxu1 %v6492_v41 }
 0x33f   :  { %5697 = vmatpush3.bf16.msra.mxu1 %v6493_v43 }
 0x340   :  { %5698 = vmatprep.subr.bf16.mxu1 %v6494_v44 }
 0x343   :  { %5699 = vmatpush3.bf16.msra.mxu1 %v6495_v26 }
 0x344   :  { %5700 = vmatprep.subr.bf16.mxu1 %v6496_v45 }
 0x347   :  { %5701 = vmatpush3.bf16.msra.mxu1 %v6497_v31 }
 0x3fa   :  { %v1089_v48 = vpop.f32.mrf.mxu1  ;;  %v1132_v49 = vpop.f32.mrf.mxu0 }
 0x3fb   :  { %v1090_v53 = vadd.f32 %v1089_v48, %v718_v46  ;;  %v1133_v58 = vadd.f32 %v1132_v49, %v726_v50  ;;  %v6500_v48 = vld [vmem:[#allocation13 + $0x50] sm:$0xff]  }
 0x3fc   :  { %v1091_v51 = vpop.f32.mrf.mxu1  ;;  %v1134_v52 = vpop.f32.mrf.mxu0  ;;  %v6501_v49 = vld [vmem:[#allocation13 + $0x10] sm:$0xff]  }
 0x3fd   :  { %v1092_v54 = vadd.f32 %v1091_v51, %v722_v33  ;;  %v1135_v61 = vadd.f32 %v1134_v52, %v730_v55  ;;  %v6503_v51 = vld [vmem:[#allocation13 + $0x8] sm:$0xff]   ;;  %v6504_v52 = vld [vmem:[#allocation13 + $0x40] sm:$0xff]  }
 0x3fe   :  { %v1093_v56 = vpop.f32.mrf.mxu1  ;;  %v1136_v57 = vpop.f32.mrf.mxu0 }
 0x3ff   :  { %v1145_v59 = vadd.f32 %v1092_v54, %v1090_v53  ;;  %v1094_v62 = vadd.f32 %v1093_v56, %v718_v46  ;;  %v1137_v1 = vadd.f32 %v1136_v57, %v726_v50  ;;  %v6498_v46 = vld [vmem:[#allocation13 + $0x58] sm:$0xff]   ;;  %v6502_v50 = vld [vmem:[#allocation13 + $0x48] sm:$0xff]  }
 0x400   :  { %v1095_v60 = vpop.f32.mrf.mxu1  ;;  %v1138_v0 = vpop.f32.mrf.mxu0  ;;  %5702 = vmatprep.subr.bf16.mxu1 %v6498_v46 }
 0x401   :  { %v1096_v63 = vadd.f32 %v1095_v60, %v722_v33  ;;  %v1146_v39 = vadd.f32 %v1145_v59, %v1133_v58  ;;  %v1139_v4 = vadd.f32 %v1138_v0, %v730_v55  ;;  %v6499_v33 = vld [vmem:[#allocation13 + $0x18] sm:$0xff]  }
 0x402   :  { %5703 = vmatpush3.bf16.msra.mxu1 %v6499_v33 }
 0x403   :  { %v1150_v2 = vadd.f32 %v1096_v63, %v1094_v62  ;;  %v1147_v3 = vadd.f32 %v1146_v39, %v1135_v61  ;;  %5704 = vmatprep.subr.bf16.mxu1 %v6500_v48 }
 0x405   :  { %1148 = vadd.xlane.f32.xlu0 %v1147_v3  ;;  %v1151_v5 = vadd.f32 %v1150_v2, %v1137_v1 }
 0x406   :  { %5705 = vmatpush3.bf16.msra.mxu1 %v6501_v49 }
 0x407   :  { %v1152_v6 = vadd.f32 %v1151_v5, %v1139_v4  ;;  %5706 = vmatprep.subr.bf16.mxu1 %v6502_v50 }
 0x409   :  { %1153 = vadd.xlane.f32.xlu1 %v1152_v6 }
 0x40a   :  { %5707 = vmatpush3.bf16.msra.mxu1 %v6503_v51 }
 0x40b   :  { %5708 = vmatprep.subr.bf16.mxu1 %v6504_v52 }
 0x48e   :  { %v1149_v7 = vpop.xlane.xlu0 %1148 }
 0x48f   :  { %v1156_v8 = vmul.f32 0.001953125, %v1149_v7 }
 0x491   :  { %v7730_v9 = vsub.f32 %v1090_v53, %v1156_v8  ;;  %v7732_v10 = vsub.f32 %v1092_v54, %v1156_v8  ;;  %v7734_v11 = vsub.f32 %v1133_v58, %v1156_v8  ;;  %v7736_v13 = vsub.f32 %v1135_v61, %v1156_v8  ;;  %v6505_v53 = vld [vmem:[#allocation13] sm:$0xff]   ;;  %v6506_v54 = vld [vmem:[#allocation13 + $0xf8] sm:$0xff]  }
 0x492   :  { %v1154_v12 = vpop.xlane.xlu1 %1153  ;;  %5709 = vmatpush3.bf16.msra.mxu1 %v6505_v53  ;;  %v1142_v61 = vld [vmem:[#allocation8 + $0x4] ss:$8 sm:$0xf] }
 0x493   :  { %v1157_v14 = vmul.f32 0.001953125, %v1154_v12  ;;  %v1166_v15 = vmul.f32 %v7730_v9, %v7730_v9  ;;  %v1167_v16 = vmul.f32 %v7732_v10, %v7732_v10  ;;  %v1168_v17 = vmul.f32 %v7734_v11, %v7734_v11  ;;  %5716 = vmatprep.subr.bf16.mxu1 %v6506_v54 }
 0x494   :  { %v1169_v22 = vmul.f32 %v7736_v13, %v7736_v13  ;;  %v1202_v39 = vrot.slane %v1142_v61, %v7677_v40  ;;  %v1214_v0 = vrot.slane %v1142_v61, %v7726_v47  ;;  %v1210_v46 = vrot.slane %v1142_v61, %v7721_v32 }
 0x495   :  { %v7744_v18 = vsub.f32 %v1094_v62, %v1157_v14  ;;  %v7746_v19 = vsub.f32 %v1096_v63, %v1157_v14  ;;  %v1174_v20 = vadd.f32 %v1167_v16, %v1166_v15  ;;  %v7748_v21 = vsub.f32 %v1137_v1, %v1157_v14  ;;  %v7762_v62 = vld [vmem:[#allocation8 + $0x5] ss:$8 sm:$0xf] }
 0x496   :  { %v7752_v24 = vsub.f32 %v1139_v4, %v1157_v14  ;;  %v1206_v63 = vrot.slane %v1142_v61, %v7680_v42  ;;  %v1235_v2 = vrot.slane %v7762_v62, %v7680_v42  ;;  %v1231_v5 = vrot.slane %v7762_v62, %v7677_v40 }
 0x497   :  { %v1175_v23 = vadd.f32 %v1174_v20, %v1168_v17  ;;  %v1170_v25 = vmul.f32 %v7744_v18, %v7744_v18  ;;  %v1171_v27 = vmul.f32 %v7746_v19, %v7746_v19  ;;  %v1172_v29 = vmul.f32 %v7748_v21, %v7748_v21 }
 0x498   :  { %v1173_v34 = vmul.f32 %v7752_v24, %v7752_v24  ;;  %v1243_v7 = vrot.slane %v7762_v62, %v7726_v47 }
 0x499   :  { %v1176_v28 = vadd.f32 %v1175_v23, %v1169_v22  ;;  %v1179_v30 = vadd.f32 %v1171_v27, %v1170_v25 }
 0x49b   :  { %1177 = vadd.xlane.f32.xlu0 %v1176_v28  ;;  %v1180_v35 = vadd.f32 %v1179_v30, %v1172_v29 }
 0x49d   :  { %v1181_v36 = vadd.f32 %v1180_v35, %v1173_v34 }
 0x49f   :  { %1182 = vadd.xlane.f32.xlu1 %v1181_v36 }
 0x524   :  { %v1178_v55 = vpop.xlane.xlu0 %1177 }
 0x525   :  { %v1184_v56 = vmul.f32 0.001953125, %v1178_v55 }
 0x527   :  { %v1186_v57 = vadd.f32 1e-05, %v1184_v56 }
 0x528   :  { %v1183_v58 = vpop.xlane.xlu1 %1182 }
 0x529   :  { %6810 = vrsqrt.f32 %v1186_v57  ;;  %v1185_v59 = vmul.f32 0.001953125, %v1183_v58 }
 0x52b   :  { %v1187_v60 = vadd.f32 1e-05, %v1185_v59 }
 0x52d   :  { %6812 = vrsqrt.f32 %v1187_v60 }
 0x536   :  { %v6811_v1 = vpop.eup %6810 }
 0x537   :  { %v1191_v3 = vmul.f32 %v6811_v1, %v7732_v10  ;;  %v1190_v4 = vmul.f32 %v6811_v1, %v7730_v9  ;;  %v1193_v6 = vmul.f32 %v6811_v1, %v7736_v13  ;;  %v1192_v31 = vmul.f32 %v6811_v1, %v7734_v11 }
 0x538   :  { %v1239_v11 = vrot.slane %v7762_v62, %v7721_v32  ;;  %v6511_v62 = vld [vmem:[#allocation13 + $0xa8] sm:$0xff]  }
 0x539   :  { %v1220_v8 = vmul.f32 %v1206_v63, %v1191_v3  ;;  %v1219_v12 = vmul.f32 %v1202_v39, %v1190_v4  ;;  %v1222_v14 = vmul.f32 %v1214_v0, %v1193_v6  ;;  %v6508_v4 = vld [vmem:[#allocation13 + $0xf0] sm:$0xff]  }
 0x53a   :  { %v6813_v15 = vpop.eup %6812 }
 0x53b   :  { %v1195_v16 = vmul.f32 %v6813_v15, %v7746_v19  ;;  %v1249_v17 = vadd.f32 %v1235_v2, %v1220_v8  ;;  %v1194_v20 = vmul.f32 %v6813_v15, %v7744_v18  ;;  %v1248_v10 = vadd.f32 %v1231_v5, %v1219_v12  ;;  %v6509_v8 = vld [vmem:[#allocation13 + $0xb0] sm:$0xff]   ;;  %v6510_v12 = vld [vmem:[#allocation13 + $0xe8] sm:$0xff]  }
 0x53c   :  { %v1197_v9 = vmul.f32 %v6813_v15, %v7752_v24  ;;  %v1251_v22 = vadd.f32 %v1243_v7, %v1222_v14  ;;  %v1196_v38 = vmul.f32 %v6813_v15, %v7748_v21 }
 0x53d   :  { %v1224_v23 = vmul.f32 %v1206_v63, %v1195_v16  ;;  %v1265_v25 = vmul.f32 0.70710677, %v1249_v17  ;;  %v1223_v27 = vmul.f32 %v1202_v39, %v1194_v20  ;;  %v1264_v13 = vmul.f32 0.70710677, %v1248_v10  ;;  %v6512_v16 = vld [vmem:[#allocation13 + $0xe0] sm:$0xff]   ;;  %v6514_v20 = vld [vmem:[#allocation13 + $0xd8] sm:$0xff]  }
 0x53e   :  { %v1226_v28 = vmul.f32 %v1214_v0, %v1197_v9  ;;  %v1267_v34 = vmul.f32 0.70710677, %v1251_v22  ;;  %v1257_v26 = vmul.f32 0.5, %v1249_v17  ;;  %v1256_v50 = vmul.f32 0.5, %v1248_v10  ;;  %v6507_v0 = vld [vmem:[#allocation13 + $0xb8] sm:$0xff]   ;;  %v6513_v17 = vld [vmem:[#allocation13 + $0xa0] sm:$0xff]  }
 0x53f   :  { %v1253_v29 = vadd.f32 %v1235_v2, %v1224_v23  ;;  %6814 = verf.f32 %v1265_v25  ;;  %v1252_v30 = vadd.f32 %v1231_v5, %v1223_v27  ;;  %v1259_v55 = vmul.f32 0.5, %v1251_v22  ;;  %v6515_v10 = vld [vmem:[#allocation13 + $0x98] sm:$0xff]   ;;  %v6516_v9 = vld [vmem:[#allocation13 + $0xd0] sm:$0xff]   ;;  %v6518_v23 = vld [vmem:[#allocation13 + $0xc8] sm:$0xff]  }
 0x540   :  { %6816 = verf.f32 %v1264_v13  ;;  %v1255_v35 = vadd.f32 %v1243_v7, %v1226_v28  ;;  %v1225_v56 = vmul.f32 %v1210_v46, %v1196_v38  ;;  %v1221_v39 = vmul.f32 %v1210_v46, %v1192_v31  ;;  %v6517_v22 = vld [vmem:[#allocation13 + $0x90] sm:$0xff]   ;;  %v6519_v13 = vld [vmem:[#allocation13 + $0x88] sm:$0xff]   ;;  %v6520_v28 = vld [vmem:[#allocation13 + $0xc0] sm:$0xff]  }
 0x541   :  { %v1269_v36 = vmul.f32 0.70710677, %v1253_v29  ;;  %v1268_v19 = vmul.f32 0.70710677, %v1252_v30  ;;  %6818 = verf.f32 %v1267_v34  ;;  %v1261_v48 = vmul.f32 0.5, %v1253_v29 }
 0x542   :  { %v1271_v37 = vmul.f32 0.70710677, %v1255_v35  ;;  %v1260_v53 = vmul.f32 0.5, %v1252_v30  ;;  %v1263_v58 = vmul.f32 0.5, %v1255_v35  ;;  %v1254_v5 = vadd.f32 %v1239_v11, %v1225_v56  ;;  %v6521_v35 = vld [vmem:[#allocation13 + $0x80] sm:$0xff]  }
 0x543   :  { %6820 = verf.f32 %v1269_v36  ;;  %v1250_v7 = vadd.f32 %v1239_v11, %v1221_v39  ;;  %v6522_v39 = vld [vmem:[#allocation14 + $0x38] sm:$0xff]   ;;  %v7452_v11 = vmov 0.0  }
 0x544   :  { %6822 = verf.f32 %v1268_v19  ;;  %v1270_v14 = vmul.f32 0.70710677, %v1254_v5  ;;  %v1262_v30 = vmul.f32 0.5, %v1254_v5  ;;  %5939 = vmatprep.subr.bf16.mxu0 %v7452_v11  ;;  %5955 = vmatprep.mubr.msk.bf16.mxu0 %vm7453_vm0, %v7452_v11  ;;  %v6529_v5 = vld [vmem:[#allocation14] sm:$0xff]  }
 0x545   :  { %6824 = verf.f32 %v1271_v37  ;;  %v1266_v15 = vmul.f32 0.70710677, %v1250_v7  ;;  %v1258_v36 = vmul.f32 0.5, %v1250_v7  ;;  %5940 = vmatpush3.bf16.msra.mxu0 %v6522_v39  ;;  %v6537_v39 = vld [vmem:[#allocation16 + $0x98] ss:$12 sps:$4 sm:$0xff]  }
 0x546   :  { %6826 = verf.f32 %v1270_v14  ;;  %5941 = vmatprep.subr.bf16.mxu0 %v7452_v11 }
 0x547   :  { %6828 = verf.f32 %v1266_v15 }
 0x54c   :  { %v6815_v18 = vpop.eup %6814 }
 0x54d   :  { %v6817_v24 = vpop.eup %6816  ;;  %v1281_v43 = vadd.f32 1.0, %v6815_v18 }
 0x54e   :  { %v6819_v41 = vpop.eup %6818  ;;  %v1280_v45 = vadd.f32 1.0, %v6817_v24 }
 0x54f   :  { %v1283_v51 = vadd.f32 1.0, %v6819_v41  ;;  %v1289_v21 = vmul.f32 %v1281_v43, %v1257_v26  ;;  %v1364_v26 = vld [vmem:[#allocation8 + $0x6] ss:$0 sm:$0xff] }
 0x550   :  { %v6821_v44 = vpop.eup %6820  ;;  %v1288_v60 = vmul.f32 %v1280_v45, %v1256_v50 }
 0x551   :  { %v6823_v33 = vpop.eup %6822  ;;  %v1285_v49 = vadd.f32 1.0, %v6821_v44  ;;  %v1291_v1 = vmul.f32 %v1283_v51, %v1259_v55 }
 0x552   :  { %v6825_v52 = vpop.eup %6824  ;;  %v1284_v54 = vadd.f32 1.0, %v6823_v33 }
 0x553   :  { %v1293_v57 = vmul.f32 %v1285_v49, %v1261_v48  ;;  %v1287_v59 = vadd.f32 1.0, %v6825_v52  ;;  %v6827_v25 = vpop.eup %6826 }
 0x554   :  { %v1292_v63 = vmul.f32 %v1284_v54, %v1260_v53  ;;  %v6829_v27 = vpop.eup %6828  ;;  %v1286_v29 = vadd.f32 1.0, %v6827_v25 }
 0x555   :  { %v1361_v61 = vpack.c.bf16 %v1293_v57, %v1289_v21  ;;  %v1295_v2 = vmul.f32 %v1287_v59, %v1263_v58  ;;  %v1282_v34 = vadd.f32 1.0, %v6829_v27 }
 0x556   :  { %v1360_v3 = vpack.c.bf16 %v1292_v63, %v1288_v60  ;;  %v1294_v19 = vmul.f32 %v1286_v29, %v1262_v30 }
 0x557   :  { %1589 = vmatprep.mubr.bf16.mxu1 %v1361_v61  ;;  %v1363_v6 = vpack.c.bf16 %v1295_v2, %v1291_v1  ;;  %v1290_v37 = vmul.f32 %v1282_v34, %v1258_v36  ;;  %v6523_v61 = vld [vmem:[#allocation14 + $0x30] sm:$0xff]   ;;  %v6525_v1 = vld [vmem:[#allocation14 + $0x20] sm:$0xff]   ;;  %v6526_v2 = vld [vmem:[#allocation14 + $0x18] sm:$0xff]  }
 0x558   :  { %1590 = vmatmul.mubr.bf16.vlgmr.msra.gmra.mxu1 %v1360_v3  ;;  %5942 = vmatpush3.bf16.msra.mxu0 %v6523_v61  ;;  %v6527_v3 = vld [vmem:[#allocation14 + $0x10] sm:$0xff]   ;;  %v6538_v61 = vld [vmem:[#allocation16 + $0x78] ss:$12 sps:$4 sm:$0xff]  }
 0x559   :  { %5717 = vmatpush3.bf16.msra.mxu1 %v6507_v0  ;;  %1630 = vmatprep.mubr.bf16.mxu1 %v1363_v6  ;;  %v1362_v18 = vpack.c.bf16 %v1294_v19, %v1290_v37  ;;  %v6524_v0 = vld [vmem:[#allocation14 + $0x28] sm:$0xff]  }
 0x55a   :  { %5718 = vmatprep.subr.bf16.mxu1 %v6508_v4  ;;  %5943 = vmatprep.subr.bf16.mxu0 %v7452_v11  ;;  %v6528_v4 = vld [vmem:[#allocation14 + $0x8] sm:$0xff]  }
 0x55c   :  { %5944 = vmatpush3.bf16.msra.mxu0 %v6524_v0  ;;  %v6540_v0 = vld [vmem:[#allocation16 + $0x7c] ss:$12 sps:$4 sm:$0xff]  }
 0x55d   :  { %5719 = vmatpush3.bf16.msra.mxu1 %v6509_v8  ;;  %5945 = vmatprep.subr.bf16.mxu0 %v7452_v11 }
 0x55e   :  { %5720 = vmatprep.subr.bf16.mxu1 %v6510_v12 }
 0x560   :  { %5946 = vmatpush3.bf16.msra.mxu0 %v6525_v1  ;;  %v6541_v1 = vld [vmem:[#allocation16 + $0x80] ss:$12 sps:$4 sm:$0xff]  }
 0x561   :  { %5721 = vmatpush3.bf16.msra.mxu1 %v6511_v62  ;;  %5947 = vmatprep.subr.bf16.mxu0 %v7452_v11 }
 0x562   :  { %5722 = vmatprep.subr.bf16.mxu1 %v6512_v16  ;;  %v1639_v16 = vld [vmem:[#allocation8 + $0x7] ss:$0 sm:$0xff] }
 0x564   :  { %5948 = vmatpush3.bf16.msra.mxu0 %v6526_v2  ;;  %v6544_v2 = vld [vmem:[#allocation16 + $0x64] ss:$12 sps:$4 sm:$0xff]  }
 0x565   :  { %5723 = vmatpush3.bf16.msra.mxu1 %v6513_v17  ;;  %5949 = vmatprep.subr.bf16.mxu0 %v7452_v11 }
 0x566   :  { %5724 = vmatprep.subr.bf16.mxu1 %v6514_v20  ;;  %v1640_v20 = vld [vmem:[#allocation8 + $0x20] ss:$0 sm:$0xff] }
 0x568   :  { %5950 = vmatpush3.bf16.msra.mxu0 %v6527_v3  ;;  %v6545_v3 = vld [vmem:[#allocation16 + $0x68] ss:$12 sps:$4 sm:$0xff]  }
 0x569   :  { %5725 = vmatpush3.bf16.msra.mxu1 %v6515_v10  ;;  %5951 = vmatprep.subr.bf16.mxu0 %v7452_v11 }
 0x56a   :  { %5726 = vmatprep.subr.bf16.mxu1 %v6516_v9 }
 0x56c   :  { %5952 = vmatpush3.bf16.msra.mxu0 %v6528_v4  ;;  %v6542_v4 = vld [vmem:[#allocation16 + $0x60] ss:$12 sps:$4 sm:$0xff]  }
 0x56d   :  { %5727 = vmatpush3.bf16.msra.mxu1 %v6517_v22  ;;  %5953 = vmatprep.subr.bf16.mxu0 %v7452_v11 }
 0x56e   :  { %5728 = vmatprep.subr.bf16.mxu1 %v6518_v23 }
 0x570   :  { %5954 = vmatpush3.bf16.msra.mxu0 %v6529_v5  ;;  %v6548_v5 = vld [vmem:[#allocation16 + $0x4c] ss:$12 sps:$4 sm:$0xff]  }
 0x571   :  { %5729 = vmatpush3.bf16.msra.mxu1 %v6519_v13  ;;  %5959 = vmatprep.subr.bf16.mxu0 %v7452_v11 }
 0x572   :  { %5730 = vmatprep.subr.bf16.mxu1 %v6520_v28 }
 0x575   :  { %5731 = vmatpush3.bf16.msra.mxu1 %v6521_v35 }
 0x578   :  { %1631 = vmatmul.mubr.bf16.vlgmr.msra.gmra.mxu1 %v1362_v18 }
 0x618   :  { %v5710_v24 = vpop.f32.mrf.mxu1 }
 0x61a   :  { %v5711_v38 = vpop.f32.mrf.mxu1 }
 0x61b   :  { %v5712_v44 = vadd.f32 %v5711_v38, %v5710_v24  ;;  %v1694_v38 = vld [vmem:[#allocation8 + $0x21] ss:$0 sm:$0xff] }
 0x61c   :  { %v5713_v41 = vpop.f32.mrf.mxu1 }
 0x61d   :  { %v1592_v46 = vadd.f32 %v5712_v44, %v1364_v26 }
 0x61e   :  { %v5714_v43 = vpop.f32.mrf.mxu1 }
 0x61f   :  { %v5715_v33 = vadd.f32 %v5714_v43, %v5713_v41  ;;  %v1784_v43 = vld [vmem:[#allocation5] sm:$0xff] }
 0x621   :  { %v1595_v52 = vadd.f32 %v5715_v33, %v1364_v26 }
 0x638   :  { %v5732_v45 = vpop.f32.mrf.mxu1 }
 0x63a   :  { %v5733_v31 = vpop.f32.mrf.mxu1 }
 0x63b   :  { %v5734_v48 = vadd.f32 %v5733_v31, %v5732_v45 }
 0x63c   :  { %v5735_v49 = vpop.f32.mrf.mxu1 }
 0x63d   :  { %v1633_v50 = vadd.f32 %v5734_v48, %v1592_v46  ;;  %v1785_v46 = vld [vmem:[#allocation5 + $0x8] sm:$0xff] }
 0x63e   :  { %v5736_v51 = vpop.f32.mrf.mxu1 }
 0x63f   :  { %v5737_v53 = vadd.f32 %v5736_v51, %v5735_v49  ;;  %1641 = vadd.xlane.f32.xlu0 %v1633_v50  ;;  %v6532_v51 = vld [vmem:[#allocation16 + $0xac] ss:$12 sps:$4 sm:$0xff]  }
 0x640   :  { %2003 = vmatprep.subr.bf16.mxu1 %v6532_v51 }
 0x641   :  { %v1636_v54 = vadd.f32 %v5737_v53, %v1595_v52  ;;  %v6533_v52 = vld [vmem:[#allocation16 + $0xb0] ss:$12 sps:$4 sm:$0xff]  }
 0x643   :  { %1643 = vadd.xlane.f32.xlu1 %v1636_v54 }
 0x6c8   :  { %v1642_v55 = vpop.xlane.xlu0 %1641 }
 0x6c9   :  { %v1645_v56 = vmul.f32 0.0078125, %v1642_v55 }
 0x6cb   :  { %v1647_v21 = vsub.f32 %v1633_v50, %v1645_v56  ;;  %v6530_v50 = vld [vmem:[#allocation16 + $0xa8] ss:$12 sps:$4 sm:$0xff]  }
 0x6cc   :  { %v1644_v57 = vpop.xlane.xlu1 %1643  ;;  %2004 = vmatpush1.bf16.msra.mxu1 %v6530_v50 }
 0x6cd   :  { %v1646_v58 = vmul.f32 0.0078125, %v1644_v57  ;;  %v1649_v59 = vmul.f32 %v1647_v21, %v1647_v21 }
 0x6cf   :  { %v1648_v60 = vsub.f32 %v1636_v54, %v1646_v58  ;;  %1651 = vadd.xlane.f32.xlu0 %v1649_v59 }
 0x6d1   :  { %v1650_v63 = vmul.f32 %v1648_v60, %v1648_v60 }
 0x6d3   :  { %1653 = vadd.xlane.f32.xlu1 %v1650_v63  ;;  %v6536_v63 = vld [vmem:[#allocation16 + $0x94] ss:$12 sps:$4 sm:$0xff]  }
 0x6d4   :  { %2005 = vmatprep.subr.bf16.mxu1 %v6536_v63 }
 0x758   :  { %v1652_v6 = vpop.xlane.xlu0 %1651 }
 0x759   :  { %v1655_v7 = vmul.f32 0.0078125, %v1652_v6  ;;  %v6549_v6 = vld [vmem:[#allocation16 + $0x50] ss:$12 sps:$4 sm:$0xff]  }
 0x75b   :  { %v1657_v8 = vadd.f32 1e-05, %v1655_v7  ;;  %v6546_v7 = vld [vmem:[#allocation16 + $0x48] ss:$12 sps:$4 sm:$0xff]  }
 0x75c   :  { %v1654_v12 = vpop.xlane.xlu1 %1653 }
 0x75d   :  { %6830 = vrsqrt.f32 %v1657_v8  ;;  %v1656_v14 = vmul.f32 0.0078125, %v1654_v12  ;;  %v6552_v8 = vld [vmem:[#allocation16 + $0x34] ss:$12 sps:$4 sm:$0xff]   ;;  %v7454_v12 = vmov 0  }
 0x75e   :  { %2035 = vmatprep.mubr.bf16.mxu1 %v7454_v12 }
 0x75f   :  { %v1658_v15 = vadd.f32 1e-05, %v1656_v14  ;;  %v6553_v14 = vld [vmem:[#allocation16 + $0x38] ss:$12 sps:$4 sm:$0xff]  }
 0x761   :  { %6832 = vrsqrt.f32 %v1658_v15  ;;  %v6550_v15 = vld [vmem:[#allocation16 + $0x30] ss:$12 sps:$4 sm:$0xff]  }
 0x76a   :  { %v6831_v62 = vpop.eup %6830 }
 0x76b   :  { %v1661_v17 = vmul.f32 %v6831_v62, %v1647_v21  ;;  %v6556_v62 = vld [vmem:[#allocation16 + $0x1c] ss:$12 sps:$4 sm:$0xff]  }
 0x76d   :  { %v1663_v10 = vmul.f32 %v1661_v17, %v1639_v16  ;;  %v6554_v17 = vld [vmem:[#allocation16 + $0x18] ss:$12 sps:$4 sm:$0xff]  }
 0x76e   :  { %v6833_v9 = vpop.eup %6832 }
 0x76f   :  { %v1662_v22 = vmul.f32 %v6833_v9, %v1648_v60  ;;  %v1665_v23 = vadd.f32 %v1663_v10, %v1640_v20  ;;  %v6534_v60 = vld [vmem:[#allocation16 + $0x90] ss:$12 sps:$4 sm:$0xff]   ;;  %v6561_v10 = vld [vmem:[#allocation16 + $0x8] ss:$12 sps:$4 sm:$0xff]   ;;  %v6558_v9 = vld [vmem:[#allocation16] ss:$12 sps:$4 sm:$0xff]  }
 0x770   :  { %2006 = vmatpush1.bf16.msra.mxu1 %v6534_v60 }
 0x771   :  { %v1664_v25 = vmul.f32 %v1662_v22, %v1639_v16  ;;  %v1669_v27 = vmul.f32 0.70710677, %v1665_v23  ;;  %v1667_v35 = vmul.f32 0.5, %v1665_v23  ;;  %2007 = vmatprep.subr.bf16.mxu1 %v6540_v0  ;;  %v6557_v16 = vld [vmem:[#allocation16 + $0x20] ss:$12 sps:$4 sm:$0xff]  }
 0x773   :  { %v1666_v13 = vadd.f32 %v1664_v25, %v1640_v20  ;;  %6834 = verf.f32 %v1669_v27  ;;  %v6560_v20 = vld [vmem:[#allocation16 + $0x4] ss:$12 sps:$4 sm:$0xff]  }
 0x774   :  { %2008 = vmatpush1.bf16.msra.mxu1 %v6538_v61 }
 0x775   :  { %v1670_v28 = vmul.f32 0.70710677, %v1666_v13  ;;  %v1668_v36 = vmul.f32 0.5, %v1666_v13  ;;  %2009 = vmatprep.subr.bf16.mxu1 %v6544_v2 }
 0x777   :  { %6836 = verf.f32 %v1670_v28 }
 0x778   :  { %2010 = vmatpush1.bf16.msra.mxu1 %v6542_v4 }
 0x779   :  { %2011 = vmatprep.subr.bf16.mxu1 %v6548_v5 }
 0x77c   :  { %2012 = vmatpush1.bf16.msra.mxu1 %v6546_v7 }
 0x77d   :  { %2013 = vmatprep.subr.bf16.mxu1 %v6552_v8 }
 0x780   :  { %v6835_v29 = vpop.eup %6834  ;;  %2014 = vmatpush1.bf16.msra.mxu1 %v6550_v15 }
 0x781   :  { %v1673_v30 = vadd.f32 1.0, %v6835_v29  ;;  %2015 = vmatprep.subr.bf16.mxu1 %v6556_v62 }
 0x783   :  { %v1675_v37 = vmul.f32 %v1673_v30, %v1667_v35 }
 0x784   :  { %v6837_v34 = vpop.eup %6836  ;;  %2016 = vmatpush1.bf16.msra.mxu1 %v6554_v17 }
 0x785   :  { %v1674_v19 = vadd.f32 1.0, %v6837_v34  ;;  %2017 = vmatprep.subr.bf16.mxu1 %v6560_v20  ;;  %v1788_v34 = vld [vmem:[#allocation8 + $0x22] ss:$0 sm:$0xff] }
 0x787   :  { %v1676_v18 = vmul.f32 %v1674_v19, %v1668_v36 }
 0x788   :  { %2018 = vmatpush1.bf16.msra.mxu1 %v6558_v9 }
 0x789   :  { %v1693_v24 = vpack.c.bf16 %v1676_v18, %v1675_v37  ;;  %v1789_v37 = vld [vmem:[#allocation8 + $0x23] ss:$0 sm:$0xff] }
 0x78b   :  { %5956 = vmatmul.mubr.bf16.vlgmr.msra.gmra.mxu0 %v1693_v24 }
 0x78c   :  { %5975 = vmatprep.mubr.msk.bf16.mxu0 %vm7453_vm0, %v7452_v11  ;;  %5960 = vmatpush3.bf16.msra.mxu0 %v6533_v52 }
 0x78d   :  { %5961 = vmatprep.subr.bf16.mxu0 %v7452_v11 }
 0x790   :  { %5962 = vmatpush3.bf16.msra.mxu0 %v6537_v39 }
 0x791   :  { %5963 = vmatprep.subr.bf16.mxu0 %v7452_v11 }
 0x794   :  { %5964 = vmatpush3.bf16.msra.mxu0 %v6541_v1 }
 0x795   :  { %5965 = vmatprep.subr.bf16.mxu0 %v7452_v11 }
 0x798   :  { %5966 = vmatpush3.bf16.msra.mxu0 %v6545_v3 }
 0x799   :  { %5967 = vmatprep.subr.bf16.mxu0 %v7452_v11 }
 0x79c   :  { %5968 = vmatpush3.bf16.msra.mxu0 %v6549_v6 }
 0x79d   :  { %5969 = vmatprep.subr.bf16.mxu0 %v7452_v11 }
 0x7a0   :  { %5970 = vmatpush3.bf16.msra.mxu0 %v6553_v14 }
 0x7a1   :  { %5971 = vmatprep.subr.bf16.mxu0 %v7452_v11 }
 0x7a4   :  { %5972 = vmatpush3.bf16.msra.mxu0 %v6557_v16 }
 0x7a5   :  { %5973 = vmatprep.subr.bf16.mxu0 %v7452_v11 }
 0x7a8   :  { %5974 = vmatpush3.bf16.msra.mxu0 %v6561_v10 }
 0x84b   :  { %v1777_v41 = vpop.f32.mrf.mxu0 }
 0x84c   :  { %v1778_v44 = vadd.f32 %v1777_v41, %v1694_v38 }
 0x84d   :  { %v5957_v26 = vpop.f32.mrf.mxu0 }
 0x84e   :  { %v1786_v45 = vadd.f32 %v1784_v43, %v1778_v44  ;;  %v1858_v43 = vld [vmem:[#allocation8 + $0x24] ss:$8 sm:$0x7] }
 0x84f   :  { %v1780_v31 = vpop.f32.mrf.mxu0 }
 0x850   :  { %v1781_v33 = vadd.f32 %v1780_v31, %v1694_v38  ;;  %1790 = vadd.xlane.f32.xlu0 %v1786_v45  ;;  %v1871_v31 = vrot.slane %v1858_v43, %v7721_v32 }
 0x851   :  { %v5958_v48 = vpop.f32.mrf.mxu0 }
 0x852   :  { %v1787_v49 = vadd.f32 %v1785_v46, %v1781_v33  ;;  %v1867_v48 = vrot.slane %v1858_v43, %v7680_v42 }
 0x854   :  { %1792 = vadd.xlane.f32.xlu1 %v1787_v49 }
 0x8d9   :  { %v1791_v53 = vpop.xlane.xlu0 %1790 }
 0x8da   :  { %v1794_v54 = vmul.f32 0.0078125, %v1791_v53 }
 0x8dc   :  { %v7798_v55 = vsub.f32 %v1786_v45, %v1794_v54  ;;  %v1863_v45 = vrot.slane %v1858_v43, %v7677_v40 }
 0x8dd   :  { %v1793_v56 = vpop.xlane.xlu1 %1792 }
 0x8de   :  { %v1795_v21 = vmul.f32 0.0078125, %v1793_v56  ;;  %v1798_v57 = vmul.f32 %v7798_v55, %v7798_v55 }
 0x8e0   :  { %v7802_v58 = vsub.f32 %v1787_v49, %v1795_v21  ;;  %1800 = vadd.xlane.f32.xlu0 %v1798_v57 }
 0x8e2   :  { %v1799_v59 = vmul.f32 %v7802_v58, %v7802_v58 }
 0x8e4   :  { %1802 = vadd.xlane.f32.xlu1 %v1799_v59 }
 0x969   :  { %v1801_v22 = vpop.xlane.xlu0 %1800 }
 0x96a   :  { %v1804_v23 = vmul.f32 0.0078125, %v1801_v22 }
 0x96c   :  { %v1806_v25 = vadd.f32 1e-12, %v1804_v23 }
 0x96d   :  { %v1803_v27 = vpop.xlane.xlu1 %1802 }
 0x96e   :  { %6838 = vrsqrt.f32 %v1806_v25  ;;  %v1805_v13 = vmul.f32 0.0078125, %v1803_v27 }
 0x970   :  { %v1807_v28 = vadd.f32 1e-12, %v1805_v13 }
 0x972   :  { %6840 = vrsqrt.f32 %v1807_v28 }
 0x97b   :  { %v6839_v29 = vpop.eup %6838 }
 0x97c   :  { %v1810_v30 = vmul.f32 %v6839_v29, %v7798_v55 }
 0x97e   :  { %v1812_v19 = vmul.f32 %v1810_v30, %v1788_v34 }
 0x97f   :  { %v6841_v35 = vpop.eup %6840 }
 0x980   :  { %v1811_v36 = vmul.f32 %v6841_v35, %v7802_v58  ;;  %v7815_v24 = vadd.f32 %v1812_v19, %v1789_v37 }
 0x982   :  { %v1813_v18 = vmul.f32 %v1811_v36, %v1788_v34 }
 0x984   :  { %v7817_v38 = vadd.f32 %v1813_v18, %v1789_v37  ;;  %v1816_v37 = vld [vmem:[#allocation7] sm:$0xff]  ;;  %v1818_v18 = vld [vmem:[#allocation7 + $0x10] sm:$0xff] }
 0x986   :  { %v1856_v41 = vpack.c.bf16 %v7817_v38, %v7815_v24 }
 0x988   :  { %2036 = vmatmul.mubr.bf16.vlgmr.msra.gmra.mxu1 %v1856_v41  ;;  %5976 = vmatmul.mubr.bf16.vlgmr.msra.gmra.mxu0 %v1856_v41 }
 0x989   :  { %2835 = vmatprep.mubr.bf16.mxu0 %v7454_v12 }
 0xa48   :  { %v2037_v44 = vpop.f32.mrf.mxu1  ;;  %v2080_v26 = vpop.f32.mrf.mxu0 }
 0xa49   :  { %v2038_v51 = vadd.f32 %v2037_v44, %v1863_v45  ;;  %v2081_v54 = vadd.f32 %v2080_v26, %v1871_v31  ;;  %v1817_v26 = vld [vmem:[#allocation7 + $0x8] sm:$0xff] }
 0xa4a   :  { %v2039_v46 = vpop.f32.mrf.mxu1  ;;  %v5977_v33 = vpop.f32.mrf.mxu0 }
 0xa4b   :  { %v2040_v21 = vadd.f32 %v2039_v46, %v1867_v48  ;;  %v1819_v46 = vld [vmem:[#allocation7 + $0x18] sm:$0xff] }
 0xa4c   :  { %v2041_v49 = vpop.f32.mrf.mxu1  ;;  %v2083_v50 = vpop.f32.mrf.mxu0 }
 0xa4d   :  { %v2042_v52 = vadd.f32 %v2041_v49, %v1863_v45  ;;  %v2084_v53 = vadd.f32 %v2083_v50, %v1871_v31 }
 0xa4e   :  { %v2043_v55 = vpop.f32.mrf.mxu1  ;;  %v5978_v56 = vpop.f32.mrf.mxu0 }
 0xa4f   :  { %v2044_v57 = vadd.f32 %v2043_v55, %v1867_v48  ;;  %v2147_v58 = vpack.c.bf16 %v2042_v52, %v2038_v51  ;;  %v7825_v59 = vpack.i.bf16 %v2084_v53, %v2081_v54  ;;  %v7828_v39 = vpack.c.bf16 %v2084_v53, %v2081_v54  ;;  %v1820_v54 = vld [vmem:[#allocation7 + $0x20] sm:$0xff]  ;;  %v1821_v56 = vld [vmem:[#allocation7 + $0x28] sm:$0xff] }
 0xa50   :  { %v6246_v61 = vpack.i.bf16 %v2042_v52, %v2038_v51 }
 0xa51   :  { %5987 = vmatprep.mubr.msk.bf16.mxu1 %vm2155_vm1, %v2147_v58  ;;  %v6231_v60 = vpack.i.bf16 %v2044_v57, %v2040_v21  ;;  %v2151_v63 = vpack.c.bf16 %v2044_v57, %v2040_v21  ;;  %v1822_v58 = vld [vmem:[#allocation7 + $0x30] sm:$0xff] }
 0xa53   :  { %6232 = vrot.lane.b32.xlu1 %v6231_v60, %s7433_s23  ;;  %6227 = vrot.lane.b32.xlu0 %v6231_v60, %s8163_s18  ;;  %v2169_v22 = vsel %vm2155_vm1, %v2151_v63, 0 }
 0xa57   :  { %6237 = vrot.lane.b32.xlu1 %v6231_v60, %s7455_s19  ;;  %6247 = vrot.lane.b32.xlu0 %v6246_v61, %s7433_s23  ;;  %v1823_v60 = vld [vmem:[#allocation7 + $0x38] sm:$0xff] }
 0xa5b   :  { %6242 = vrot.lane.b32.xlu1 %v6246_v61, %s7455_s19 }
 0xa5f   :  { %6252 = vrot.lane.b32.xlu1 %v6246_v61, %s8163_s18 }
 0xac5   :  { %v6233_v0 = vpop.permute.xlu1 %6232  ;;  %v6228_v1 = vpop.permute.xlu0 %6227 }
 0xac6   :  { %v6230_v2 = vunpack.i.h.bf16 %v6228_v1  ;;  %v6229_v3 = vunpack.i.l.bf16 %v6228_v1  ;;  %v6235_v4 = vunpack.i.h.bf16 %v6233_v0  ;;  %v6234_v5 = vunpack.i.l.bf16 %v6233_v0 }
 0xac8   :  { %v2154_v6 = vpack.c.bf16 %v6230_v2, %v6229_v3  ;;  %v2153_v7 = vpack.c.bf16 %v6235_v4, %v6234_v5 }
 0xac9   :  { %v6238_v14 = vpop.permute.xlu1 %6237  ;;  %v6248_v9 = vpop.permute.xlu0 %6247 }
 0xaca   :  { %6183 = vmatprep.subr.msk.bf16.mxu1 %vm2155_vm1, %v2154_v6  ;;  %v2178_v8 = vsel %vm2155_vm1, %v2154_v6, 0  ;;  %v6240_v15 = vunpack.i.h.bf16 %v6238_v14  ;;  %v6239_v62 = vunpack.i.l.bf16 %v6238_v14  ;;  %v2175_v17 = vsel %vm2155_vm1, %v2153_v7, 0 }
 0xacb   :  { %5980 = vmatpush3.bf16.xpose.msra.mxu1 %v2178_v8  ;;  %v6250_v27 = vunpack.i.h.bf16 %v6248_v9  ;;  %v6249_v13 = vunpack.i.l.bf16 %v6248_v9 }
 0xacc   :  { %6184 = vmatprep.subr.msk.bf16.mxu1 %vm2155_vm1, %v2153_v7  ;;  %v2152_v16 = vpack.c.bf16 %v6240_v15, %v6239_v62 }
 0xacd   :  { %v6243_v10 = vpop.permute.xlu1 %6242  ;;  %v2149_v29 = vpack.c.bf16 %v6250_v27, %v6249_v13 }
 0xace   :  { %v2172_v20 = vsel %vm2155_vm1, %v2152_v16, 0  ;;  %v6245_v23 = vunpack.i.h.bf16 %v6243_v10  ;;  %v6244_v25 = vunpack.i.l.bf16 %v6243_v10 }
 0xad0   :  { %v2148_v28 = vpack.c.bf16 %v6245_v23, %v6244_v25 }
 0xad1   :  { %v6253_v30 = vpop.permute.xlu1 %6252 }
 0xad2   :  { %v6255_v34 = vunpack.i.h.bf16 %v6253_v30  ;;  %v6254_v35 = vunpack.i.l.bf16 %v6253_v30 }
 0xad3   :  { %5982 = vmatpush3.bf16.xpose.msra.mxu1 %v2175_v17 }
 0xad4   :  { %6185 = vmatprep.subr.msk.bf16.mxu1 %vm2155_vm1, %v2152_v16  ;;  %v2150_v36 = vpack.c.bf16 %v6255_v34, %v6254_v35 }
 0xadb   :  { %5984 = vmatpush3.bf16.xpose.msra.mxu1 %v2172_v20 }
 0xadc   :  { %6186 = vmatprep.subr.msk.bf16.mxu1 %vm2155_vm1, %v2151_v63 }
 0xae3   :  { %5986 = vmatpush3.bf16.xpose.msra.mxu1 %v2169_v22 }
 0xaea   :  { %5988 = vmatmul.mubr.msk.bf16.vlgmr.msra.gmra.mxu1 %vm2155_vm1, %v2148_v28 }
 0xaeb   :  { %5991 = vmatprep.mubr.msk.bf16.mxu1 %vm2155_vm1, %v2149_v29 }
 0xaf2   :  { %5992 = vmatmul.mubr.msk.bf16.gmra.mxu1 %vm2155_vm1, %v2150_v36 }
 0xbaa   :  { %v5989_v19 = vpop.f32.mrf.mxu1 }
 0xbab   :  { %v2223_v45 = vadd.f32 %v5989_v19, %v1818_v18 }
 0xbac   :  { %v2214_v41 = vpop.f32.mrf.mxu1 }
 0xbad   :  { %v2215_v43 = vadd.f32 %v2214_v41, %v1816_v37  ;;  %v2252_v52 = vsel %vm2245_vm2, %v2223_v45, -inf }
 0xbae   :  { %v5990_v44 = vpop.f32.mrf.mxu1 }
 0xbaf   :  { %v2246_v31 = vsel %vm2245_vm2, %v2215_v43, -inf  ;;  %v2226_v50 = vadd.f32 %v5990_v44, %v1819_v46 }
 0xbb0   :  { %v2217_v33 = vpop.f32.mrf.mxu1  ;;  %2247 = vmax.xlane.f32.xlu0 %v2246_v31 }
 0xbb1   :  { %v2218_v48 = vadd.f32 %v2217_v33, %v1817_v26  ;;  %v2255_v57 = vsel %vm2245_vm2, %v2226_v50, -inf }
 0xbb2   :  { %v5993_v49 = vpop.f32.mrf.mxu1 }
 0xbb3   :  { %v2249_v51 = vsel %vm2245_vm2, %v2218_v48, -inf  ;;  %v2239_v0 = vadd.f32 %v5993_v49, %v1822_v58 }
 0xbb4   :  { %v2230_v53 = vpop.f32.mrf.mxu1  ;;  %2250 = vmax.xlane.f32.xlu1 %v2249_v51  ;;  %2253 = vmax.xlane.f32.xlu0 %v2252_v52 }
 0xbb5   :  { %v2231_v21 = vadd.f32 %v2230_v53, %v1820_v54  ;;  %v2264_v5 = vsel %vm2245_vm2, %v2239_v0, -inf }
 0xbb6   :  { %v5994_v55 = vpop.f32.mrf.mxu1 }
 0xbb7   :  { %v2242_v1 = vadd.f32 %v5994_v55, %v1823_v60  ;;  %v2258_v3 = vsel %vm2245_vm2, %v2231_v21, -inf }
 0xbb8   :  { %v2233_v63 = vpop.f32.mrf.mxu1  ;;  %2256 = vmax.xlane.f32.xlu0 %v2255_v57 }
 0xbb9   :  { %v2234_v61 = vadd.f32 %v2233_v63, %v1821_v56  ;;  %v2267_v4 = vsel %vm2245_vm2, %v2242_v1, -inf }
 0xbbb   :  { %v2261_v2 = vsel %vm2245_vm2, %v2234_v61, -inf }
 0xbbc   :  { %2262 = vmax.xlane.f32.xlu1 %v2261_v2  ;;  %2259 = vmax.xlane.f32.xlu0 %v2258_v3 }
 0xbc0   :  { %2268 = vmax.xlane.f32.xlu1 %v2267_v4  ;;  %2265 = vmax.xlane.f32.xlu0 %v2264_v5 }
 0xc39   :  { %v2248_v6 = vpop.xlane.xlu0 %2247 }
 0xc3a   :  { %v2270_v7 = vsub.f32 %v2215_v43, %v2248_v6 }
 0xc3c   :  { %v2278_v17 = vmul.f32 1.442695, %v2270_v7 }
 0xc3d   :  { %v2251_v8 = vpop.xlane.xlu1 %2250  ;;  %v2254_v14 = vpop.xlane.xlu0 %2253 }
 0xc3e   :  { %v2272_v15 = vsub.f32 %v2223_v45, %v2254_v14  ;;  %v2271_v62 = vsub.f32 %v2218_v48, %v2251_v8 }
 0xc40   :  { %v2282_v16 = vmul.f32 1.442695, %v2272_v15  ;;  %v2280_v9 = vmul.f32 1.442695, %v2271_v62 }
 0xc41   :  { %v2257_v20 = vpop.xlane.xlu0 %2256 }
 0xc42   :  { %v2273_v10 = vsub.f32 %v2226_v50, %v2257_v20  ;;  %6842 = vpow2.f32 %v2282_v16 }
 0xc43   :  { %6844 = vpow2.f32 %v2278_v17 }
 0xc44   :  { %v2284_v22 = vmul.f32 1.442695, %v2273_v10 }
 0xc45   :  { %v2260_v23 = vpop.xlane.xlu0 %2259  ;;  %v2263_v31 = vpop.xlane.xlu1 %2262 }
 0xc46   :  { %6846 = vpow2.f32 %v2284_v22  ;;  %v2274_v25 = vsub.f32 %v2231_v21, %v2260_v23  ;;  %v2275_v48 = vsub.f32 %v2234_v61, %v2263_v31 }
 0xc47   :  { %6848 = vpow2.f32 %v2280_v9 }
 0xc48   :  { %v2286_v29 = vmul.f32 1.442695, %v2274_v25  ;;  %v2288_v50 = vmul.f32 1.442695, %v2275_v48 }
 0xc49   :  { %v2266_v27 = vpop.xlane.xlu0 %2265  ;;  %v2269_v46 = vpop.xlane.xlu1 %2268 }
 0xc4a   :  { %v2276_v13 = vsub.f32 %v2239_v0, %v2266_v27  ;;  %v2277_v33 = vsub.f32 %v2242_v1, %v2269_v46 }
 0xc4c   :  { %v2290_v28 = vmul.f32 1.442695, %v2276_v13  ;;  %v2292_v49 = vmul.f32 1.442695, %v2277_v33  ;;  %v6568_v33 = vld [vmem:[#allocation17 + $0x8] sm:$0xff]  }
 0xc4e   :  { %6850 = vpow2.f32 %v2290_v28 }
 0xc4f   :  { %v7855_v30 = vpop.eup %6842  ;;  %6852 = vpow2.f32 %v2286_v29 }
 0xc50   :  { %v2300_v34 = vsel %vm2245_vm2, %v7855_v30, 0.0  ;;  %v6845_v35 = vpop.eup %6844  ;;  %6854 = vpow2.f32 %v2292_v49 }
 0xc51   :  { %2301 = vadd.xlane.f32.xlu0 %v2300_v34  ;;  %v2294_v18 = vsel %vm2245_vm2, %v6845_v35, 0.0  ;;  %6856 = vpow2.f32 %v2288_v50 }
 0xc53   :  { %v7859_v36 = vpop.eup %6846 }
 0xc54   :  { %v2303_v19 = vsel %vm2245_vm2, %v7859_v36, 0.0  ;;  %v6849_v37 = vpop.eup %6848 }
 0xc55   :  { %2304 = vadd.xlane.f32.xlu1 %v2303_v19  ;;  %2295 = vadd.xlane.f32.xlu0 %v2294_v18  ;;  %v2297_v41 = vsel %vm2245_vm2, %v6849_v37, 0.0 }
 0xc59   :  { %2298 = vadd.xlane.f32.xlu1 %v2297_v41  ;;  %v6563_v41 = vld [vmem:[#allocation17 + $0x30] sm:$0xff]  }
 0xc5b   :  { %v7865_v43 = vpop.eup %6850 }
 0xc5c   :  { %v2312_v44 = vsel %vm2245_vm2, %v7865_v43, 0.0  ;;  %v7869_v26 = vpop.eup %6852 }
 0xc5d   :  { %2313 = vadd.xlane.f32.xlu0 %v2312_v44  ;;  %v2306_v45 = vsel %vm2245_vm2, %v7869_v26, 0.0  ;;  %v7877_v51 = vpop.eup %6854  ;;  %v6564_v44 = vld [vmem:[#allocation17 + $0x28] sm:$0xff]  }
 0xc5e   :  { %v2315_v52 = vsel %vm2245_vm2, %v7877_v51, 0.0  ;;  %v6857_v53 = vpop.eup %6856 }
 0xc5f   :  { %v2309_v54 = vsel %vm2245_vm2, %v6857_v53, 0.0 }
 0xc61   :  { %2307 = vadd.xlane.f32.xlu0 %v2306_v45  ;;  %v6567_v45 = vld [vmem:[#allocation17 + $0x10] sm:$0xff]  }
 0xc6a   :  { %6262 = vrot.lane.b32.xlu1 %v7825_v59, %s7433_s23 }
 0xc77   :  { %6257 = vrot.lane.b32.xlu0 %v7825_v59, %s8163_s18 }
 0xc8e   :  { %2316 = vadd.xlane.f32.xlu1 %v2315_v52  ;;  %v6569_v52 = vld [vmem:[#allocation17] sm:$0xff]  }
 0xc92   :  { %2310 = vadd.xlane.f32.xlu1 %v2309_v54 }
 0xca3   :  { %6267 = vrot.lane.b32.xlu1 %v7825_v59, %s7455_s19 }
 0xcda   :  { %v2302_v55 = vpop.xlane.xlu0 %2301 }
 0xcde   :  { %v2305_v56 = vpop.xlane.xlu1 %2304  ;;  %v2296_v21 = vpop.xlane.xlu0 %2295 }
 0xcdf   :  { %6858 = vrcp.f32 %v2296_v21 }
 0xce2   :  { %v2299_v57 = vpop.xlane.xlu1 %2298 }
 0xce3   :  { %6860 = vrcp.f32 %v2299_v57 }
 0xce4   :  { %6862 = vrcp.f32 %v2305_v56 }
 0xce5   :  { %6864 = vrcp.f32 %v2302_v55 }
 0xce6   :  { %v2314_v58 = vpop.xlane.xlu0 %2313  ;;  %v6263_v63 = vpop.permute.xlu1 %6262 }
 0xce7   :  { %v6265_v2 = vunpack.i.h.bf16 %v6263_v63  ;;  %v6264_v3 = vunpack.i.l.bf16 %v6263_v63 }
 0xce9   :  { %v2340_v14 = vpack.c.bf16 %v6265_v2, %v6264_v3 }
 0xcea   :  { %v2308_v60 = vpop.xlane.xlu0 %2307 }
 0xceb   :  { %6866 = vrcp.f32 %v2308_v60 }
 0xcec   :  { %v6859_v61 = vpop.eup %6858 }
 0xced   :  { %v2326_v6 = vmul.f32 %v6859_v61, %v6845_v35 }
 0xcee   :  { %v6258_v0 = vpop.permute.xlu0 %6257 }
 0xcef   :  { %v6260_v4 = vunpack.i.h.bf16 %v6258_v0  ;;  %v6259_v5 = vunpack.i.l.bf16 %v6258_v0 }
 0xcf0   :  { %v6861_v1 = vpop.eup %6860 }
 0xcf1   :  { %v2327_v7 = vmul.f32 %v6861_v1, %v6849_v37  ;;  %v2341_v8 = vpack.c.bf16 %v6260_v4, %v6259_v5  ;;  %v6863_v9 = vpop.eup %6862 }
 0xcf2   :  { %v6865_v22 = vpop.eup %6864  ;;  %v2329_v23 = vmul.f32 %v6863_v9, %v7859_v36 }
 0xcf3   :  { %v2334_v59 = vpack.c.bf16 %v2327_v7, %v2326_v6  ;;  %5995 = vmatprep.subr.bf16.mxu1 %v2341_v8  ;;  %v2328_v27 = vmul.f32 %v6865_v22, %v7855_v30 }
 0xcf4   :  { %5996 = vmatpush3.bf16.msra.mxu1 %v2341_v8 }
 0xcf5   :  { %6003 = vmatprep.mubr.msk.bf16.mxu1 %vm2245_vm2, %v2334_v59  ;;  %5997 = vmatprep.subr.bf16.mxu1 %v2340_v14  ;;  %v2335_v28 = vpack.c.bf16 %v2329_v23, %v2328_v27  ;;  %v6572_v27 = vld [vmem:[#allocation19 + $0xe4] ss:$16 sps:$4 sm:$0xff]  }
 0xcf6   :  { %2803 = vmatprep.subr.bf16.mxu0 %v6572_v27  ;;  %v6620_v27 = vld [vmem:[#allocation20 + $0x38] sm:$0xff]  }
 0xcf8   :  { %5998 = vmatpush3.bf16.msra.mxu1 %v2340_v14  ;;  %v6867_v25 = vpop.eup %6866 }
 0xcf9   :  { %v2330_v29 = vmul.f32 %v6867_v25, %v7869_v26  ;;  %v6565_v26 = vld [vmem:[#allocation17 + $0x20] sm:$0xff]  }
 0xcfa   :  { %v6570_v25 = vld [vmem:[#allocation19 + $0xe0] ss:$16 sps:$4 sm:$0xff]  }
 0xcfb   :  { %2804 = vmatpush1.bf16.msra.mxu0 %v6570_v25  ;;  %v6619_v25 = vld [vmem:[#allocation20 + $0xf8] sm:$0xff]  }
 0xd17   :  { %v2317_v15 = vpop.xlane.xlu1 %2316 }
 0xd1b   :  { %v2311_v62 = vpop.xlane.xlu1 %2310 }
 0xd1c   :  { %6868 = vrcp.f32 %v2311_v62 }
 0xd1d   :  { %6870 = vrcp.f32 %v2317_v15  ;;  %v2467_v15 = vld [vmem:[#allocation8 + $0x25] ss:$0 sm:$0xff] }
 0xd1e   :  { %6872 = vrcp.f32 %v2314_v58 }
 0xd1f   :  { %v6268_v16 = vpop.permute.xlu1 %6267 }
 0xd20   :  { %v6270_v17 = vunpack.i.h.bf16 %v6268_v16  ;;  %v6269_v20 = vunpack.i.l.bf16 %v6268_v16 }
 0xd22   :  { %v2339_v10 = vpack.c.bf16 %v6270_v17, %v6269_v20 }
 0xd24   :  { %5999 = vmatprep.subr.bf16.mxu1 %v2339_v10 }
 0xd25   :  { %6000 = vmatpush3.bf16.msra.mxu1 %v2339_v10 }
 0xd26   :  { %6001 = vmatprep.subr.bf16.mxu1 %v7828_v39 }
 0xd29   :  { %v6869_v13 = vpop.eup %6868  ;;  %6002 = vmatpush3.bf16.msra.mxu1 %v7828_v39  ;;  %v6562_v39 = vld [vmem:[#allocation17 + $0x38] sm:$0xff]  }
 0xd2a   :  { %v2331_v34 = vmul.f32 %v6869_v13, %v6857_v53  ;;  %6011 = vmatprep.subr.bf16.mxu1 %v7452_v11  ;;  %v6871_v35 = vpop.eup %6870  ;;  %v6573_v13 = vld [vmem:[#allocation19 + $0xe8] ss:$16 sps:$4 sm:$0xff]  }
 0xd2b   :  { %v6873_v37 = vpop.eup %6872  ;;  %v2333_v36 = vmul.f32 %v6871_v35, %v7877_v51 }
 0xd2c   :  { %6004 = vmatmul.mubr.msk.bf16.vlgmr.msra.gmra.mxu1 %vm2245_vm2, %v2335_v28  ;;  %v2336_v19 = vpack.c.bf16 %v2331_v34, %v2330_v29  ;;  %v2332_v30 = vmul.f32 %v6873_v37, %v7865_v43  ;;  %v6566_v43 = vld [vmem:[#allocation17 + $0x18] sm:$0xff]  }
 0xd2d   :  { %6012 = vmatpush3.bf16.msra.mxu1 %v6562_v39  ;;  %v6575_v28 = vld [vmem:[#allocation19 + $0xec] ss:$16 sps:$4 sm:$0xff]   ;;  %v6579_v39 = vld [vmem:[#allocation19 + $0xc8] ss:$16 sps:$4 sm:$0xff]  }
 0xd2e   :  { %6007 = vmatprep.mubr.msk.bf16.mxu1 %vm2245_vm2, %v2336_v19  ;;  %v2337_v18 = vpack.c.bf16 %v2333_v36, %v2332_v30  ;;  %6013 = vmatprep.subr.bf16.mxu1 %v7452_v11  ;;  %v6576_v30 = vld [vmem:[#allocation19 + $0xc0] ss:$16 sps:$4 sm:$0xff]  }
 0xd31   :  { %6014 = vmatpush3.bf16.msra.mxu1 %v6563_v41  ;;  %v6581_v41 = vld [vmem:[#allocation19 + $0xcc] ss:$16 sps:$4 sm:$0xff]  }
 0xd32   :  { %6015 = vmatprep.subr.bf16.mxu1 %v7452_v11 }
 0xd34   :  { %6008 = vmatmul.mubr.msk.bf16.gmra.mxu1 %vm2245_vm2, %v2337_v18  ;;  %v6578_v18 = vld [vmem:[#allocation19 + $0xc4] ss:$16 sps:$4 sm:$0xff]  }
 0xd35   :  { %6027 = vmatprep.mubr.msk.bf16.mxu1 %vm7453_vm0, %v7452_v11  ;;  %6016 = vmatpush3.bf16.msra.mxu1 %v6564_v44  ;;  %v6582_v44 = vld [vmem:[#allocation19 + $0xa0] ss:$16 sps:$4 sm:$0xff]  }
 0xd36   :  { %6017 = vmatprep.subr.bf16.mxu1 %v7452_v11  ;;  %2805 = vmatprep.subr.bf16.mxu0 %v6578_v18  ;;  %v6632_v18 = vld [vmem:[#allocation20 + $0x20] sm:$0xff]  }
 0xd37   :  { %2806 = vmatpush1.bf16.msra.mxu0 %v6576_v30  ;;  %v6631_v30 = vld [vmem:[#allocation20 + $0xe0] sm:$0xff]  }
 0xd39   :  { %6018 = vmatpush3.bf16.msra.mxu1 %v6565_v26  ;;  %v6584_v26 = vld [vmem:[#allocation19 + $0xa4] ss:$16 sps:$4 sm:$0xff]  }
 0xd3a   :  { %6019 = vmatprep.subr.bf16.mxu1 %v7452_v11  ;;  %2807 = vmatprep.subr.bf16.mxu0 %v6584_v26  ;;  %v6636_v26 = vld [vmem:[#allocation20 + $0x18] sm:$0xff]  }
 0xd3b   :  { %2808 = vmatpush1.bf16.msra.mxu0 %v6582_v44  ;;  %v6635_v44 = vld [vmem:[#allocation20 + $0xd8] sm:$0xff]  }
 0xd3d   :  { %6020 = vmatpush3.bf16.msra.mxu1 %v6566_v43  ;;  %v6585_v43 = vld [vmem:[#allocation19 + $0xa8] ss:$16 sps:$4 sm:$0xff]  }
 0xd3e   :  { %6021 = vmatprep.subr.bf16.mxu1 %v7452_v11 }
 0xd41   :  { %6022 = vmatpush3.bf16.msra.mxu1 %v6567_v45  ;;  %v6587_v45 = vld [vmem:[#allocation19 + $0xac] ss:$16 sps:$4 sm:$0xff]  }
 0xd42   :  { %6023 = vmatprep.subr.bf16.mxu1 %v7452_v11 }
 0xd45   :  { %6024 = vmatpush3.bf16.msra.mxu1 %v6568_v33  ;;  %v6588_v33 = vld [vmem:[#allocation19 + $0x80] ss:$16 sps:$4 sm:$0xff]  }
 0xd46   :  { %6025 = vmatprep.subr.bf16.mxu1 %v7452_v11 }
 0xd49   :  { %6026 = vmatpush3.bf16.msra.mxu1 %v6569_v52  ;;  %v6597_v52 = vld [vmem:[#allocation19 + $0x68] ss:$16 sps:$4 sm:$0xff]  }
 0xd4a   :  { %2846 = vmatprep.subr.bf16.mxu1 %v6575_v28  ;;  %v6622_v28 = vld [vmem:[#allocation20 + $0x70] sm:$0xff]  }
 0xdec   :  { %v6005_v31 = vpop.f32.mrf.mxu1 }
 0xdee   :  { %v2388_v46 = vpop.f32.mrf.mxu1 }
 0xdf0   :  { %v6006_v48 = vpop.f32.mrf.mxu1 }
 0xdf1   :  { %v6271_v49 = vpack.i.bf16 %v6006_v48, %v6005_v31  ;;  %v6590_v31 = vld [vmem:[#allocation19 + $0x84] ss:$16 sps:$4 sm:$0xff]   ;;  %v6591_v48 = vld [vmem:[#allocation19 + $0x88] ss:$16 sps:$4 sm:$0xff]  }
 0xdf2   :  { %v2391_v50 = vpop.f32.mrf.mxu1  ;;  %2809 = vmatprep.subr.bf16.mxu0 %v6590_v31  ;;  %v6639_v31 = vld [vmem:[#allocation20 + $0xd0] sm:$0xff]  }
 0xdf3   :  { %6272 = vrot.lane.b32.xlu1 %v6271_v49, %s8163_s18  ;;  %v6596_v49 = vld [vmem:[#allocation19 + $0x64] ss:$16 sps:$4 sm:$0xff]   ;;  %2810 = vmatpush1.bf16.msra.mxu0 %v6588_v33 }
 0xdf4   :  { %v6009_v51 = vpop.f32.mrf.mxu1  ;;  %2811 = vmatprep.subr.bf16.mxu0 %v6596_v49  ;;  %v6641_v33 = vld [vmem:[#allocation20 + $0x90] sm:$0xff]   ;;  %v6643_v49 = vld [vmem:[#allocation20 + $0xc8] sm:$0xff]  }
 0xdf6   :  { %v2404_v53 = vpop.f32.mrf.mxu1 }
 0xdf8   :  { %v6010_v54 = vpop.f32.mrf.mxu1 }
 0xdf9   :  { %v6281_v55 = vpack.i.bf16 %v6010_v54, %v6009_v51  ;;  %v6594_v51 = vld [vmem:[#allocation19 + $0x60] ss:$16 sps:$4 sm:$0xff]   ;;  %v6605_v54 = vld [vmem:[#allocation19 + $0x4c] ss:$16 sps:$4 sm:$0xff]  }
 0xdfa   :  { %v2407_v56 = vpop.f32.mrf.mxu1  ;;  %2812 = vmatpush1.bf16.msra.mxu0 %v6594_v51  ;;  %v6645_v51 = vld [vmem:[#allocation20 + $0x88] sm:$0xff]  }
 0xdfb   :  { %v6276_v21 = vpack.i.bf16 %v2407_v56, %v2404_v53  ;;  %6282 = vrot.lane.b32.xlu1 %v6281_v55, %s7455_s19  ;;  %v6602_v53 = vld [vmem:[#allocation19 + $0x44] ss:$16 sps:$4 sm:$0xff]   ;;  %v6600_v55 = vld [vmem:[#allocation19 + $0x40] ss:$16 sps:$4 sm:$0xff]   ;;  %v6603_v56 = vld [vmem:[#allocation19 + $0x48] ss:$16 sps:$4 sm:$0xff]  }
 0xdfc   :  { %2813 = vmatprep.subr.bf16.mxu0 %v6602_v53  ;;  %v6647_v53 = vld [vmem:[#allocation20 + $0xc0] sm:$0xff]  }
 0xdfd   :  { %6277 = vrot.lane.b32.xlu0 %v6276_v21, %s7433_s23  ;;  %v6608_v21 = vld [vmem:[#allocation19 + $0x24] ss:$16 sps:$4 sm:$0xff]  }
 0xdfe   :  { %2814 = vmatpush1.bf16.msra.mxu0 %v6600_v55  ;;  %v6649_v55 = vld [vmem:[#allocation20 + $0x80] sm:$0xff]  }
 0xdff   :  { %2815 = vmatprep.subr.bf16.mxu0 %v6608_v21 }
 0xe65   :  { %v6273_v57 = vpop.permute.xlu1 %6272 }
 0xe66   :  { %v6275_v58 = vunpack.i.h.bf16 %v6273_v57  ;;  %v6274_v60 = vunpack.i.l.bf16 %v6273_v57  ;;  %v6611_v57 = vld [vmem:[#allocation19 + $0x2c] ss:$16 sps:$4 sm:$0xff]  }
 0xe68   :  { %v2443_v2 = vsel %vm2155_vm1, %v2388_v46, %v6274_v60  ;;  %v2444_v3 = vsel %vm2155_vm1, %v2391_v50, %v6275_v58  ;;  %v6593_v46 = vld [vmem:[#allocation19 + $0x8c] ss:$16 sps:$4 sm:$0xff]   ;;  %v6606_v58 = vld [vmem:[#allocation19 + $0x20] ss:$16 sps:$4 sm:$0xff]   ;;  %v6609_v60 = vld [vmem:[#allocation19 + $0x28] ss:$16 sps:$4 sm:$0xff]  }
 0xe69   :  { %v6599_v50 = vld [vmem:[#allocation19 + $0x6c] ss:$16 sps:$4 sm:$0xff]   ;;  %2816 = vmatpush1.bf16.msra.mxu0 %v6606_v58 }
 0xe6d   :  { %v6283_v63 = vpop.permute.xlu1 %6282 }
 0xe6e   :  { %v6285_v4 = vunpack.i.h.bf16 %v6283_v63  ;;  %v6284_v5 = vunpack.i.l.bf16 %v6283_v63  ;;  %v6614_v63 = vld [vmem:[#allocation19 + $0x4] ss:$16 sps:$4 sm:$0xff]  }
 0xe6f   :  { %v6278_v61 = vpop.permute.xlu0 %6277  ;;  %2817 = vmatprep.subr.bf16.mxu0 %v6614_v63 }
 0xe70   :  { %v6280_v0 = vunpack.i.h.bf16 %v6278_v61  ;;  %v6279_v1 = vunpack.i.l.bf16 %v6278_v61  ;;  %v6617_v61 = vld [vmem:[#allocation19 + $0xc] ss:$16 sps:$4 sm:$0xff]  }
 0xe72   :  { %v2446_v6 = vsel %vm2245_vm2, %v2444_v3, %v6280_v0  ;;  %v2445_v7 = vsel %vm2245_vm2, %v2443_v2, %v6279_v1  ;;  %v6612_v0 = vld [vmem:[#allocation19] ss:$16 sps:$4 sm:$0xff]   ;;  %v6615_v1 = vld [vmem:[#allocation19 + $0x8] ss:$16 sps:$4 sm:$0xff]  }
 0xe73   :  { %v2449_v8 = vsel %vm2447_vm3, %v2446_v6, %v6285_v4  ;;  %v2448_v59 = vsel %vm2447_vm3, %v2445_v7, %v6284_v5  ;;  %2818 = vmatpush1.bf16.msra.mxu0 %v6612_v0 }
 0xe74   :  { %v2466_v14 = vpack.c.bf16 %v2449_v8, %v2448_v59 }
 0xe76   :  { %6028 = vmatmul.mubr.bf16.vlgmr.msra.gmra.mxu1 %v2466_v14  ;;  %v2559_v14 = vld [vmem:[#allocation8 + $0x26] ss:$0 sm:$0xff] }
 0xe77   :  { %2878 = vmatprep.mubr.bf16.mxu1 %v7454_v12  ;;  %2847 = vmatpush1.bf16.msra.mxu1 %v6573_v13  ;;  %v6621_v13 = vld [vmem:[#allocation20 + $0xb8] sm:$0xff]  }
 0xe78   :  { %2848 = vmatprep.subr.bf16.mxu1 %v6581_v41  ;;  %v6634_v41 = vld [vmem:[#allocation20 + $0x58] sm:$0xff]  }
 0xe7b   :  { %2849 = vmatpush1.bf16.msra.mxu1 %v6579_v39  ;;  %v6633_v39 = vld [vmem:[#allocation20 + $0xa0] sm:$0xff]  }
 0xe7c   :  { %2850 = vmatprep.subr.bf16.mxu1 %v6587_v45  ;;  %v6638_v45 = vld [vmem:[#allocation20 + $0x50] sm:$0xff]  }
 0xe7f   :  { %2851 = vmatpush1.bf16.msra.mxu1 %v6585_v43  ;;  %v6637_v43 = vld [vmem:[#allocation20 + $0x98] sm:$0xff]  }
 0xe80   :  { %2852 = vmatprep.subr.bf16.mxu1 %v6593_v46  ;;  %v6640_v46 = vld [vmem:[#allocation20 + $0x10] sm:$0xff]  }
 0xe83   :  { %2853 = vmatpush1.bf16.msra.mxu1 %v6591_v48  ;;  %v6642_v48 = vld [vmem:[#allocation20 + $0x48] sm:$0xff]  }
 0xe84   :  { %2854 = vmatprep.subr.bf16.mxu1 %v6599_v50  ;;  %v6644_v50 = vld [vmem:[#allocation20 + $0x8] sm:$0xff]  }
 0xe87   :  { %2855 = vmatpush1.bf16.msra.mxu1 %v6597_v52  ;;  %v6646_v52 = vld [vmem:[#allocation20 + $0x40] sm:$0xff]  }
 0xe88   :  { %2856 = vmatprep.subr.bf16.mxu1 %v6605_v54  ;;  %v6648_v54 = vld [vmem:[#allocation20] sm:$0xff]  }
 0xe8b   :  { %2857 = vmatpush1.bf16.msra.mxu1 %v6603_v56  ;;  %v2621_v56 = vld [vmem:[#allocation8 + $0x40] ss:$8 sm:$0xf] }
 0xe8c   :  { %2858 = vmatprep.subr.bf16.mxu1 %v6611_v57  ;;  %v2626_v21 = vrot.slane %v2621_v56, %v7677_v40  ;;  %v2634_v57 = vrot.slane %v2621_v56, %v7721_v32  ;;  %v2630_v63 = vrot.slane %v2621_v56, %v7680_v42 }
 0xe8f   :  { %2859 = vmatpush1.bf16.msra.mxu1 %v6609_v60 }
 0xe90   :  { %2860 = vmatprep.subr.bf16.mxu1 %v6617_v61  ;;  %v2638_v61 = vrot.slane %v2621_v56, %v7726_v47 }
 0xe93   :  { %2861 = vmatpush1.bf16.msra.mxu1 %v6615_v1 }
 0xe94   :  { %5803 = vmatprep.subr.bf16.mxu1 %v6619_v25 }
 0xf36   :  { %v2550_v62 = vpop.f32.mrf.mxu1 }
 0xf37   :  { %v2551_v16 = vadd.f32 %v2550_v62, %v2467_v15 }
 0xf38   :  { %v6029_v17 = vpop.f32.mrf.mxu1 }
 0xf39   :  { %v2557_v20 = vadd.f32 %v2551_v16, %v7815_v24  ;;  %v2560_v17 = vld [vmem:[#allocation8 + $0x27] ss:$0 sm:$0xff] }
 0xf3a   :  { %v2553_v10 = vpop.f32.mrf.mxu1 }
 0xf3b   :  { %v2554_v9 = vadd.f32 %v2553_v10, %v2467_v15  ;;  %2561 = vadd.xlane.f32.xlu0 %v2557_v20 }
 0xf3c   :  { %v6030_v22 = vpop.f32.mrf.mxu1 }
 0xf3d   :  { %v2558_v23 = vadd.f32 %v2554_v9, %v7817_v38 }
 0xf3f   :  { %2563 = vadd.xlane.f32.xlu1 %v2558_v23 }
 0xfc4   :  { %v2562_v29 = vpop.xlane.xlu0 %2561 }
 0xfc5   :  { %v2565_v34 = vmul.f32 0.0078125, %v2562_v29  ;;  %v6623_v29 = vld [vmem:[#allocation20 + $0xf0] sm:$0xff]  }
 0xfc7   :  { %v7917_v35 = vsub.f32 %v2557_v20, %v2565_v34  ;;  %v6624_v34 = vld [vmem:[#allocation20 + $0x30] sm:$0xff]  }
 0xfc8   :  { %v2564_v24 = vpop.xlane.xlu1 %2563 }
 0xfc9   :  { %v2566_v19 = vmul.f32 0.0078125, %v2564_v24  ;;  %v2569_v37 = vmul.f32 %v7917_v35, %v7917_v35  ;;  %v6626_v24 = vld [vmem:[#allocation20 + $0x68] sm:$0xff]  }
 0xfcb   :  { %v7921_v36 = vsub.f32 %v2558_v23, %v2566_v19  ;;  %2571 = vadd.xlane.f32.xlu0 %v2569_v37  ;;  %v6618_v23 = vld [vmem:[#allocation20 + $0x78] sm:$0xff]   ;;  %v6627_v19 = vld [vmem:[#allocation20 + $0xe8] sm:$0xff]  }
 0xfcc   :  { %5781 = vmatprep.subr.bf16.mxu0 %v6618_v23  ;;  %v6628_v37 = vld [vmem:[#allocation20 + $0x28] sm:$0xff]  }
 0xfcd   :  { %v2570_v38 = vmul.f32 %v7921_v36, %v7921_v36 }
 0xfcf   :  { %2573 = vadd.xlane.f32.xlu0 %v2570_v38  ;;  %v6630_v38 = vld [vmem:[#allocation20 + $0x60] sm:$0xff]  }
0x1054   :  { %v2572_v2 = vpop.xlane.xlu0 %2571 }
0x1055   :  { %v2575_v3 = vmul.f32 0.0078125, %v2572_v2 }
0x1057   :  { %v2577_v4 = vadd.f32 1e-12, %v2575_v3 }
0x1058   :  { %v2574_v5 = vpop.xlane.xlu0 %2573 }
0x1059   :  { %6874 = vrsqrt.f32 %v2577_v4  ;;  %v2576_v6 = vmul.f32 0.0078125, %v2574_v5 }
0x105b   :  { %v2578_v7 = vadd.f32 1e-12, %v2576_v6 }
0x105d   :  { %6876 = vrsqrt.f32 %v2578_v7 }
0x1066   :  { %v6875_v8 = vpop.eup %6874 }
0x1067   :  { %v2581_v59 = vmul.f32 %v6875_v8, %v7917_v35  ;;  %v6625_v35 = vld [vmem:[#allocation20 + $0xb0] sm:$0xff]  }
0x1069   :  { %v2583_v16 = vmul.f32 %v2581_v59, %v2559_v14 }
0x106a   :  { %v6877_v15 = vpop.eup %6876 }
0x106b   :  { %v2582_v62 = vmul.f32 %v6877_v15, %v7921_v36  ;;  %v7927_v10 = vadd.f32 %v2583_v16, %v2560_v17  ;;  %v6629_v36 = vld [vmem:[#allocation20 + $0xa8] sm:$0xff]  }
0x106d   :  { %v2584_v20 = vmul.f32 %v2582_v62, %v2559_v14 }
0x106f   :  { %v7929_v9 = vadd.f32 %v2584_v20, %v2560_v17 }
0x1071   :  { %v2619_v22 = vpack.c.bf16 %v7929_v9, %v7927_v10 }
0x1073   :  { %2836 = vmatmul.mubr.bf16.vlgmr.msra.gmra.mxu0 %v2619_v22  ;;  %2879 = vmatmul.mubr.bf16.vlgmr.msra.gmra.mxu1 %v2619_v22 }
0x1074   :  { %5782 = vmatpush3.bf16.msra.mxu0 %v6620_v27  ;;  %5804 = vmatpush3.bf16.msra.mxu1 %v6621_v13 }
0x1075   :  { %5783 = vmatprep.subr.bf16.mxu0 %v6622_v28  ;;  %5805 = vmatprep.subr.bf16.mxu1 %v6623_v29 }
0x1078   :  { %5784 = vmatpush3.bf16.msra.mxu0 %v6624_v34  ;;  %5806 = vmatpush3.bf16.msra.mxu1 %v6625_v35 }
0x1079   :  { %5785 = vmatprep.subr.bf16.mxu0 %v6626_v24  ;;  %5807 = vmatprep.subr.bf16.mxu1 %v6627_v19 }
0x107c   :  { %5786 = vmatpush3.bf16.msra.mxu0 %v6628_v37  ;;  %5808 = vmatpush3.bf16.msra.mxu1 %v6629_v36 }
0x107d   :  { %5787 = vmatprep.subr.bf16.mxu0 %v6630_v38  ;;  %5809 = vmatprep.subr.bf16.mxu1 %v6631_v30 }
0x1080   :  { %5788 = vmatpush3.bf16.msra.mxu0 %v6632_v18  ;;  %5810 = vmatpush3.bf16.msra.mxu1 %v6633_v39 }
0x1081   :  { %5789 = vmatprep.subr.bf16.mxu0 %v6634_v41  ;;  %5811 = vmatprep.subr.bf16.mxu1 %v6635_v44 }
0x1084   :  { %5790 = vmatpush3.bf16.msra.mxu0 %v6636_v26  ;;  %5812 = vmatpush3.bf16.msra.mxu1 %v6637_v43 }
0x1085   :  { %5791 = vmatprep.subr.bf16.mxu0 %v6638_v45  ;;  %5813 = vmatprep.subr.bf16.mxu1 %v6639_v31 }
0x1088   :  { %5792 = vmatpush3.bf16.msra.mxu0 %v6640_v46  ;;  %5814 = vmatpush3.bf16.msra.mxu1 %v6641_v33 }
0x1089   :  { %5793 = vmatprep.subr.bf16.mxu0 %v6642_v48  ;;  %5815 = vmatprep.subr.bf16.mxu1 %v6643_v49 }
0x108c   :  { %5794 = vmatpush3.bf16.msra.mxu0 %v6644_v50  ;;  %5816 = vmatpush3.bf16.msra.mxu1 %v6645_v51 }
0x108d   :  { %5795 = vmatprep.subr.bf16.mxu0 %v6646_v52  ;;  %5817 = vmatprep.subr.bf16.mxu1 %v6647_v53 }
0x1090   :  { %5796 = vmatpush3.bf16.msra.mxu0 %v6648_v54  ;;  %5818 = vmatpush3.bf16.msra.mxu1 %v6649_v55 }
0x1091   :  { %6031 = vmatprep.subr.bf16.mxu1 %v7452_v11 }
0x1133   :  { %v2837_v58 = vpop.f32.mrf.mxu0  ;;  %v2880_v60 = vpop.f32.mrf.mxu1 }
0x1134   :  { %v2838_v0 = vadd.f32 %v2837_v58, %v2626_v21  ;;  %v2881_v1 = vadd.f32 %v2880_v60, %v2634_v57 }
0x1135   :  { %v2839_v2 = vpop.f32.mrf.mxu0  ;;  %v2882_v3 = vpop.f32.mrf.mxu1 }
0x1136   :  { %v2897_v4 = vmul.f32 0.70710677, %v2838_v0  ;;  %v2899_v5 = vmul.f32 0.70710677, %v2881_v1  ;;  %v2840_v6 = vadd.f32 %v2839_v2, %v2630_v63  ;;  %v2883_v7 = vadd.f32 %v2882_v3, %v2638_v61 }
0x1137   :  { %v2841_v8 = vpop.f32.mrf.mxu0  ;;  %v2884_v59 = vpop.f32.mrf.mxu1  ;;  %v2889_v36 = vmul.f32 0.5, %v2838_v0  ;;  %v2891_v53 = vmul.f32 0.5, %v2881_v1 }
0x1138   :  { %v2842_v14 = vadd.f32 %v2841_v8, %v2626_v21  ;;  %v2885_v15 = vadd.f32 %v2884_v59, %v2634_v57  ;;  %6878 = verf.f32 %v2897_v4  ;;  %v2898_v62 = vmul.f32 0.70710677, %v2840_v6  ;;  %v2997_v4 = vld [vmem:[#allocation8 + $0x41] ss:$0 sm:$0xff] }
0x1139   :  { %v2843_v16 = vpop.f32.mrf.mxu0  ;;  %v2886_v17 = vpop.f32.mrf.mxu1  ;;  %6880 = verf.f32 %v2899_v5  ;;  %v2900_v20 = vmul.f32 0.70710677, %v2883_v7  ;;  %v2890_v38 = vmul.f32 0.5, %v2840_v6  ;;  %v2892_v49 = vmul.f32 0.5, %v2883_v7 }
0x113a   :  { %v2901_v22 = vmul.f32 0.70710677, %v2842_v14  ;;  %6882 = verf.f32 %v2898_v62  ;;  %v2903_v23 = vmul.f32 0.70710677, %v2885_v15  ;;  %v2844_v25 = vadd.f32 %v2843_v16, %v2630_v63 }
0x113b   :  { %v2887_v27 = vadd.f32 %v2886_v17, %v2638_v61  ;;  %6884 = verf.f32 %v2900_v20  ;;  %v2893_v26 = vmul.f32 0.5, %v2842_v14  ;;  %v2895_v46 = vmul.f32 0.5, %v2885_v15 }
0x113c   :  { %6886 = verf.f32 %v2901_v22  ;;  %v2902_v13 = vmul.f32 0.70710677, %v2844_v25  ;;  %v2894_v33 = vmul.f32 0.5, %v2844_v25 }
0x113d   :  { %6888 = verf.f32 %v2903_v23  ;;  %v2904_v28 = vmul.f32 0.70710677, %v2887_v27  ;;  %v2896_v51 = vmul.f32 0.5, %v2887_v27 }
0x113e   :  { %6890 = verf.f32 %v2902_v13 }
0x113f   :  { %6892 = verf.f32 %v2904_v28  ;;  %v6650_v28 = vld [vmem:[#allocation22 + $0xa8] ss:$12 sps:$4 sm:$0xff]  }
0x1145   :  { %v6879_v29 = vpop.eup %6878 }
0x1146   :  { %v6881_v34 = vpop.eup %6880  ;;  %v2913_v41 = vadd.f32 1.0, %v6879_v29  ;;  %v6652_v29 = vld [vmem:[#allocation22 + $0xac] ss:$12 sps:$4 sm:$0xff]  }
0x1147   :  { %v6883_v35 = vpop.eup %6882  ;;  %v2915_v31 = vadd.f32 1.0, %v6881_v34  ;;  %v6653_v34 = vld [vmem:[#allocation22 + $0xb0] ss:$12 sps:$4 sm:$0xff]   ;;  %3481 = vmatprep.subr.bf16.mxu0 %v6652_v29 }
0x1148   :  { %v6885_v24 = vpop.eup %6884  ;;  %v2914_v30 = vadd.f32 1.0, %v6883_v35  ;;  %v2921_v21 = vmul.f32 %v2913_v41, %v2889_v36  ;;  %v6658_v41 = vld [vmem:[#allocation22 + $0x78] ss:$12 sps:$4 sm:$0xff]  }
0x1149   :  { %v6887_v19 = vpop.eup %6886  ;;  %v2916_v44 = vadd.f32 1.0, %v6885_v24  ;;  %v2923_v60 = vmul.f32 %v2915_v31, %v2891_v53  ;;  %v6662_v31 = vld [vmem:[#allocation22 + $0x60] ss:$12 sps:$4 sm:$0xff]  }
0x114a   :  { %v6889_v37 = vpop.eup %6888  ;;  %v2917_v18 = vadd.f32 1.0, %v6887_v19  ;;  %v2922_v54 = vmul.f32 %v2914_v30, %v2890_v38  ;;  %v6654_v30 = vld [vmem:[#allocation22 + $0x90] ss:$12 sps:$4 sm:$0xff]   ;;  %v6677_v53 = vld [vmem:[#allocation22 + $0x20] ss:$12 sps:$4 sm:$0xff]  }
0x114b   :  { %v6891_v39 = vpop.eup %6890  ;;  %v2919_v43 = vadd.f32 1.0, %v6889_v37  ;;  %v2924_v57 = vmul.f32 %v2916_v44, %v2892_v49  ;;  %v6660_v44 = vld [vmem:[#allocation22 + $0x7c] ss:$12 sps:$4 sm:$0xff]   ;;  %v6672_v49 = vld [vmem:[#allocation22 + $0x34] ss:$12 sps:$4 sm:$0xff]  }
0x114c   :  { %v6893_v45 = vpop.eup %6892  ;;  %v2918_v48 = vadd.f32 1.0, %v6891_v39  ;;  %v2925_v50 = vmul.f32 %v2917_v18, %v2893_v26  ;;  %v6656_v18 = vld [vmem:[#allocation22 + $0x94] ss:$12 sps:$4 sm:$0xff]   ;;  %v6657_v39 = vld [vmem:[#allocation22 + $0x98] ss:$12 sps:$4 sm:$0xff]  }
0x114d   :  { %v2920_v52 = vadd.f32 1.0, %v6893_v45  ;;  %v2927_v55 = vmul.f32 %v2919_v43, %v2895_v46  ;;  %v6661_v26 = vld [vmem:[#allocation22 + $0x80] ss:$12 sps:$4 sm:$0xff]   ;;  %v6664_v43 = vld [vmem:[#allocation22 + $0x64] ss:$12 sps:$4 sm:$0xff]  }
0x114e   :  { %v2926_v56 = vmul.f32 %v2918_v48, %v2894_v33  ;;  %v2993_v61 = vpack.c.bf16 %v2925_v50, %v2921_v21  ;;  %v6665_v45 = vld [vmem:[#allocation22 + $0x68] ss:$12 sps:$4 sm:$0xff]   ;;  %v6668_v46 = vld [vmem:[#allocation22 + $0x4c] ss:$12 sps:$4 sm:$0xff]   ;;  %v6669_v33 = vld [vmem:[#allocation22 + $0x50] ss:$12 sps:$4 sm:$0xff]  }
0x114f   :  { %v2928_v58 = vmul.f32 %v2920_v52, %v2896_v51  ;;  %v2995_v2 = vpack.c.bf16 %v2927_v55, %v2923_v60  ;;  %v6666_v48 = vld [vmem:[#allocation22 + $0x48] ss:$12 sps:$4 sm:$0xff]   ;;  %v6673_v50 = vld [vmem:[#allocation22 + $0x38] ss:$12 sps:$4 sm:$0xff]   ;;  %v6670_v51 = vld [vmem:[#allocation22 + $0x30] ss:$12 sps:$4 sm:$0xff]  }
0x1150   :  { %v2994_v63 = vpack.c.bf16 %v2926_v56, %v2922_v54  ;;  %v6676_v52 = vld [vmem:[#allocation22 + $0x1c] ss:$12 sps:$4 sm:$0xff]   ;;  %v6674_v54 = vld [vmem:[#allocation22 + $0x18] ss:$12 sps:$4 sm:$0xff]   ;;  %v6678_v21 = vld [vmem:[#allocation22] ss:$12 sps:$4 sm:$0xff]  }
0x1151   :  { %v2996_v0 = vpack.c.bf16 %v2928_v58, %v2924_v57  ;;  %v6680_v55 = vld [vmem:[#allocation22 + $0x4] ss:$12 sps:$4 sm:$0xff]   ;;  %v6681_v56 = vld [vmem:[#allocation22 + $0x8] ss:$12 sps:$4 sm:$0xff]  }
0x1152   :  { %3222 = vmatprep.mubr.bf16.mxu0 %v2994_v63 }
0x1153   :  { %3263 = vmatprep.mubr.bf16.mxu1 %v2996_v0  ;;  %3223 = vmatmul.mubr.bf16.vlgmr.msra.gmra.mxu0 %v2993_v61 }
0x1154   :  { %3264 = vmatmul.mubr.bf16.vlgmr.msra.gmra.mxu1 %v2995_v2  ;;  %3513 = vmatprep.mubr.bf16.mxu0 %v7454_v12 }
0x1155   :  { %6047 = vmatprep.mubr.msk.bf16.mxu1 %vm7453_vm0, %v7452_v11  ;;  %6032 = vmatpush3.bf16.msra.mxu1 %v6653_v34 }
0x1156   :  { %3482 = vmatpush1.bf16.msra.mxu0 %v6650_v28  ;;  %6033 = vmatprep.subr.bf16.mxu1 %v7452_v11 }
0x1157   :  { %3483 = vmatprep.subr.bf16.mxu0 %v6656_v18 }
0x1159   :  { %6034 = vmatpush3.bf16.msra.mxu1 %v6657_v39 }
0x115a   :  { %3484 = vmatpush1.bf16.msra.mxu0 %v6654_v30  ;;  %6035 = vmatprep.subr.bf16.mxu1 %v7452_v11 }
0x115b   :  { %3485 = vmatprep.subr.bf16.mxu0 %v6660_v44 }
0x115d   :  { %6036 = vmatpush3.bf16.msra.mxu1 %v6661_v26 }
0x115e   :  { %3486 = vmatpush1.bf16.msra.mxu0 %v6658_v41  ;;  %6037 = vmatprep.subr.bf16.mxu1 %v7452_v11 }
0x115f   :  { %3487 = vmatprep.subr.bf16.mxu0 %v6664_v43 }
0x1161   :  { %6038 = vmatpush3.bf16.msra.mxu1 %v6665_v45 }
0x1162   :  { %3488 = vmatpush1.bf16.msra.mxu0 %v6662_v31  ;;  %6039 = vmatprep.subr.bf16.mxu1 %v7452_v11 }
0x1163   :  { %3489 = vmatprep.subr.bf16.mxu0 %v6668_v46 }
0x1165   :  { %6040 = vmatpush3.bf16.msra.mxu1 %v6669_v33 }
0x1166   :  { %3490 = vmatpush1.bf16.msra.mxu0 %v6666_v48  ;;  %6041 = vmatprep.subr.bf16.mxu1 %v7452_v11 }
0x1167   :  { %3491 = vmatprep.subr.bf16.mxu0 %v6672_v49 }
0x1169   :  { %6042 = vmatpush3.bf16.msra.mxu1 %v6673_v50 }
0x116a   :  { %3492 = vmatpush1.bf16.msra.mxu0 %v6670_v51  ;;  %6043 = vmatprep.subr.bf16.mxu1 %v7452_v11 }
0x116b   :  { %3493 = vmatprep.subr.bf16.mxu0 %v6676_v52 }
0x116d   :  { %6044 = vmatpush3.bf16.msra.mxu1 %v6677_v53 }
0x116e   :  { %3494 = vmatpush1.bf16.msra.mxu0 %v6674_v54  ;;  %6045 = vmatprep.subr.bf16.mxu1 %v7452_v11 }
0x116f   :  { %3495 = vmatprep.subr.bf16.mxu0 %v6680_v55 }
0x1171   :  { %6046 = vmatpush3.bf16.msra.mxu1 %v6681_v56 }
0x1172   :  { %3496 = vmatpush1.bf16.msra.mxu0 %v6678_v21 }
0x1213   :  { %v5797_v1 = vpop.f32.mrf.mxu0 }
0x1214   :  { %v5819_v3 = vpop.f32.mrf.mxu1 }
0x1215   :  { %v5798_v5 = vpop.f32.mrf.mxu0 }
0x1216   :  { %v5799_v6 = vadd.f32 %v5798_v5, %v5797_v1  ;;  %v5820_v7 = vpop.f32.mrf.mxu1 }
0x1217   :  { %v5800_v8 = vpop.f32.mrf.mxu0  ;;  %v5821_v14 = vadd.f32 %v5820_v7, %v5819_v3  ;;  %v3274_v3 = vld [vmem:[#allocation8 + $0x42] ss:$0 sm:$0xff]  ;;  %v3275_v7 = vld [vmem:[#allocation8 + $0x43] ss:$0 sm:$0xff] }
0x1218   :  { %v3225_v59 = vadd.f32 %v5799_v6, %v2997_v4  ;;  %v5822_v15 = vpop.f32.mrf.mxu1 }
0x1219   :  { %v5801_v62 = vpop.f32.mrf.mxu0 }
0x121a   :  { %v3266_v16 = vadd.f32 %v5821_v14, %v3225_v59  ;;  %v5802_v17 = vadd.f32 %v5801_v62, %v5800_v8  ;;  %v5823_v20 = vpop.f32.mrf.mxu1  ;;  %v3336_v62 = vld [vmem:[#allocation8 + $0x44] ss:$8 sm:$0x7] }
0x121b   :  { %v5824_v23 = vadd.f32 %v5823_v20, %v5822_v15  ;;  %v3341_v20 = vrot.slane %v3336_v62, %v7677_v40 }
0x121c   :  { %v3228_v22 = vadd.f32 %v5802_v17, %v2997_v4  ;;  %v3272_v25 = vadd.f32 %v3266_v16, %v7927_v10 }
0x121e   :  { %v3269_v27 = vadd.f32 %v5824_v23, %v3228_v22  ;;  %3276 = vadd.xlane.f32.xlu0 %v3272_v25  ;;  %v3349_v22 = vrot.slane %v3336_v62, %v7721_v32 }
0x1220   :  { %v3273_v13 = vadd.f32 %v3269_v27, %v7929_v9  ;;  %v3345_v27 = vrot.slane %v3336_v62, %v7680_v42 }
0x1222   :  { %3278 = vadd.xlane.f32.xlu1 %v3273_v13 }
0x12a7   :  { %v3277_v35 = vpop.xlane.xlu0 %3276 }
0x12a8   :  { %v3280_v24 = vmul.f32 0.0078125, %v3277_v35 }
0x12aa   :  { %v7944_v19 = vsub.f32 %v3272_v25, %v3280_v24 }
0x12ab   :  { %v3279_v37 = vpop.xlane.xlu1 %3278 }
0x12ac   :  { %v3281_v36 = vmul.f32 0.0078125, %v3279_v37  ;;  %v3284_v10 = vmul.f32 %v7944_v19, %v7944_v19 }
0x12ae   :  { %v7948_v38 = vsub.f32 %v3273_v13, %v3281_v36  ;;  %3286 = vadd.xlane.f32.xlu0 %v3284_v10 }
0x12b0   :  { %v3285_v9 = vmul.f32 %v7948_v38, %v7948_v38 }
0x12b2   :  { %3288 = vadd.xlane.f32.xlu1 %v3285_v9 }
0x1337   :  { %v3287_v57 = vpop.xlane.xlu0 %3286 }
0x1338   :  { %v3290_v58 = vmul.f32 0.0078125, %v3287_v57 }
0x133a   :  { %v3292_v60 = vadd.f32 1e-12, %v3290_v58 }
0x133b   :  { %v3289_v63 = vpop.xlane.xlu1 %3288 }
0x133c   :  { %6894 = vrsqrt.f32 %v3292_v60  ;;  %v3291_v61 = vmul.f32 0.0078125, %v3289_v63 }
0x133e   :  { %v3293_v0 = vadd.f32 1e-12, %v3291_v61 }
0x1340   :  { %6896 = vrsqrt.f32 %v3293_v0 }
0x1349   :  { %v6895_v2 = vpop.eup %6894 }
0x134a   :  { %v3296_v1 = vmul.f32 %v6895_v2, %v7944_v19 }
0x134c   :  { %v3298_v6 = vmul.f32 %v3296_v1, %v3274_v3 }
0x134d   :  { %v6897_v4 = vpop.eup %6896 }
0x134e   :  { %v3297_v5 = vmul.f32 %v6897_v4, %v7948_v38  ;;  %v7960_v59 = vadd.f32 %v3298_v6, %v3275_v7 }
0x1350   :  { %v3299_v8 = vmul.f32 %v3297_v5, %v3274_v3 }
0x1352   :  { %v7962_v14 = vadd.f32 %v3299_v8, %v3275_v7  ;;  %v6970_v8 = vld [vmem:[#allocation7] sm:$0xff] }
0x1354   :  { %v3334_v15 = vpack.c.bf16 %v7962_v14, %v7960_v59 }
0x1356   :  { %3514 = vmatmul.mubr.bf16.vlgmr.msra.gmra.mxu0 %v3334_v15  ;;  %6048 = vmatmul.mubr.bf16.vlgmr.msra.gmra.mxu1 %v3334_v15 }
0x1416   :  { %v3515_v16 = vpop.f32.mrf.mxu0  ;;  %v3558_v17 = vpop.f32.mrf.mxu1 }
0x1417   :  { %v3516_v29 = vadd.f32 %v3515_v16, %v3341_v20  ;;  %v3559_v24 = vadd.f32 %v3558_v17, %v3349_v22  ;;  %v6971_v16 = vld [vmem:[#allocation7 + $0x10] sm:$0xff] }
0x1418   :  { %v3517_v23 = vpop.f32.mrf.mxu0  ;;  %v6049_v25 = vpop.f32.mrf.mxu1 }
0x1419   :  { %v3518_v36 = vadd.f32 %v3517_v23, %v3345_v27  ;;  %v6972_v23 = vld [vmem:[#allocation7 + $0x8] sm:$0xff] }
0x141a   :  { %v3519_v13 = vpop.f32.mrf.mxu0  ;;  %v3561_v28 = vpop.f32.mrf.mxu1 }
0x141b   :  { %v3520_v34 = vadd.f32 %v3519_v13, %v3341_v20  ;;  %v3562_v35 = vadd.f32 %v3561_v28, %v3349_v22  ;;  %v6973_v13 = vld [vmem:[#allocation7 + $0x18] sm:$0xff] }
0x141c   :  { %v3521_v19 = vpop.f32.mrf.mxu0  ;;  %v6050_v37 = vpop.f32.mrf.mxu1 }
0x141d   :  { %v3522_v10 = vadd.f32 %v3521_v19, %v3345_v27  ;;  %v3625_v38 = vpack.c.bf16 %v3520_v34, %v3516_v29  ;;  %v7969_v9 = vpack.i.bf16 %v3562_v35, %v3559_v24  ;;  %v7972_v39 = vpack.c.bf16 %v3562_v35, %v3559_v24  ;;  %v6974_v19 = vld [vmem:[#allocation7 + $0x20] sm:$0xff] }
0x141e   :  { %v6306_v41 = vpack.i.bf16 %v3520_v34, %v3516_v29 }
0x141f   :  { %6059 = vmatprep.mubr.msk.bf16.mxu0 %vm2155_vm1, %v3625_v38  ;;  %v6291_v30 = vpack.i.bf16 %v3522_v10, %v3518_v36  ;;  %v3629_v18 = vpack.c.bf16 %v3522_v10, %v3518_v36  ;;  %v6975_v38 = vld [vmem:[#allocation7 + $0x28] sm:$0xff] }
0x1421   :  { %6292 = vrot.lane.b32.xlu1 %v6291_v30, %s7433_s23  ;;  %6287 = vrot.lane.b32.xlu0 %v6291_v30, %s8163_s18  ;;  %v3646_v57 = vsel %vm2155_vm1, %v3629_v18, 0 }
0x1425   :  { %6297 = vrot.lane.b32.xlu1 %v6291_v30, %s7455_s19  ;;  %6307 = vrot.lane.b32.xlu0 %v6306_v41, %s7433_s23 }
0x1429   :  { %6302 = vrot.lane.b32.xlu1 %v6306_v41, %s7455_s19 }
0x142d   :  { %6312 = vrot.lane.b32.xlu1 %v6306_v41, %s8163_s18 }
0x1493   :  { %v6293_v44 = vpop.permute.xlu1 %6292  ;;  %v6288_v26 = vpop.permute.xlu0 %6287 }
0x1494   :  { %v6290_v43 = vunpack.i.h.bf16 %v6288_v26  ;;  %v6289_v45 = vunpack.i.l.bf16 %v6288_v26  ;;  %v6295_v31 = vunpack.i.h.bf16 %v6293_v44  ;;  %v6294_v46 = vunpack.i.l.bf16 %v6293_v44  ;;  %v6977_v44 = vld [vmem:[#allocation7 + $0x38] sm:$0xff] }
0x1496   :  { %v3632_v33 = vpack.c.bf16 %v6290_v43, %v6289_v45  ;;  %v3631_v48 = vpack.c.bf16 %v6295_v31, %v6294_v46 }
0x1497   :  { %v6298_v50 = vpop.permute.xlu1 %6297  ;;  %v6308_v21 = vpop.permute.xlu0 %6307 }
0x1498   :  { %6187 = vmatprep.subr.msk.bf16.mxu0 %vm2155_vm1, %v3632_v33  ;;  %v3655_v49 = vsel %vm2155_vm1, %v3632_v33, 0  ;;  %v6300_v51 = vunpack.i.h.bf16 %v6298_v50  ;;  %v6299_v52 = vunpack.i.l.bf16 %v6298_v50  ;;  %v3652_v54 = vsel %vm2155_vm1, %v3631_v48, 0 }
0x1499   :  { %6052 = vmatpush3.bf16.xpose.msra.mxu0 %v3655_v49  ;;  %v6310_v63 = vunpack.i.h.bf16 %v6308_v21  ;;  %v6309_v61 = vunpack.i.l.bf16 %v6308_v21 }
0x149a   :  { %6188 = vmatprep.subr.msk.bf16.mxu0 %vm2155_vm1, %v3631_v48  ;;  %v3630_v53 = vpack.c.bf16 %v6300_v51, %v6299_v52 }
0x149b   :  { %v6303_v56 = vpop.permute.xlu1 %6302  ;;  %v3627_v2 = vpack.c.bf16 %v6310_v63, %v6309_v61 }
0x149c   :  { %v3649_v55 = vsel %vm2155_vm1, %v3630_v53, 0  ;;  %v6305_v58 = vunpack.i.h.bf16 %v6303_v56  ;;  %v6304_v60 = vunpack.i.l.bf16 %v6303_v56 }
0x149e   :  { %v3626_v0 = vpack.c.bf16 %v6305_v58, %v6304_v60 }
0x149f   :  { %v6313_v1 = vpop.permute.xlu1 %6312 }
0x14a0   :  { %v6315_v3 = vunpack.i.h.bf16 %v6313_v1  ;;  %v6314_v4 = vunpack.i.l.bf16 %v6313_v1 }
0x14a1   :  { %6054 = vmatpush3.bf16.xpose.msra.mxu0 %v3652_v54 }
0x14a2   :  { %6189 = vmatprep.subr.msk.bf16.mxu0 %vm2155_vm1, %v3630_v53  ;;  %v3628_v5 = vpack.c.bf16 %v6315_v3, %v6314_v4 }
0x14a9   :  { %6056 = vmatpush3.bf16.xpose.msra.mxu0 %v3649_v55 }
0x14aa   :  { %6190 = vmatprep.subr.msk.bf16.mxu0 %vm2155_vm1, %v3629_v18  ;;  %v6976_v18 = vld [vmem:[#allocation7 + $0x30] sm:$0xff] }
0x14b1   :  { %6058 = vmatpush3.bf16.xpose.msra.mxu0 %v3646_v57 }
0x14b2   :  { %6083 = vmatprep.subr.bf16.mxu0 %v7452_v11 }
0x14b8   :  { %6060 = vmatmul.mubr.msk.bf16.vlgmr.msra.gmra.mxu0 %vm2155_vm1, %v3626_v0 }
0x14b9   :  { %6063 = vmatprep.mubr.msk.bf16.mxu0 %vm2155_vm1, %v3627_v2 }
0x14c0   :  { %6064 = vmatmul.mubr.msk.bf16.gmra.mxu0 %vm2155_vm1, %v3628_v5 }
0x14c1   :  { %6099 = vmatprep.mubr.msk.bf16.mxu0 %vm7453_vm0, %v7452_v11 }
0x1578   :  { %v6061_v6 = vpop.f32.mrf.mxu0 }
0x1579   :  { %v3700_v17 = vadd.f32 %v6971_v16, %v6061_v6 }
0x157a   :  { %v3691_v7 = vpop.f32.mrf.mxu0 }
0x157b   :  { %v3692_v15 = vadd.f32 %v6970_v8, %v3691_v7  ;;  %v3728_v34 = vsel %vm2245_vm2, %v3700_v17, -inf }
0x157c   :  { %v6062_v62 = vpop.f32.mrf.mxu0 }
0x157d   :  { %v3722_v20 = vsel %vm2245_vm2, %v3692_v15, -inf  ;;  %v3703_v28 = vadd.f32 %v6973_v13, %v6062_v62 }
0x157e   :  { %v3694_v22 = vpop.f32.mrf.mxu0  ;;  %3723 = vmax.xlane.f32.xlu0 %v3722_v20 }
0x157f   :  { %v3695_v25 = vadd.f32 %v6972_v23, %v3694_v22  ;;  %v3731_v36 = vsel %vm2245_vm2, %v3703_v28, -inf }
0x1580   :  { %v6065_v27 = vpop.f32.mrf.mxu0 }
0x1581   :  { %v3725_v29 = vsel %vm2245_vm2, %v3695_v25, -inf  ;;  %v3716_v41 = vadd.f32 %v6976_v18, %v6065_v27 }
0x1582   :  { %v3707_v35 = vpop.f32.mrf.mxu0  ;;  %3726 = vmax.xlane.f32.xlu1 %v3725_v29  ;;  %3729 = vmax.xlane.f32.xlu0 %v3728_v34 }
0x1583   :  { %v3708_v37 = vadd.f32 %v6974_v19, %v3707_v35  ;;  %v3740_v46 = vsel %vm2245_vm2, %v3716_v41, -inf }
0x1584   :  { %v6066_v24 = vpop.f32.mrf.mxu0 }
0x1585   :  { %v3719_v26 = vadd.f32 %v6977_v44, %v6066_v24  ;;  %v3734_v45 = vsel %vm2245_vm2, %v3708_v37, -inf }
0x1586   :  { %v3710_v10 = vpop.f32.mrf.mxu0  ;;  %3732 = vmax.xlane.f32.xlu0 %v3731_v36 }
0x1587   :  { %v3711_v30 = vadd.f32 %v6975_v38, %v3710_v10  ;;  %v3743_v31 = vsel %vm2245_vm2, %v3719_v26, -inf }
0x1589   :  { %v3737_v43 = vsel %vm2245_vm2, %v3711_v30, -inf }
0x158a   :  { %3738 = vmax.xlane.f32.xlu1 %v3737_v43  ;;  %3735 = vmax.xlane.f32.xlu0 %v3734_v45 }
0x158e   :  { %3744 = vmax.xlane.f32.xlu1 %v3743_v31  ;;  %3741 = vmax.xlane.f32.xlu0 %v3740_v46 }
0x1607   :  { %v3724_v33 = vpop.xlane.xlu0 %3723 }
0x1608   :  { %v3746_v48 = vsub.f32 %v3692_v15, %v3724_v33 }
0x160a   :  { %v3754_v54 = vmul.f32 1.442695, %v3746_v48 }
0x160b   :  { %v3727_v49 = vpop.xlane.xlu1 %3726  ;;  %v3730_v50 = vpop.xlane.xlu0 %3729 }
0x160c   :  { %v3748_v51 = vsub.f32 %v3700_v17, %v3730_v50  ;;  %v3747_v52 = vsub.f32 %v3695_v25, %v3727_v49 }
0x160e   :  { %v3758_v53 = vmul.f32 1.442695, %v3748_v51  ;;  %v3756_v21 = vmul.f32 1.442695, %v3747_v52 }
0x160f   :  { %v3733_v55 = vpop.xlane.xlu0 %3732 }
0x1610   :  { %v3749_v56 = vsub.f32 %v3703_v28, %v3733_v55  ;;  %6898 = vpow2.f32 %v3758_v53 }
0x1611   :  { %6900 = vpow2.f32 %v3754_v54 }
0x1612   :  { %v3760_v57 = vmul.f32 1.442695, %v3749_v56 }
0x1613   :  { %v3736_v58 = vpop.xlane.xlu0 %3735  ;;  %v3739_v22 = vpop.xlane.xlu1 %3738 }
0x1614   :  { %6902 = vpow2.f32 %v3760_v57  ;;  %v3750_v60 = vsub.f32 %v3708_v37, %v3736_v58  ;;  %v3751_v27 = vsub.f32 %v3711_v30, %v3739_v22 }
0x1615   :  { %6904 = vpow2.f32 %v3756_v21 }
0x1616   :  { %v3762_v2 = vmul.f32 1.442695, %v3750_v60  ;;  %v3764_v28 = vmul.f32 1.442695, %v3751_v27 }
0x1617   :  { %v3742_v63 = vpop.xlane.xlu0 %3741  ;;  %v3745_v23 = vpop.xlane.xlu1 %3744 }
0x1618   :  { %v3752_v61 = vsub.f32 %v3716_v41, %v3742_v63  ;;  %v3753_v25 = vsub.f32 %v3719_v26, %v3745_v23 }
0x161a   :  { %v3766_v0 = vmul.f32 1.442695, %v3752_v61  ;;  %v3768_v13 = vmul.f32 1.442695, %v3753_v25  ;;  %v6688_v25 = vld [vmem:[#allocation23 + $0x8] sm:$0xff]  }
0x161c   :  { %6906 = vpow2.f32 %v3766_v0 }
0x161d   :  { %v8002_v1 = vpop.eup %6898  ;;  %6908 = vpow2.f32 %v3762_v2 }
0x161e   :  { %v3776_v3 = vsel %vm2245_vm2, %v8002_v1, 0.0  ;;  %v6901_v4 = vpop.eup %6900  ;;  %6910 = vpow2.f32 %v3768_v13 }
0x161f   :  { %3777 = vadd.xlane.f32.xlu0 %v3776_v3  ;;  %v3770_v8 = vsel %vm2245_vm2, %v6901_v4, 0.0  ;;  %6912 = vpow2.f32 %v3764_v28 }
0x1621   :  { %v8006_v5 = vpop.eup %6902 }
0x1622   :  { %v3779_v6 = vsel %vm2245_vm2, %v8006_v5, 0.0  ;;  %v6905_v7 = vpop.eup %6904 }
0x1623   :  { %3780 = vadd.xlane.f32.xlu1 %v3779_v6  ;;  %3771 = vadd.xlane.f32.xlu0 %v3770_v8  ;;  %v3773_v15 = vsel %vm2245_vm2, %v6905_v7, 0.0 }
0x1627   :  { %3774 = vadd.xlane.f32.xlu1 %v3773_v15 }
0x1629   :  { %v8012_v62 = vpop.eup %6906 }
0x162a   :  { %v3788_v16 = vsel %vm2245_vm2, %v8012_v62, 0.0  ;;  %v8016_v17 = vpop.eup %6908 }
0x162b   :  { %3789 = vadd.xlane.f32.xlu0 %v3788_v16  ;;  %v3782_v20 = vsel %vm2245_vm2, %v8016_v17, 0.0  ;;  %v8024_v29 = vpop.eup %6910  ;;  %v6684_v16 = vld [vmem:[#allocation23 + $0x28] sm:$0xff]  }
0x162c   :  { %v3791_v34 = vsel %vm2245_vm2, %v8024_v29, 0.0  ;;  %v6913_v35 = vpop.eup %6912 }
0x162d   :  { %v3785_v24 = vsel %vm2245_vm2, %v6913_v35, 0.0 }
0x162f   :  { %3783 = vadd.xlane.f32.xlu0 %v3782_v20  ;;  %v6687_v20 = vld [vmem:[#allocation23 + $0x10] sm:$0xff]  }
0x1638   :  { %6322 = vrot.lane.b32.xlu1 %v7969_v9, %s7433_s23 }
0x1645   :  { %6317 = vrot.lane.b32.xlu0 %v7969_v9, %s8163_s18 }
0x165c   :  { %3792 = vadd.xlane.f32.xlu1 %v3791_v34  ;;  %v6689_v34 = vld [vmem:[#allocation23] sm:$0xff]  }
0x1660   :  { %3786 = vadd.xlane.f32.xlu1 %v3785_v24 }
0x1671   :  { %6327 = vrot.lane.b32.xlu1 %v7969_v9, %s7455_s19 }
0x16a8   :  { %v3778_v19 = vpop.xlane.xlu0 %3777 }
0x16ac   :  { %v3781_v37 = vpop.xlane.xlu1 %3780  ;;  %v3772_v36 = vpop.xlane.xlu0 %3771 }
0x16ad   :  { %6914 = vrcp.f32 %v3772_v36 }
0x16b0   :  { %v3775_v10 = vpop.xlane.xlu1 %3774 }
0x16b1   :  { %6916 = vrcp.f32 %v3775_v10 }
0x16b2   :  { %6918 = vrcp.f32 %v3781_v37 }
0x16b3   :  { %6920 = vrcp.f32 %v3778_v19 }
0x16b4   :  { %v3790_v38 = vpop.xlane.xlu0 %3789  ;;  %v6323_v18 = vpop.permute.xlu1 %6322 }
0x16b5   :  { %v6325_v43 = vunpack.i.h.bf16 %v6323_v18  ;;  %v6324_v45 = vunpack.i.l.bf16 %v6323_v18 }
0x16b7   :  { %v3816_v50 = vpack.c.bf16 %v6325_v43, %v6324_v45 }
0x16b8   :  { %v3784_v30 = vpop.xlane.xlu0 %3783 }
0x16b9   :  { %6922 = vrcp.f32 %v3784_v30 }
0x16ba   :  { %v6915_v41 = vpop.eup %6914 }
0x16bb   :  { %v3802_v33 = vmul.f32 %v6915_v41, %v6901_v4 }
0x16bc   :  { %v6318_v44 = vpop.permute.xlu0 %6317 }
0x16bd   :  { %v6320_v31 = vunpack.i.h.bf16 %v6318_v44  ;;  %v6319_v46 = vunpack.i.l.bf16 %v6318_v44 }
0x16be   :  { %v6917_v26 = vpop.eup %6916 }
0x16bf   :  { %v3803_v48 = vmul.f32 %v6917_v26, %v6905_v7  ;;  %v3817_v49 = vpack.c.bf16 %v6320_v31, %v6319_v46  ;;  %v6919_v21 = vpop.eup %6918 }
0x16c0   :  { %v6921_v57 = vpop.eup %6920  ;;  %v3805_v58 = vmul.f32 %v6919_v21, %v8006_v5 }
0x16c1   :  { %v3810_v9 = vpack.c.bf16 %v3803_v48, %v3802_v33  ;;  %6067 = vmatprep.subr.bf16.mxu1 %v3817_v49  ;;  %v3804_v63 = vmul.f32 %v6921_v57, %v8002_v1  ;;  %v6683_v1 = vld [vmem:[#allocation23 + $0x30] sm:$0xff]  }
0x16c2   :  { %6068 = vmatpush3.bf16.msra.mxu1 %v3817_v49 }
0x16c3   :  { %6075 = vmatprep.mubr.msk.bf16.mxu1 %vm2245_vm2, %v3810_v9  ;;  %6069 = vmatprep.subr.bf16.mxu1 %v3816_v50  ;;  %v3811_v0 = vpack.c.bf16 %v3805_v58, %v3804_v63  ;;  %v6692_v63 = vld [vmem:[#allocation25 + $0xe4] ss:$16 sps:$4 sm:$0xff]  }
0x16c6   :  { %6070 = vmatpush3.bf16.msra.mxu1 %v3816_v50  ;;  %v6923_v60 = vpop.eup %6922 }
0x16c7   :  { %v3806_v2 = vmul.f32 %v6923_v60, %v8016_v17  ;;  %v6685_v17 = vld [vmem:[#allocation23 + $0x20] sm:$0xff]  }
0x16c8   :  { %v6690_v60 = vld [vmem:[#allocation25 + $0xe0] ss:$16 sps:$4 sm:$0xff]  }
0x16e5   :  { %v3793_v51 = vpop.xlane.xlu1 %3792 }
0x16e9   :  { %v3787_v52 = vpop.xlane.xlu1 %3786 }
0x16ea   :  { %6924 = vrcp.f32 %v3787_v52 }
0x16eb   :  { %6926 = vrcp.f32 %v3793_v51  ;;  %v3942_v51 = vld [vmem:[#allocation8 + $0x45] ss:$0 sm:$0xff] }
0x16ec   :  { %6928 = vrcp.f32 %v3790_v38 }
0x16ed   :  { %v6328_v53 = vpop.permute.xlu1 %6327 }
0x16ee   :  { %v6330_v54 = vunpack.i.h.bf16 %v6328_v53  ;;  %v6329_v55 = vunpack.i.l.bf16 %v6328_v53 }
0x16f0   :  { %v3815_v56 = vpack.c.bf16 %v6330_v54, %v6329_v55 }
0x16f2   :  { %6071 = vmatprep.subr.bf16.mxu1 %v3815_v56 }
0x16f3   :  { %6072 = vmatpush3.bf16.msra.mxu1 %v3815_v56 }
0x16f4   :  { %6073 = vmatprep.subr.bf16.mxu1 %v7972_v39 }
0x16f7   :  { %v6925_v61 = vpop.eup %6924  ;;  %6074 = vmatpush3.bf16.msra.mxu1 %v7972_v39  ;;  %v6682_v39 = vld [vmem:[#allocation23 + $0x38] sm:$0xff]  }
0x16f8   :  { %v3807_v3 = vmul.f32 %v6925_v61, %v6913_v35  ;;  %v6927_v4 = vpop.eup %6926  ;;  %6084 = vmatpush3.bf16.msra.mxu0 %v6682_v39  ;;  %v6693_v61 = vld [vmem:[#allocation25 + $0xe8] ss:$16 sps:$4 sm:$0xff]   ;;  %4278 = vmatprep.subr.bf16.mxu1 %v6692_v63 }
0x16f9   :  { %v6929_v7 = vpop.eup %6928  ;;  %v3809_v8 = vmul.f32 %v6927_v4, %v8024_v29  ;;  %6085 = vmatprep.subr.bf16.mxu0 %v7452_v11  ;;  %v6699_v39 = vld [vmem:[#allocation25 + $0xc8] ss:$16 sps:$4 sm:$0xff]  }
0x16fa   :  { %6076 = vmatmul.mubr.msk.bf16.vlgmr.msra.gmra.mxu1 %vm2245_vm2, %v3811_v0  ;;  %v3812_v6 = vpack.c.bf16 %v3807_v3, %v3806_v2  ;;  %v3808_v5 = vmul.f32 %v6929_v7, %v8012_v62  ;;  %v6686_v62 = vld [vmem:[#allocation23 + $0x18] sm:$0xff]  }
0x16fb   :  { %v6695_v0 = vld [vmem:[#allocation25 + $0xec] ss:$16 sps:$4 sm:$0xff]   ;;  %4279 = vmatpush1.bf16.msra.mxu1 %v6690_v60 }
0x16fc   :  { %6079 = vmatprep.mubr.msk.bf16.mxu1 %vm2245_vm2, %v3812_v6  ;;  %v3813_v15 = vpack.c.bf16 %v3809_v8, %v3808_v5  ;;  %6086 = vmatpush3.bf16.msra.mxu0 %v6683_v1  ;;  %v6698_v8 = vld [vmem:[#allocation25 + $0xc4] ss:$16 sps:$4 sm:$0xff]   ;;  %v6701_v5 = vld [vmem:[#allocation25 + $0xcc] ss:$16 sps:$4 sm:$0xff]  }
0x16fd   :  { %6087 = vmatprep.subr.bf16.mxu0 %v7452_v11  ;;  %4280 = vmatprep.subr.bf16.mxu1 %v6698_v8  ;;  %v6704_v1 = vld [vmem:[#allocation25 + $0xa4] ss:$16 sps:$4 sm:$0xff]   ;;  %v6740_v60 = vld [vmem:[#allocation26 + $0x38] sm:$0xff]  }
0x16fe   :  { %v6741_v63 = vld [vmem:[#allocation26 + $0xb8] sm:$0xff]   ;;  %v6752_v8 = vld [vmem:[#allocation26 + $0x20] sm:$0xff]  }
0x1700   :  { %6088 = vmatpush3.bf16.msra.mxu0 %v6684_v16  ;;  %v6707_v16 = vld [vmem:[#allocation25 + $0xac] ss:$16 sps:$4 sm:$0xff]  }
0x1701   :  { %6089 = vmatprep.subr.bf16.mxu0 %v7452_v11 }
0x1702   :  { %6080 = vmatmul.mubr.msk.bf16.gmra.mxu1 %vm2245_vm2, %v3813_v15  ;;  %v6696_v15 = vld [vmem:[#allocation25 + $0xc0] ss:$16 sps:$4 sm:$0xff]  }
0x1703   :  { %4310 = vmatprep.mubr.bf16.mxu1 %v7454_v12  ;;  %4281 = vmatpush1.bf16.msra.mxu1 %v6696_v15  ;;  %v6754_v15 = vld [vmem:[#allocation26 + $0x58] sm:$0xff]  }
0x1704   :  { %6090 = vmatpush3.bf16.msra.mxu0 %v6685_v17  ;;  %v6702_v17 = vld [vmem:[#allocation25 + $0xa0] ss:$16 sps:$4 sm:$0xff]   ;;  %4282 = vmatprep.subr.bf16.mxu1 %v6704_v1  ;;  %v6756_v1 = vld [vmem:[#allocation26 + $0x18] sm:$0xff]  }
0x1705   :  { %6091 = vmatprep.subr.bf16.mxu0 %v7452_v11 }
0x1707   :  { %4283 = vmatpush1.bf16.msra.mxu1 %v6702_v17  ;;  %v6758_v17 = vld [vmem:[#allocation26 + $0x50] sm:$0xff]  }
0x1708   :  { %6092 = vmatpush3.bf16.msra.mxu0 %v6686_v62  ;;  %v6705_v62 = vld [vmem:[#allocation25 + $0xa8] ss:$16 sps:$4 sm:$0xff]  }
0x1709   :  { %6093 = vmatprep.subr.bf16.mxu0 %v7452_v11 }
0x170c   :  { %6094 = vmatpush3.bf16.msra.mxu0 %v6687_v20  ;;  %v6710_v20 = vld [vmem:[#allocation25 + $0x84] ss:$16 sps:$4 sm:$0xff]  }
0x170d   :  { %6095 = vmatprep.subr.bf16.mxu0 %v7452_v11  ;;  %4284 = vmatprep.subr.bf16.mxu1 %v6710_v20  ;;  %v6760_v20 = vld [vmem:[#allocation26 + $0x10] sm:$0xff]  }
0x1710   :  { %6096 = vmatpush3.bf16.msra.mxu0 %v6688_v25  ;;  %v6711_v25 = vld [vmem:[#allocation25 + $0x88] ss:$16 sps:$4 sm:$0xff]  }
0x1711   :  { %6097 = vmatprep.subr.bf16.mxu0 %v7452_v11 }
0x1714   :  { %6098 = vmatpush3.bf16.msra.mxu0 %v6689_v34  ;;  %v6722_v34 = vld [vmem:[#allocation25 + $0x44] ss:$16 sps:$4 sm:$0xff]  }
0x1715   :  { %4321 = vmatprep.subr.bf16.mxu0 %v6695_v0  ;;  %v6743_v0 = vld [vmem:[#allocation26 + $0xf0] sm:$0xff]  }
0x17ba   :  { %v6077_v22 = vpop.f32.mrf.mxu1 }
0x17bc   :  { %v3864_v23 = vpop.f32.mrf.mxu1 }
0x17be   :  { %v6078_v27 = vpop.f32.mrf.mxu1 }
0x17bf   :  { %v6331_v13 = vpack.i.bf16 %v6078_v27, %v6077_v22  ;;  %v6713_v22 = vld [vmem:[#allocation25 + $0x8c] ss:$16 sps:$4 sm:$0xff]   ;;  %v6716_v27 = vld [vmem:[#allocation25 + $0x64] ss:$16 sps:$4 sm:$0xff]  }
0x17c0   :  { %v3867_v28 = vpop.f32.mrf.mxu1 }
0x17c1   :  { %6332 = vrot.lane.b32.xlu1 %v6331_v13, %s8163_s18  ;;  %v6719_v13 = vld [vmem:[#allocation25 + $0x6c] ss:$16 sps:$4 sm:$0xff]  }
0x17c2   :  { %v6081_v29 = vpop.f32.mrf.mxu1 }
0x17c4   :  { %v3880_v35 = vpop.f32.mrf.mxu1 }
0x17c6   :  { %v6082_v24 = vpop.f32.mrf.mxu1 }
0x17c7   :  { %v6341_v19 = vpack.i.bf16 %v6082_v24, %v6081_v29  ;;  %v6717_v29 = vld [vmem:[#allocation25 + $0x68] ss:$16 sps:$4 sm:$0xff]   ;;  %v6720_v24 = vld [vmem:[#allocation25 + $0x40] ss:$16 sps:$4 sm:$0xff]  }
0x17c8   :  { %v3883_v37 = vpop.f32.mrf.mxu1 }
0x17c9   :  { %v6336_v36 = vpack.i.bf16 %v3883_v37, %v3880_v35  ;;  %6342 = vrot.lane.b32.xlu1 %v6341_v19, %s7455_s19  ;;  %v6725_v35 = vld [vmem:[#allocation25 + $0x4c] ss:$16 sps:$4 sm:$0xff]   ;;  %v6723_v19 = vld [vmem:[#allocation25 + $0x48] ss:$16 sps:$4 sm:$0xff]   ;;  %v6726_v37 = vld [vmem:[#allocation25 + $0x20] ss:$16 sps:$4 sm:$0xff]  }
0x17cb   :  { %6337 = vrot.lane.b32.xlu0 %v6336_v36, %s7433_s23  ;;  %v6728_v36 = vld [vmem:[#allocation25 + $0x24] ss:$16 sps:$4 sm:$0xff]   ;;  %s7456_s23 = smov [#allocation34]  }
0x17cc   :  { %s5296_s22 = sshll.u32 %s7456_s23, 4  ;;  %s5297_s22 = int_to_ptr.vmem [resolvable:$true] %s5296_s22 }
0x17cd   :  { %s7378_s5 = scalar_lea.vmem %s5297_s22, 256  ;;  %p7383_p3 = scmp.lt.s32.totalorder %s5297_s22, %s5297_s22 }
0x17ce   :  { %p7379_p2 = scmp.ne.s32.totalorder %s5297_s22, %s7378_s5  ;;  %p7384_p4 = scmp.lt.s32.totalorder %s7378_s5, %s7378_s5 }
0x17d0   :  { %p7385_p5 = por %p7384_p4, %p7383_p3 }
0x17d2   :  { %p7386_p6 = pnand %p7385_p5, %p7379_p2 }
0x1833   :  { %v6333_v10 = vpop.permute.xlu1 %6332 }
0x1834   :  { %v6335_v38 = vunpack.i.h.bf16 %v6333_v10  ;;  %v6334_v30 = vunpack.i.l.bf16 %v6333_v10  ;;  %v6729_v10 = vld [vmem:[#allocation25 + $0x28] ss:$16 sps:$4 sm:$0xff]  }
0x1836   :  { %v3919_v43 = vsel %vm2155_vm1, %v3864_v23, %v6334_v30  ;;  %v3920_v45 = vsel %vm2155_vm1, %v3867_v28, %v6335_v38  ;;  %v6708_v23 = vld [vmem:[#allocation25 + $0x80] ss:$16 sps:$4 sm:$0xff]   ;;  %v6731_v38 = vld [vmem:[#allocation25 + $0x2c] ss:$16 sps:$4 sm:$0xff]   ;;  %v6734_v30 = vld [vmem:[#allocation25 + $0x4] ss:$16 sps:$4 sm:$0xff]  }
0x1837   :  { %4285 = vmatpush1.bf16.msra.mxu1 %v6708_v23  ;;  %v6714_v28 = vld [vmem:[#allocation25 + $0x60] ss:$16 sps:$4 sm:$0xff]   ;;  %v6762_v23 = vld [vmem:[#allocation26 + $0x48] sm:$0xff]  }
0x1838   :  { %4286 = vmatprep.subr.bf16.mxu1 %v6716_v27  ;;  %v6764_v27 = vld [vmem:[#allocation26 + $0x8] sm:$0xff]  }
0x183b   :  { %v6343_v18 = vpop.permute.xlu1 %6342  ;;  %4287 = vmatpush1.bf16.msra.mxu1 %v6714_v28  ;;  %v6766_v28 = vld [vmem:[#allocation26 + $0x40] sm:$0xff]  }
0x183c   :  { %v6345_v31 = vunpack.i.h.bf16 %v6343_v18  ;;  %v6344_v46 = vunpack.i.l.bf16 %v6343_v18  ;;  %4288 = vmatprep.subr.bf16.mxu1 %v6722_v34  ;;  %v6737_v18 = vld [vmem:[#allocation25 + $0xc] ss:$16 sps:$4 sm:$0xff]   ;;  %v6768_v34 = vld [vmem:[#allocation26] sm:$0xff]  }
0x183d   :  { %v6338_v41 = vpop.permute.xlu0 %6337 }
0x183e   :  { %v6340_v44 = vunpack.i.h.bf16 %v6338_v41  ;;  %v6339_v26 = vunpack.i.l.bf16 %v6338_v41  ;;  %v6732_v41 = vld [vmem:[#allocation25] ss:$16 sps:$4 sm:$0xff]  }
0x183f   :  { %4289 = vmatpush1.bf16.msra.mxu1 %v6720_v24  ;;  %v4096_v24 = vld [vmem:[#allocation8 + $0x60] ss:$8 sm:$0xf] }
0x1840   :  { %v3922_v33 = vsel %vm2245_vm2, %v3920_v45, %v6340_v44  ;;  %v3921_v48 = vsel %vm2245_vm2, %v3919_v43, %v6339_v26  ;;  %4290 = vmatprep.subr.bf16.mxu1 %v6728_v36  ;;  %v6735_v44 = vld [vmem:[#allocation25 + $0x8] ss:$16 sps:$4 sm:$0xff]  }
0x1841   :  { %v3924_v49 = vsel %vm2447_vm3, %v3922_v33, %v6345_v31  ;;  %v3923_v9 = vsel %vm2447_vm3, %v3921_v48, %v6344_v46 }
0x1842   :  { %v3941_v50 = vpack.c.bf16 %v3924_v49, %v3923_v9  ;;  %v4034_v9 = vld [vmem:[#allocation8 + $0x46] ss:$0 sm:$0xff] }
0x1843   :  { %4291 = vmatpush1.bf16.msra.mxu1 %v6726_v37  ;;  %v4109_v37 = vrot.slane %v4096_v24, %v7721_v32 }
0x1844   :  { %6100 = vmatmul.mubr.bf16.vlgmr.msra.gmra.mxu0 %v3941_v50  ;;  %4292 = vmatprep.subr.bf16.mxu1 %v6734_v30  ;;  %v4113_v30 = vrot.slane %v4096_v24, %v7726_v47 }
0x1845   :  { %4353 = vmatprep.mubr.bf16.mxu0 %v7454_v12  ;;  %4322 = vmatpush1.bf16.msra.mxu0 %v6693_v61  ;;  %v6742_v61 = vld [vmem:[#allocation26 + $0x70] sm:$0xff]  }
0x1846   :  { %4323 = vmatprep.subr.bf16.mxu0 %v6701_v5  ;;  %v6753_v5 = vld [vmem:[#allocation26 + $0xa0] sm:$0xff]  }
0x1847   :  { %4293 = vmatpush1.bf16.msra.mxu1 %v6732_v41 }
0x1849   :  { %4324 = vmatpush1.bf16.msra.mxu0 %v6699_v39  ;;  %v6755_v39 = vld [vmem:[#allocation26 + $0xd8] sm:$0xff]  }
0x184a   :  { %4325 = vmatprep.subr.bf16.mxu0 %v6707_v16  ;;  %v6757_v16 = vld [vmem:[#allocation26 + $0x98] sm:$0xff]  }
0x184d   :  { %4326 = vmatpush1.bf16.msra.mxu0 %v6705_v62  ;;  %v6759_v62 = vld [vmem:[#allocation26 + $0xd0] sm:$0xff]  }
0x184e   :  { %4327 = vmatprep.subr.bf16.mxu0 %v6713_v22  ;;  %v6761_v22 = vld [vmem:[#allocation26 + $0x90] sm:$0xff]  }
0x1851   :  { %4328 = vmatpush1.bf16.msra.mxu0 %v6711_v25  ;;  %v6763_v25 = vld [vmem:[#allocation26 + $0xc8] sm:$0xff]  }
0x1852   :  { %4329 = vmatprep.subr.bf16.mxu0 %v6719_v13  ;;  %v6765_v13 = vld [vmem:[#allocation26 + $0x88] sm:$0xff]  }
0x1855   :  { %4330 = vmatpush1.bf16.msra.mxu0 %v6717_v29  ;;  %v6767_v29 = vld [vmem:[#allocation26 + $0xc0] sm:$0xff]  }
0x1856   :  { %4331 = vmatprep.subr.bf16.mxu0 %v6725_v35  ;;  %v6769_v35 = vld [vmem:[#allocation26 + $0x80] sm:$0xff]  }
0x1859   :  { %4332 = vmatpush1.bf16.msra.mxu0 %v6723_v19  ;;  %v4101_v19 = vrot.slane %v4096_v24, %v7677_v40 }
0x185a   :  { %4333 = vmatprep.subr.bf16.mxu0 %v6731_v38  ;;  %v4105_v38 = vrot.slane %v4096_v24, %v7680_v42 }
0x185d   :  { %4334 = vmatpush1.bf16.msra.mxu0 %v6729_v10 }
0x185e   :  { %4335 = vmatprep.subr.bf16.mxu0 %v6737_v18 }
0x1861   :  { %4336 = vmatpush1.bf16.msra.mxu0 %v6735_v44 }
0x1904   :  { %v4025_v52 = vpop.f32.mrf.mxu0 }
0x1905   :  { %v4026_v53 = vadd.f32 %v4025_v52, %v3942_v51 }
0x1906   :  { %v6101_v54 = vpop.f32.mrf.mxu0 }
0x1907   :  { %v4032_v55 = vadd.f32 %v4026_v53, %v7960_v59  ;;  %v4035_v53 = vld [vmem:[#allocation8 + $0x47] ss:$0 sm:$0xff] }
0x1908   :  { %v4028_v56 = vpop.f32.mrf.mxu0 }
0x1909   :  { %v4029_v21 = vadd.f32 %v4028_v56, %v3942_v51  ;;  %4036 = vadd.xlane.f32.xlu0 %v4032_v55 }
0x190a   :  { %v6102_v57 = vpop.f32.mrf.mxu0 }
0x190b   :  { %v4033_v58 = vadd.f32 %v4029_v21, %v7962_v14  ;;  %v6738_v57 = vld [vmem:[#allocation26 + $0x78] sm:$0xff]  }
0x190c   :  { %5859 = vmatprep.subr.bf16.mxu1 %v6738_v57 }
0x190d   :  { %4038 = vadd.xlane.f32.xlu1 %v4033_v58 }
0x1992   :  { %v4037_v12 = vpop.xlane.xlu0 %4036 }
0x1993   :  { %v4040_v2 = vmul.f32 0.0078125, %v4037_v12  ;;  %v6744_v12 = vld [vmem:[#allocation26 + $0x30] sm:$0xff]  }
0x1995   :  { %v8062_v3 = vsub.f32 %v4032_v55, %v4040_v2  ;;  %v6745_v2 = vld [vmem:[#allocation26 + $0xb0] sm:$0xff]  }
0x1996   :  { %v4039_v59 = vpop.xlane.xlu1 %4038 }
0x1997   :  { %v4041_v4 = vmul.f32 0.0078125, %v4039_v59  ;;  %v4044_v6 = vmul.f32 %v8062_v3, %v8062_v3  ;;  %v6747_v59 = vld [vmem:[#allocation26 + $0xe8] sm:$0xff]  }
0x1999   :  { %v8066_v7 = vsub.f32 %v4033_v58, %v4041_v4  ;;  %4046 = vadd.xlane.f32.xlu0 %v4044_v6  ;;  %v6739_v58 = vld [vmem:[#allocation26 + $0xf8] sm:$0xff]   ;;  %v6748_v4 = vld [vmem:[#allocation26 + $0x28] sm:$0xff]  }
0x199a   :  { %5881 = vmatprep.subr.bf16.mxu0 %v6739_v58  ;;  %v6749_v6 = vld [vmem:[#allocation26 + $0xa8] sm:$0xff]  }
0x199b   :  { %v4045_v14 = vmul.f32 %v8066_v7, %v8066_v7 }
0x199d   :  { %4048 = vadd.xlane.f32.xlu0 %v4045_v14  ;;  %v6751_v14 = vld [vmem:[#allocation26 + $0xe0] sm:$0xff]  }
0x1a22   :  { %v4047_v26 = vpop.xlane.xlu0 %4046 }
0x1a23   :  { %v4050_v43 = vmul.f32 0.0078125, %v4047_v26 }
0x1a25   :  { %v4052_v45 = vadd.f32 1e-12, %v4050_v43 }
0x1a26   :  { %v4049_v31 = vpop.xlane.xlu0 %4048 }
0x1a27   :  { %6930 = vrsqrt.f32 %v4052_v45  ;;  %v4051_v46 = vmul.f32 0.0078125, %v4049_v31 }
0x1a29   :  { %v4053_v33 = vadd.f32 1e-12, %v4051_v46 }
0x1a2b   :  { %6932 = vrsqrt.f32 %v4053_v33 }
0x1a34   :  { %v6931_v48 = vpop.eup %6930 }
0x1a35   :  { %v4056_v49 = vmul.f32 %v6931_v48, %v8062_v3  ;;  %v6746_v3 = vld [vmem:[#allocation26 + $0x68] sm:$0xff]  }
0x1a37   :  { %v4058_v52 = vmul.f32 %v4056_v49, %v4034_v9 }
0x1a38   :  { %v6933_v50 = vpop.eup %6932 }
0x1a39   :  { %v4057_v51 = vmul.f32 %v6933_v50, %v8066_v7  ;;  %v8072_v55 = vadd.f32 %v4058_v52, %v4035_v53  ;;  %v6750_v7 = vld [vmem:[#allocation26 + $0x60] sm:$0xff]  }
0x1a3b   :  { %v4059_v54 = vmul.f32 %v4057_v51, %v4034_v9 }
0x1a3d   :  { %v8074_v56 = vadd.f32 %v4059_v54, %v4035_v53 }
0x1a3f   :  { %v4094_v21 = vpack.c.bf16 %v8074_v56, %v8072_v55 }
0x1a41   :  { %4311 = vmatmul.mubr.bf16.vlgmr.msra.gmra.mxu1 %v4094_v21  ;;  %4354 = vmatmul.mubr.bf16.vlgmr.msra.gmra.mxu0 %v4094_v21 }
0x1a42   :  { %5860 = vmatpush3.bf16.msra.mxu1 %v6740_v60  ;;  %5882 = vmatpush3.bf16.msra.mxu0 %v6741_v63 }
0x1a43   :  { %5861 = vmatprep.subr.bf16.mxu1 %v6742_v61  ;;  %5883 = vmatprep.subr.bf16.mxu0 %v6743_v0 }
0x1a46   :  { %5862 = vmatpush3.bf16.msra.mxu1 %v6744_v12  ;;  %5884 = vmatpush3.bf16.msra.mxu0 %v6745_v2 }
0x1a47   :  { %5863 = vmatprep.subr.bf16.mxu1 %v6746_v3  ;;  %5885 = vmatprep.subr.bf16.mxu0 %v6747_v59 }
0x1a4a   :  { %5864 = vmatpush3.bf16.msra.mxu1 %v6748_v4  ;;  %5886 = vmatpush3.bf16.msra.mxu0 %v6749_v6 }
0x1a4b   :  { %5865 = vmatprep.subr.bf16.mxu1 %v6750_v7  ;;  %5887 = vmatprep.subr.bf16.mxu0 %v6751_v14 }
0x1a4e   :  { %5866 = vmatpush3.bf16.msra.mxu1 %v6752_v8  ;;  %5888 = vmatpush3.bf16.msra.mxu0 %v6753_v5 }
0x1a4f   :  { %5867 = vmatprep.subr.bf16.mxu1 %v6754_v15  ;;  %5889 = vmatprep.subr.bf16.mxu0 %v6755_v39 }
0x1a52   :  { %5868 = vmatpush3.bf16.msra.mxu1 %v6756_v1  ;;  %5890 = vmatpush3.bf16.msra.mxu0 %v6757_v16 }
0x1a53   :  { %5869 = vmatprep.subr.bf16.mxu1 %v6758_v17  ;;  %5891 = vmatprep.subr.bf16.mxu0 %v6759_v62 }
0x1a56   :  { %5870 = vmatpush3.bf16.msra.mxu1 %v6760_v20  ;;  %5892 = vmatpush3.bf16.msra.mxu0 %v6761_v22 }
0x1a57   :  { %5871 = vmatprep.subr.bf16.mxu1 %v6762_v23  ;;  %5893 = vmatprep.subr.bf16.mxu0 %v6763_v25 }
0x1a5a   :  { %5872 = vmatpush3.bf16.msra.mxu1 %v6764_v27  ;;  %5894 = vmatpush3.bf16.msra.mxu0 %v6765_v13 }
0x1a5b   :  { %5873 = vmatprep.subr.bf16.mxu1 %v6766_v28  ;;  %5895 = vmatprep.subr.bf16.mxu0 %v6767_v29 }
0x1a5e   :  { %5874 = vmatpush3.bf16.msra.mxu1 %v6768_v34  ;;  %5896 = vmatpush3.bf16.msra.mxu0 %v6769_v35 }
0x1a5f   :  { %6103 = vmatprep.subr.bf16.mxu1 %v7452_v11  ;;  %6123 = vmatprep.subr.bf16.mxu0 %v7452_v11 }
0x1b01   :  { %v4312_v36 = vpop.f32.mrf.mxu1  ;;  %v4355_v10 = vpop.f32.mrf.mxu0 }
0x1b02   :  { %v4313_v18 = vadd.f32 %v4312_v36, %v4101_v19  ;;  %v4356_v41 = vadd.f32 %v4355_v10, %v4109_v37 }
0x1b03   :  { %v4314_v44 = vpop.f32.mrf.mxu1  ;;  %v4357_v26 = vpop.f32.mrf.mxu0 }
0x1b04   :  { %v4372_v43 = vmul.f32 0.70710677, %v4313_v18  ;;  %v4374_v45 = vmul.f32 0.70710677, %v4356_v41  ;;  %v4315_v31 = vadd.f32 %v4314_v44, %v4105_v38  ;;  %v4358_v46 = vadd.f32 %v4357_v26, %v4113_v30 }
0x1b05   :  { %v4316_v33 = vpop.f32.mrf.mxu1  ;;  %v4359_v48 = vpop.f32.mrf.mxu0  ;;  %v4364_v12 = vmul.f32 0.5, %v4313_v18  ;;  %v4366_v23 = vmul.f32 0.5, %v4356_v41 }
0x1b06   :  { %v4317_v49 = vadd.f32 %v4316_v33, %v4101_v19  ;;  %v4360_v40 = vadd.f32 %v4359_v48, %v4109_v37  ;;  %6934 = verf.f32 %v4372_v43  ;;  %v4373_v32 = vmul.f32 0.70710677, %v4315_v31 }
0x1b07   :  { %v4318_v9 = vpop.f32.mrf.mxu1  ;;  %v4361_v50 = vpop.f32.mrf.mxu0  ;;  %6936 = verf.f32 %v4374_v45  ;;  %v4375_v42 = vmul.f32 0.70710677, %v4358_v46  ;;  %v4365_v2 = vmul.f32 0.5, %v4315_v31  ;;  %v4367_v17 = vmul.f32 0.5, %v4358_v46 }
0x1b08   :  { %v4376_v51 = vmul.f32 0.70710677, %v4317_v49  ;;  %6938 = verf.f32 %v4373_v32  ;;  %v4378_v47 = vmul.f32 0.70710677, %v4360_v40  ;;  %v4319_v52 = vadd.f32 %v4318_v9, %v4105_v38 }
0x1b09   :  { %v4362_v53 = vadd.f32 %v4361_v50, %v4113_v30  ;;  %6940 = verf.f32 %v4375_v42  ;;  %v4368_v14 = vmul.f32 0.5, %v4317_v49  ;;  %v4370_v39 = vmul.f32 0.5, %v4360_v40  ;;  %v4472_v30 = vld [vmem:[#allocation8 + $0x61] ss:$0 sm:$0xff] }
0x1b0a   :  { %6942 = verf.f32 %v4376_v51  ;;  %v4377_v54 = vmul.f32 0.70710677, %v4319_v52  ;;  %v4369_v1 = vmul.f32 0.5, %v4319_v52  ;;  %v6770_v51 = vld [vmem:[#allocation28 + $0x38] sm:$0xff]  }
0x1b0b   :  { %6944 = verf.f32 %v4378_v47  ;;  %v4379_v21 = vmul.f32 0.70710677, %v4362_v53  ;;  %v4371_v20 = vmul.f32 0.5, %v4362_v53 }
0x1b0c   :  { %6946 = verf.f32 %v4377_v54 }
0x1b0d   :  { %6948 = verf.f32 %v4379_v21 }
0x1b13   :  { %v6935_v57 = vpop.eup %6934 }
0x1b14   :  { %v6937_v58 = vpop.eup %6936  ;;  %v4388_v6 = vadd.f32 1.0, %v6935_v57 }
0x1b15   :  { %v6939_v60 = vpop.eup %6938  ;;  %v4390_v15 = vadd.f32 1.0, %v6937_v58 }
0x1b16   :  { %v6941_v63 = vpop.eup %6940  ;;  %v4389_v3 = vadd.f32 1.0, %v6939_v60  ;;  %v4396_v28 = vmul.f32 %v4388_v6, %v4364_v12  ;;  %v6776_v12 = vld [vmem:[#allocation28 + $0x8] sm:$0xff]   ;;  %v6781_v6 = vld [vmem:[#allocation29 + $0x20] sm:$0xff]  }
0x1b17   :  { %v6943_v61 = vpop.eup %6942  ;;  %v4391_v7 = vadd.f32 1.0, %v6941_v63  ;;  %v4398_v35 = vmul.f32 %v4390_v15, %v4366_v23  ;;  %v6773_v63 = vld [vmem:[#allocation28 + $0x20] sm:$0xff]  }
0x1b18   :  { %v6945_v0 = vpop.eup %6944  ;;  %v4392_v59 = vadd.f32 1.0, %v6943_v61  ;;  %v4397_v25 = vmul.f32 %v4389_v3, %v4365_v2  ;;  %v6774_v61 = vld [vmem:[#allocation28 + $0x18] sm:$0xff]   ;;  %v6777_v2 = vld [vmem:[#allocation28] sm:$0xff]  }
0x1b19   :  { %v6947_v4 = vpop.eup %6946  ;;  %v4394_v8 = vadd.f32 1.0, %v6945_v0  ;;  %v4399_v29 = vmul.f32 %v4391_v7, %v4367_v17  ;;  %v6775_v0 = vld [vmem:[#allocation28 + $0x10] sm:$0xff]   ;;  %v6778_v3 = vld [vmem:[#allocation29 + $0x38] sm:$0xff]  }
0x1b1a   :  { %v6949_v5 = vpop.eup %6948  ;;  %v4393_v16 = vadd.f32 1.0, %v6947_v4  ;;  %v4400_v62 = vmul.f32 %v4392_v59, %v4368_v14  ;;  %v6779_v59 = vld [vmem:[#allocation29 + $0x30] sm:$0xff]   ;;  %v6780_v4 = vld [vmem:[#allocation29 + $0x28] sm:$0xff]   ;;  %v6782_v7 = vld [vmem:[#allocation29 + $0x18] sm:$0xff]  }
0x1b1b   :  { %v4395_v22 = vadd.f32 1.0, %v6949_v5  ;;  %v4402_v27 = vmul.f32 %v4394_v8, %v4370_v39  ;;  %v6783_v14 = vld [vmem:[#allocation29 + $0x10] sm:$0xff]  }
0x1b1c   :  { %v4401_v13 = vmul.f32 %v4393_v16, %v4369_v1  ;;  %v4468_v19 = vpack.c.bf16 %v4400_v62, %v4396_v28 }
0x1b1d   :  { %v4403_v34 = vmul.f32 %v4395_v22, %v4371_v20  ;;  %v4470_v36 = vpack.c.bf16 %v4402_v27, %v4398_v35  ;;  %v4749_v20 = vld [vmem:[#allocation8 + $0x62] ss:$0 sm:$0xff]  ;;  %v4750_v27 = vld [vmem:[#allocation8 + $0x63] ss:$0 sm:$0xff]  ;;  %v6784_v35 = vld [vmem:[#allocation29 + $0x8] sm:$0xff]  }
0x1b1e   :  { %v4469_v24 = vpack.c.bf16 %v4401_v13, %v4397_v25 }
0x1b1f   :  { %v4471_v37 = vpack.c.bf16 %v4403_v34, %v4399_v29 }
0x1b20   :  { %4697 = vmatprep.mubr.bf16.mxu1 %v4469_v24  ;;  %v6785_v24 = vld [vmem:[#allocation29] sm:$0xff]  }
0x1b21   :  { %4738 = vmatprep.mubr.bf16.mxu0 %v4471_v37  ;;  %4698 = vmatmul.mubr.bf16.vlgmr.msra.gmra.mxu1 %v4468_v19  ;;  %v4794_v37 = vld [vmem:[#allocation8 + $0x64] ss:$0 sm:$0xff] }
0x1b22   :  { %4739 = vmatmul.mubr.bf16.vlgmr.msra.gmra.mxu0 %v4470_v36  ;;  %6119 = vmatprep.mubr.msk.bf16.mxu1 %vm7453_vm0, %v7452_v11 }
0x1b23   :  { %6139 = vmatprep.mubr.msk.bf16.mxu0 %vm7453_vm0, %v7452_v11  ;;  %6104 = vmatpush3.bf16.msra.mxu1 %v6770_v51  ;;  %v6791_v51 = vld [vmem:[#allocation31 + $0x10] sm:$0xff]  }
0x1b24   :  { %6105 = vmatprep.subr.bf16.mxu1 %v7452_v11  ;;  %6124 = vmatpush3.bf16.msra.mxu0 %v6778_v3 }
0x1b25   :  { %6125 = vmatprep.subr.bf16.mxu0 %v7452_v11 }
0x1b28   :  { %6126 = vmatpush3.bf16.msra.mxu0 %v6779_v59 }
0x1b29   :  { %6127 = vmatprep.subr.bf16.mxu0 %v7452_v11 }
0x1b2c   :  { %6128 = vmatpush3.bf16.msra.mxu0 %v6780_v4 }
0x1b2d   :  { %6129 = vmatprep.subr.bf16.mxu0 %v7452_v11 }
0x1b30   :  { %6130 = vmatpush3.bf16.msra.mxu0 %v6781_v6  ;;  %v4991_v6 = vld [vmem:[#allocation8 + $0x66] ss:$0 sm:$0xff] }
0x1b31   :  { %6131 = vmatprep.subr.bf16.mxu0 %v7452_v11 }
0x1b34   :  { %6132 = vmatpush3.bf16.msra.mxu0 %v6782_v7 }
0x1b35   :  { %6133 = vmatprep.subr.bf16.mxu0 %v7452_v11 }
0x1b38   :  { %6134 = vmatpush3.bf16.msra.mxu0 %v6783_v14  ;;  %v4992_v14 = vld [vmem:[#allocation8 + $0x67] ss:$0 sm:$0xff] }
0x1b39   :  { %6135 = vmatprep.subr.bf16.mxu0 %v7452_v11 }
0x1b3c   :  { %6136 = vmatpush3.bf16.msra.mxu0 %v6784_v35 }
0x1b3d   :  { %6137 = vmatprep.subr.bf16.mxu0 %v7452_v11 }
0x1b40   :  { %6138 = vmatpush3.bf16.msra.mxu0 %v6785_v24  ;;  %v5050_v24 = vld [vmem:[#allocation8 + $0x80] ss:$0 sm:$0xff] }
0x1b41   :  { %6163 = vmatprep.subr.bf16.mxu0 %v7452_v11 }
0x1be1   :  { %v5875_v10 = vpop.f32.mrf.mxu1 }
0x1be2   :  { %v5897_v38 = vpop.f32.mrf.mxu0 }
0x1be3   :  { %v5876_v18 = vpop.f32.mrf.mxu1 }
0x1be4   :  { %v5877_v41 = vadd.f32 %v5876_v18, %v5875_v10  ;;  %v5898_v44 = vpop.f32.mrf.mxu0 }
0x1be5   :  { %v5878_v26 = vpop.f32.mrf.mxu1  ;;  %v5899_v45 = vadd.f32 %v5898_v44, %v5897_v38  ;;  %v4901_v44 = vld [vmem:[#allocation8 + $0x65] ss:$0 sm:$0xff] }
0x1be6   :  { %v4700_v43 = vadd.f32 %v5877_v41, %v4472_v30  ;;  %v5900_v31 = vpop.f32.mrf.mxu0 }
0x1be7   :  { %v5879_v46 = vpop.f32.mrf.mxu1 }
0x1be8   :  { %v4741_v33 = vadd.f32 %v5899_v45, %v4700_v43  ;;  %v5880_v48 = vadd.f32 %v5879_v46, %v5878_v26  ;;  %v5901_v49 = vpop.f32.mrf.mxu0 }
0x1be9   :  { %v5902_v32 = vadd.f32 %v5901_v49, %v5900_v31 }
0x1bea   :  { %v4703_v40 = vadd.f32 %v5880_v48, %v4472_v30  ;;  %v4747_v9 = vadd.f32 %v4741_v33, %v8072_v55  ;;  %v6771_v55 = vld [vmem:[#allocation28 + $0x30] sm:$0xff]  }
0x1beb   :  { %6106 = vmatpush3.bf16.msra.mxu1 %v6771_v55 }
0x1bec   :  { %v4744_v50 = vadd.f32 %v5902_v32, %v4703_v40  ;;  %4751 = vadd.xlane.f32.xlu0 %v4747_v9  ;;  %6107 = vmatprep.subr.bf16.mxu1 %v7452_v11  ;;  %v6786_v40 = vld [vmem:[#allocation31 + $0x38] sm:$0xff]   ;;  %v6787_v32 = vld [vmem:[#allocation31 + $0x30] sm:$0xff]  }
0x1bee   :  { %v4748_v42 = vadd.f32 %v4744_v50, %v8074_v56  ;;  %v6772_v56 = vld [vmem:[#allocation28 + $0x28] sm:$0xff]   ;;  %v6789_v50 = vld [vmem:[#allocation31 + $0x20] sm:$0xff]  }
0x1bef   :  { %6108 = vmatpush3.bf16.msra.mxu1 %v6772_v56 }
0x1bf0   :  { %4753 = vadd.xlane.f32.xlu1 %v4748_v42  ;;  %6109 = vmatprep.subr.bf16.mxu1 %v7452_v11 }
0x1bf3   :  { %6110 = vmatpush3.bf16.msra.mxu1 %v6773_v63 }
0x1bf4   :  { %6111 = vmatprep.subr.bf16.mxu1 %v7452_v11 }
0x1bf7   :  { %6112 = vmatpush3.bf16.msra.mxu1 %v6774_v61 }
0x1bf8   :  { %6113 = vmatprep.subr.bf16.mxu1 %v7452_v11 }
0x1bfb   :  { %6114 = vmatpush3.bf16.msra.mxu1 %v6775_v0 }
0x1bfc   :  { %6115 = vmatprep.subr.bf16.mxu1 %v7452_v11 }
0x1bff   :  { %6116 = vmatpush3.bf16.msra.mxu1 %v6776_v12 }
0x1c00   :  { %6117 = vmatprep.subr.bf16.mxu1 %v7452_v11 }
0x1c03   :  { %6118 = vmatpush3.bf16.msra.mxu1 %v6777_v2 }
0x1c04   :  { %6143 = vmatprep.subr.bf16.mxu1 %v7452_v11 }
0x1c75   :  { %v4752_v47 = vpop.xlane.xlu0 %4751 }
0x1c76   :  { %v4755_v52 = vmul.f32 0.0078125, %v4752_v47  ;;  %v6792_v47 = vld [vmem:[#allocation31 + $0x8] sm:$0xff]  }
0x1c78   :  { %v4757_v53 = vsub.f32 %v4747_v9, %v4755_v52  ;;  %v6788_v9 = vld [vmem:[#allocation31 + $0x28] sm:$0xff]   ;;  %v6793_v52 = vld [vmem:[#allocation31] sm:$0xff]  }
0x1c79   :  { %v4754_v54 = vpop.xlane.xlu1 %4753 }
0x1c7a   :  { %v4756_v21 = vmul.f32 0.0078125, %v4754_v54  ;;  %v4759_v57 = vmul.f32 %v4757_v53, %v4757_v53 }
0x1c7c   :  { %v4758_v58 = vsub.f32 %v4748_v42, %v4756_v21  ;;  %4761 = vadd.xlane.f32.xlu0 %v4759_v57  ;;  %v6790_v42 = vld [vmem:[#allocation31 + $0x18] sm:$0xff]  }
0x1c7e   :  { %v4760_v60 = vmul.f32 %v4758_v58, %v4758_v58 }
0x1c80   :  { %4763 = vadd.xlane.f32.xlu1 %v4760_v60 }
0x1d05   :  { %v4762_v8 = vpop.xlane.xlu0 %4761 }
0x1d06   :  { %v4765_v5 = vmul.f32 0.0078125, %v4762_v8 }
0x1d08   :  { %v4767_v15 = vadd.f32 1e-12, %v4765_v5 }
0x1d09   :  { %v4764_v39 = vpop.xlane.xlu1 %4763 }
0x1d0a   :  { %6950 = vrsqrt.f32 %v4767_v15  ;;  %v4766_v1 = vmul.f32 0.0078125, %v4764_v39 }
0x1d0c   :  { %v4768_v16 = vadd.f32 1e-12, %v4766_v1 }
0x1d0e   :  { %6952 = vrsqrt.f32 %v4768_v16 }
0x1d17   :  { %v6951_v17 = vpop.eup %6950 }
0x1d18   :  { %v4771_v62 = vmul.f32 %v6951_v17, %v4757_v53 }
0x1d1a   :  { %v4773_v25 = vmul.f32 %v4771_v62, %v4749_v20 }
0x1d1b   :  { %v6953_v22 = vpop.eup %6952 }
0x1d1c   :  { %v4772_v23 = vmul.f32 %v6953_v22, %v4758_v58  ;;  %v4775_v28 = vadd.f32 %v4773_v25, %v4750_v27 }
0x1d1e   :  { %v4774_v13 = vmul.f32 %v4772_v23, %v4749_v20 }
0x1d20   :  { %v4776_v29 = vadd.f32 %v4774_v13, %v4750_v27 }
0x1d22   :  { %v4793_v34 = vpack.c.bf16 %v4776_v29, %v4775_v28 }
0x1d24   :  { %6120 = vmatmul.mubr.bf16.vlgmr.msra.gmra.mxu1 %v4793_v34 }
0x1d25   :  { %6159 = vmatprep.mubr.msk.bf16.mxu1 %vm7453_vm0, %v7452_v11  ;;  %6144 = vmatpush3.bf16.msra.mxu1 %v6786_v40 }
0x1d26   :  { %6145 = vmatprep.subr.bf16.mxu1 %v7452_v11 }
0x1d29   :  { %6146 = vmatpush3.bf16.msra.mxu1 %v6787_v32 }
0x1d2a   :  { %6147 = vmatprep.subr.bf16.mxu1 %v7452_v11 }
0x1d2d   :  { %6148 = vmatpush3.bf16.msra.mxu1 %v6788_v9 }
0x1d2e   :  { %6149 = vmatprep.subr.bf16.mxu1 %v7452_v11 }
0x1d31   :  { %6150 = vmatpush3.bf16.msra.mxu1 %v6789_v50 }
0x1d32   :  { %6151 = vmatprep.subr.bf16.mxu1 %v7452_v11 }
0x1d35   :  { %6152 = vmatpush3.bf16.msra.mxu1 %v6790_v42 }
0x1d36   :  { %6153 = vmatprep.subr.bf16.mxu1 %v7452_v11 }
0x1d39   :  { %6154 = vmatpush3.bf16.msra.mxu1 %v6791_v51 }
0x1d3a   :  { %6155 = vmatprep.subr.bf16.mxu1 %v7452_v11 }
0x1d3d   :  { %6156 = vmatpush3.bf16.msra.mxu1 %v6792_v47 }
0x1d3e   :  { %6157 = vmatprep.subr.bf16.mxu1 %v7452_v11 }
0x1d41   :  { %6158 = vmatpush3.bf16.msra.mxu1 %v6793_v52 }
0x1de4   :  { %v4877_v19 = vpop.f32.mrf.mxu1 }
0x1de5   :  { %v4878_v38 = vadd.f32 %v4877_v19, %v4794_v37 }
0x1de6   :  { %v6121_v36 = vpop.f32.mrf.mxu1 }
0x1de8   :  { %v4880_v10 = vpop.f32.mrf.mxu1 }
0x1de9   :  { %v4881_v30 = vadd.f32 %v4880_v10, %v4794_v37 }
0x1dea   :  { %v6122_v18 = vpop.f32.mrf.mxu1 }
0x1deb   :  { %v4900_v41 = vpack.c.bf16 %v4881_v30, %v4878_v38 }
0x1ded   :  { %6140 = vmatmul.mubr.bf16.vlgmr.msra.gmra.mxu0 %v4900_v41 }
0x1dee   :  { %6179 = vmatprep.mubr.msk.bf16.mxu0 %vm7453_vm0, %v7452_v11 }
0x1ead   :  { %v4984_v26 = vpop.f32.mrf.mxu0 }
0x1eae   :  { %v4985_v43 = vadd.f32 %v4984_v26, %v4901_v44  ;;  %v6795_v26 = vld [vmem:[#allocation32 + $0x30] sm:$0xff]  }
0x1eaf   :  { %v6141_v45 = vpop.f32.mrf.mxu0 }
0x1eb0   :  { %4993 = vadd.xlane.f32.xlu0 %v4985_v43  ;;  %v4999_v33 = vmul.f32 %v4985_v43, %v4985_v43  ;;  %v6797_v45 = vld [vmem:[#allocation32 + $0x20] sm:$0xff]  }
0x1eb1   :  { %v4987_v31 = vpop.f32.mrf.mxu0 }
0x1eb2   :  { %v4988_v46 = vadd.f32 %v4987_v31, %v4901_v44  ;;  %v6794_v44 = vld [vmem:[#allocation32 + $0x38] sm:$0xff]  }
0x1eb3   :  { %v6142_v48 = vpop.f32.mrf.mxu0  ;;  %6164 = vmatpush3.bf16.msra.mxu0 %v6794_v44  ;;  %v6798_v31 = vld [vmem:[#allocation32 + $0x18] sm:$0xff]  }
0x1eb4   :  { %5001 = vadd.xlane.f32.xlu0 %v4999_v33  ;;  %4995 = vadd.xlane.f32.xlu1 %v4988_v46  ;;  %v5000_v49 = vmul.f32 %v4988_v46, %v4988_v46  ;;  %v6800_v33 = vld [vmem:[#allocation32 + $0x8] sm:$0xff]   ;;  %v6801_v48 = vld [vmem:[#allocation32] sm:$0xff]  }
0x1eb5   :  { %6165 = vmatprep.subr.bf16.mxu0 %v7452_v11 }
0x1eb7   :  { %6166 = vmatpush3.bf16.msra.mxu0 %v6795_v26 }
0x1eb8   :  { %5003 = vadd.xlane.f32.xlu1 %v5000_v49  ;;  %6167 = vmatprep.subr.bf16.mxu0 %v7452_v11 }
0x1f39   :  { %v4994_v53 = vpop.xlane.xlu0 %4993 }
0x1f3a   :  { %v4997_v54 = vmul.f32 0.015625, %v4994_v53 }
0x1f3c   :  { %v5007_v58 = vmul.f32 %v4997_v54, %v4997_v54  ;;  %v5011_v59 = vsub.f32 %v4985_v43, %v4997_v54  ;;  %v6796_v43 = vld [vmem:[#allocation32 + $0x28] sm:$0xff]  }
0x1f3d   :  { %v5002_v21 = vpop.xlane.xlu0 %5001  ;;  %v4996_v57 = vpop.xlane.xlu1 %4995  ;;  %6168 = vmatpush3.bf16.msra.mxu0 %v6796_v43 }
0x1f3e   :  { %v5005_v60 = vmul.f32 0.015625, %v5002_v21  ;;  %v4998_v55 = vmul.f32 0.015625, %v4996_v57  ;;  %6169 = vmatprep.subr.bf16.mxu0 %v7452_v11 }
0x1f40   :  { %v5009_v56 = vsub.f32 %v5005_v60, %v5007_v58  ;;  %v5008_v0 = vmul.f32 %v4998_v55, %v4998_v55  ;;  %v5012_v8 = vsub.f32 %v4988_v46, %v4998_v55  ;;  %v6799_v46 = vld [vmem:[#allocation32 + $0x10] sm:$0xff]  }
0x1f41   :  { %v5004_v63 = vpop.xlane.xlu1 %5003  ;;  %6170 = vmatpush3.bf16.msra.mxu0 %v6797_v45 }
0x1f42   :  { %v5013_v61 = vadd.f32 1e-05, %v5009_v56  ;;  %v5006_v12 = vmul.f32 0.015625, %v5004_v63  ;;  %6171 = vmatprep.subr.bf16.mxu0 %v7452_v11  ;;  %v5141_v63 = vld [vmem:[#allocation8 + $0x82] ss:$0 sm:$0xff] }
0x1f44   :  { %6954 = vrsqrt.f32 %v5013_v61  ;;  %v5010_v2 = vsub.f32 %v5006_v12, %v5008_v0 }
0x1f45   :  { %6172 = vmatpush3.bf16.msra.mxu0 %v6798_v31 }
0x1f46   :  { %v5014_v3 = vadd.f32 1e-05, %v5010_v2  ;;  %6173 = vmatprep.subr.bf16.mxu0 %v7452_v11 }
0x1f48   :  { %6956 = vrsqrt.f32 %v5014_v3 }
0x1f49   :  { %6174 = vmatpush3.bf16.msra.mxu0 %v6799_v46 }
0x1f4a   :  { %6175 = vmatprep.subr.bf16.mxu0 %v7452_v11 }
0x1f4d   :  { %6176 = vmatpush3.bf16.msra.mxu0 %v6800_v33 }
0x1f4e   :  { %6177 = vmatprep.subr.bf16.mxu0 %v7452_v11  ;;  %v5140_v11 = vld [vmem:[#allocation8 + $0x81] ss:$0 sm:$0xff] }
0x1f51   :  { %v6955_v4 = vpop.eup %6954  ;;  %6178 = vmatpush3.bf16.msra.mxu0 %v6801_v48 }
0x1f52   :  { %v5017_v7 = vmul.f32 %v6955_v4, %v5011_v59 }
0x1f54   :  { %v5019_v5 = vmul.f32 %v5017_v7, %v4991_v6 }
0x1f55   :  { %v6957_v15 = vpop.eup %6956 }
0x1f56   :  { %v5018_v39 = vmul.f32 %v6957_v15, %v5012_v8  ;;  %v5021_v1 = vadd.f32 %v5019_v5, %v4992_v14 }
0x1f58   :  { %v5020_v16 = vmul.f32 %v5018_v39, %v4991_v6  ;;  %v5025_v17 = vmul.f32 0.70710677, %v5021_v1  ;;  %v5023_v27 = vmul.f32 0.5, %v5021_v1 }
0x1f5a   :  { %v5022_v62 = vadd.f32 %v5020_v16, %v4992_v14  ;;  %6958 = verf.f32 %v5025_v17 }
0x1f5c   :  { %v5026_v20 = vmul.f32 0.70710677, %v5022_v62  ;;  %v5024_v13 = vmul.f32 0.5, %v5022_v62 }
0x1f5e   :  { %6960 = verf.f32 %v5026_v20  ;;  %v5199_v20 = vld [vmem:[#allocation8 + $0x83] ss:$0 sm:$0xff] }
0x1f67   :  { %v6959_v22 = vpop.eup %6958 }
0x1f68   :  { %v5029_v23 = vadd.f32 1.0, %v6959_v22 }
0x1f6a   :  { %v5031_v29 = vmul.f32 %v5029_v23, %v5023_v27 }
0x1f6b   :  { %v6961_v25 = vpop.eup %6960 }
0x1f6c   :  { %v5030_v28 = vadd.f32 1.0, %v6961_v25 }
0x1f6e   :  { %v5032_v34 = vmul.f32 %v5030_v28, %v5024_v13 }
0x1f70   :  { %v5049_v35 = vpack.c.bf16 %v5032_v34, %v5031_v29 }
0x1f72   :  { %6160 = vmatmul.mubr.bf16.vlgmr.msra.gmra.mxu1 %v5049_v35 }
0x2032   :  { %v5133_v19 = vpop.f32.mrf.mxu1 }
0x2033   :  { %v5134_v37 = vadd.f32 %v5133_v19, %v5050_v24 }
0x2034   :  { %v6161_v36 = vpop.f32.mrf.mxu1 }
0x2035   :  { %5142 = vadd.xlane.f32.xlu0 %v5134_v37  ;;  %v5148_v30 = vmul.f32 %v5134_v37, %v5134_v37 }
0x2036   :  { %v5136_v10 = vpop.f32.mrf.mxu1 }
0x2037   :  { %v5137_v38 = vadd.f32 %v5136_v10, %v5050_v24 }
0x2038   :  { %v6162_v18 = vpop.f32.mrf.mxu1 }
0x2039   :  { %5150 = vadd.xlane.f32.xlu0 %v5148_v30  ;;  %5144 = vadd.xlane.f32.xlu1 %v5137_v38  ;;  %v5149_v41 = vmul.f32 %v5137_v38, %v5137_v38 }
0x203d   :  { %5152 = vadd.xlane.f32.xlu1 %v5149_v41 }
0x20be   :  { %v5143_v49 = vpop.xlane.xlu0 %5142 }
0x20bf   :  { %v5146_v40 = vmul.f32 0.03125, %v5143_v49 }
0x20c1   :  { %v5156_v50 = vmul.f32 %v5146_v40, %v5146_v40  ;;  %v5160_v60 = vsub.f32 %v5134_v37, %v5146_v40 }
0x20c2   :  { %v5151_v32 = vpop.xlane.xlu0 %5150  ;;  %v5145_v9 = vpop.xlane.xlu1 %5144 }
0x20c3   :  { %v5154_v42 = vmul.f32 0.03125, %v5151_v32  ;;  %v5147_v51 = vmul.f32 0.03125, %v5145_v9 }
0x20c5   :  { %v5158_v47 = vsub.f32 %v5154_v42, %v5156_v50  ;;  %v5157_v54 = vmul.f32 %v5147_v51, %v5147_v51  ;;  %v5161_v61 = vsub.f32 %v5137_v38, %v5147_v51 }
0x20c6   :  { %v5153_v52 = vpop.xlane.xlu1 %5152 }
0x20c7   :  { %v5162_v53 = vadd.f32 1e-05, %v5158_v47  ;;  %v5155_v21 = vmul.f32 0.03125, %v5153_v52 }
0x20c9   :  { %6962 = vrsqrt.f32 %v5162_v53  ;;  %v5159_v57 = vsub.f32 %v5155_v21, %v5157_v54 }
0x20cb   :  { %v5163_v58 = vadd.f32 1e-05, %v5159_v57 }
0x20cd   :  { %6964 = vrsqrt.f32 %v5163_v58 }
0x20d6   :  { %v6963_v55 = vpop.eup %6962 }
0x20d7   :  { %v5166_v56 = vmul.f32 %v6963_v55, %v5160_v60 }
0x20d9   :  { %v5168_v0 = vmul.f32 %v5166_v56, %v5140_v11 }
0x20da   :  { %v6965_v12 = vpop.eup %6964 }
0x20db   :  { %v5167_v2 = vmul.f32 %v6965_v12, %v5161_v61  ;;  %v5170_v3 = vadd.f32 %v5168_v0, %v5141_v63 }
0x20dd   :  { %v5169_v59 = vmul.f32 %v5167_v2, %v5140_v11  ;;  %v5174_v4 = vmul.f32 0.70710677, %v5170_v3  ;;  %v5172_v15 = vmul.f32 0.5, %v5170_v3 }
0x20df   :  { %v5171_v6 = vadd.f32 %v5169_v59, %v5141_v63  ;;  %6966 = verf.f32 %v5174_v4 }
0x20e1   :  { %v5175_v7 = vmul.f32 0.70710677, %v5171_v6  ;;  %v5173_v39 = vmul.f32 0.5, %v5171_v6 }
0x20e3   :  { %6968 = verf.f32 %v5175_v7 }
0x20ec   :  { %v6967_v14 = vpop.eup %6966 }
0x20ed   :  { %v5178_v8 = vadd.f32 1.0, %v6967_v14 }
0x20ef   :  { %v5180_v16 = vmul.f32 %v5178_v8, %v5172_v15 }
0x20f0   :  { %v6969_v5 = vpop.eup %6968 }
0x20f1   :  { %v5179_v1 = vadd.f32 1.0, %v6969_v5 }
0x20f3   :  { %v5181_v17 = vmul.f32 %v5179_v1, %v5173_v39 }
0x20f5   :  { %v5198_v62 = vpack.c.bf16 %v5181_v17, %v5180_v16 }
0x20f7   :  { %6180 = vmatmul.mubr.bf16.vlgmr.msra.gmra.mxu0 %v5198_v62 }
0x21b7   :  { %v5282_v22 = vpop.f32.mrf.mxu0 }
0x21b8   :  { %v5283_v23 = vadd.f32 %v5282_v22, %v5199_v20 }
0x21b9   :  { %v6181_v25 = vpop.f32.mrf.mxu0 }
0x21ba   :  { %5289 = vst [vmem:[#allocation34] sm:$0xff] %v5283_v23 }
0x21bb   :  { %v5285_v27 = vpop.f32.mrf.mxu0 }
0x21bc   :  { %v5286_v13 = vadd.f32 %v5285_v27, %v5199_v20 }
0x21bd   :  { %v6182_v28 = vpop.f32.mrf.mxu0 }
0x21be   :  { %5290 = vst [vmem:[#allocation34 + $0x8] sm:$0xff] %v5286_v13 }
0x21bf   :  { %7389 = shalt.err (!%p7386_p6)
}
0x21c0   :  { %5302 = dma.vmem_to_hbm [thread:$0]  %s5297_s22, 256, %s8150_s20, [#allocation4], %s7423_s24, %s7423_s24, %s7424_s2  }
0x21c1   :  { %7420 = dma.done.wait [#allocation4], 256  }
0x21c2   :  { %7421 = vsyncadd [#allocation4], 4294967040 }
0x21c3   :  { %5306 = vsyncpa [#allocation3], 1 }
0x21c4   :  { %5307 = vsyncpa [#allocation6], 1 }
0x21c5   :  { %5308 = vsyncpa [#allocation9], 1 }
0x21c6   :  { %5309 = vsyncpa [#allocation12], 1 }
0x21c7   :  { %5310 = vsyncpa [#allocation15], 1 }
0x21c8   :  { %5311 = vsyncpa [#allocation18], 1 }
0x21c9   :  { %5312 = vsyncpa [#allocation21], 1 }
0x21ca   :  { %5313 = vsyncpa [#allocation24], 1 }
0x21cb   :  { %5314 = vsyncpa [#allocation27], 1 }
0x21cc   :  { %5315 = vsyncpa [#allocation30], 1 }
0x21cd   :  { %5316 = vsyncpa [#allocation33], 1 }
0x21ce   :  { %5317 = vsyncpa [#allocation4], 1 }

</bundles_post_ra>
